<compile_context>
chip_gen: v5e
topology: v5e:2x2
jax: 0.10.0
libtpu: 0.0.40
codegen_flags: <defaults>
</compile_context>

<pallas_src>
import functools
import math

import jax
import jax.numpy as jnp
from jax.experimental import pallas as pl
from jax.experimental.pallas import tpu as pltpu


COMPUTE_DTYPE = jnp.bfloat16
VMEM_LIMIT = 32 * 1024 * 1024


# --------------------------------------------------------------------------
# Tile-size selection (generation aware)
# --------------------------------------------------------------------------

def _m_tile_candidates():
    try:
        vmem = pltpu.get_tpu_info().vmem_capacity_bytes
    except Exception:
        vmem = 128 * 1024 * 1024
    if vmem >= 100 * 1024 * 1024:       # v5e / v6e: 128 MiB VMEM -> bigger M tiles
        return (1024, 512, 256, 128)
    return (512, 256, 128)              # v7x-class: 64 MiB VMEM -> smaller tiles


_NK_CANDIDATES = (512, 256, 128)


def _tile(dim, candidates):
    """Largest candidate that evenly divides `dim`, else the full dim (small shapes)."""
    for t in candidates:
        if dim >= t and dim % t == 0:
            return t
    return dim


# --------------------------------------------------------------------------
# Tiled linear (matmul + bias [+ relu] [+ scale] [+ additive epilogue])
# --------------------------------------------------------------------------

def _linear_kernel(x_ref, w_ref, b_ref, *rest, activation, scale, has_add):
    if has_add:
        add_ref, o_ref, acc_ref = rest
    else:
        o_ref, acc_ref = rest
    k = pl.program_id(2)

    @pl.when(k == 0)
    def _():
        acc_ref[...] = jnp.zeros_like(acc_ref)

    acc_ref[...] += jnp.dot(x_ref[...], w_ref[...],
                            preferred_element_type=jnp.float32)

    @pl.when(k == pl.num_programs(2) - 1)
    def _():
        y = acc_ref[...] + b_ref[...].astype(jnp.float32)
        if activation == "relu":
            y = jnp.maximum(y, 0.0)
        if scale != 1.0:
            y = y * jnp.float32(scale)
        if has_add:
            y = y + add_ref[...].astype(jnp.float32)
        o_ref[...] = y.astype(o_ref.dtype)


def linear(x, w, b, *, activation=None, scale=1.0, add=None, out_dtype=None):
    """x:(M,K) @ w:(K,N) + b, optional relu / scalar scale / elementwise add epilogue."""
    M, K = x.shape
    N = w.shape[1]
    out_dtype = out_dtype or x.dtype
    tm = _tile(M, _m_tile_candidates())
    tn = _tile(N, _NK_CANDIDATES)
    tk = _tile(K, _NK_CANDIDATES)
    grid = (M // tm, N // tn, K // tk)

    in_specs = [
        pl.BlockSpec((tm, tk), lambda i, j, k: (i, k)),
        pl.BlockSpec((tk, tn), lambda i, j, k: (k, j)),
        pl.BlockSpec((1, tn), lambda i, j, k: (0, j)),
    ]
    args = [x, w, b.reshape(1, N)]
    if add is not None:
        in_specs.append(pl.BlockSpec((tm, tn), lambda i, j, k: (i, j)))
        args.append(add)

    bytes_accessed = int(x.size * x.dtype.itemsize + w.size * w.dtype.itemsize
                         + M * N * jnp.dtype(out_dtype).itemsize)
    return pl.pallas_call(
        functools.partial(_linear_kernel, activation=activation, scale=scale,
                          has_add=add is not None),
        out_shape=jax.ShapeDtypeStruct((M, N), out_dtype),
        grid=grid,
        in_specs=in_specs,
        out_specs=pl.BlockSpec((tm, tn), lambda i, j, k: (i, j)),
        scratch_shapes=[pltpu.VMEM((tm, tn), jnp.float32)],
        compiler_params=pltpu.CompilerParams(
            dimension_semantics=("parallel", "parallel", "arbitrary"),
            vmem_limit_bytes=VMEM_LIMIT),
        cost_estimate=pl.CostEstimate(flops=2 * M * N * K, transcendentals=0,
                                      bytes_accessed=bytes_accessed),
    )(*args)


# --------------------------------------------------------------------------
# Tiled linear fused with residual add + LayerNorm epilogue (post-norm block)
# --------------------------------------------------------------------------

def _linear_res_ln_kernel(x_ref, w_ref, b_ref, r_ref, g_ref, bt_ref, o_ref, acc_ref,
                          *, eps):
    k = pl.program_id(1)

    @pl.when(k == 0)
    def _():
        acc_ref[...] = jnp.zeros_like(acc_ref)

    acc_ref[...] += jnp.dot(x_ref[...], w_ref[...],
                            preferred_element_type=jnp.float32)

    @pl.when(k == pl.num_programs(1) - 1)
    def _():
        h = (acc_ref[...] + b_ref[...].astype(jnp.float32)
             + r_ref[...].astype(jnp.float32))
        mu = jnp.mean(h, axis=-1, keepdims=True)
        var = jnp.mean((h - mu) * (h - mu), axis=-1, keepdims=True)
        y = (h - mu) * jax.lax.rsqrt(var + eps)
        o_ref[...] = (y * g_ref[...].astype(jnp.float32)
                      + bt_ref[...].astype(jnp.float32)).astype(o_ref.dtype)


def linear_residual_ln(x, w, b, res, gamma, beta, *, eps=1e-5, out_dtype=None):
    """out = LayerNorm(res + x @ w + b); N (=D) is kept as a single lane-dense block."""
    M, K = x.shape
    N = w.shape[1]
    out_dtype = out_dtype or res.dtype
    tm = _tile(M, _m_tile_candidates())
    tk = _tile(K, _NK_CANDIDATES)
    grid = (M // tm, K // tk)

    bytes_accessed = int(x.size * x.dtype.itemsize + w.size * w.dtype.itemsize
                         + 2 * M * N * jnp.dtype(out_dtype).itemsize)
    return pl.pallas_call(
        functools.partial(_linear_res_ln_kernel, eps=eps),
        out_shape=jax.ShapeDtypeStruct((M, N), out_dtype),
        grid=grid,
        in_specs=[
            pl.BlockSpec((tm, tk), lambda i, k: (i, k)),
            pl.BlockSpec((tk, N), lambda i, k: (k, 0)),
            pl.BlockSpec((1, N), lambda i, k: (0, 0)),
            pl.BlockSpec((tm, N), lambda i, k: (i, 0)),
            pl.BlockSpec((1, N), lambda i, k: (0, 0)),
            pl.BlockSpec((1, N), lambda i, k: (0, 0)),
        ],
        out_specs=pl.BlockSpec((tm, N), lambda i, k: (i, 0)),
        scratch_shapes=[pltpu.VMEM((tm, N), jnp.float32)],
        compiler_params=pltpu.CompilerParams(
            dimension_semantics=("parallel", "arbitrary"),
            vmem_limit_bytes=VMEM_LIMIT),
        cost_estimate=pl.CostEstimate(flops=2 * M * N * K, transcendentals=0,
                                      bytes_accessed=bytes_accessed),
    )(x, w, b.reshape(1, N), res, gamma.reshape(1, N), beta.reshape(1, N))


# --------------------------------------------------------------------------
# Attention (all heads per grid step, mask optional / generated in-kernel)
# --------------------------------------------------------------------------

def _self_attn_kernel(*refs, n_heads, causal, has_pad):
    if has_pad:
        pad_ref, qkv_ref, o_ref = refs
    else:
        qkv_ref, o_ref = refs
    qkv = qkv_ref[0].astype(jnp.float32)            # (L, 3D)
    L = qkv.shape[0]
    D = qkv.shape[1] // 3
    dh = D // n_heads
    scale = 1.0 / math.sqrt(dh)

    mask = None
    if causal:
        row = jax.lax.broadcasted_iota(jnp.int32, (L, L), 0)
        col = jax.lax.broadcasted_iota(jnp.int32, (L, L), 1)
        mask = col > row
    if has_pad:
        pad = pad_ref[0] > 0.5                      # (1, L) bool, broadcast over queries
        mask = pad if mask is None else (mask | pad)

    outs = []
    for h in range(n_heads):
        qh = qkv[:, h * dh:(h + 1) * dh] * scale
        kh = qkv[:, D + h * dh: D + (h + 1) * dh]
        vh = qkv[:, 2 * D + h * dh: 2 * D + (h + 1) * dh]
        s = jax.lax.dot_general(qh, kh, (((1,), (1,)), ((), ())),
                                preferred_element_type=jnp.float32)
        if mask is not None:
            s = jnp.where(mask, jnp.float32(-1e30), s)
        s = s - jnp.max(s, axis=-1, keepdims=True)
        p = jnp.exp(s)
        p = p * pl.reciprocal(jnp.sum(p, axis=-1, keepdims=True), approx=True)
        outs.append(jnp.dot(p, vh, preferred_element_type=jnp.float32))
    o_ref[0] = jnp.concatenate(outs, axis=-1).astype(o_ref.dtype)


def self_attention(qkv, *, n_heads, pad_mask=None, causal=False):
    """qkv: (B, L, 3D) fused projection; pad_mask: (B, 1, L) float (1.0 = masked) or None."""
    B, L, D3 = qkv.shape
    D = D3 // 3
    has_pad = pad_mask is not None
    in_specs, args = [], []
    if has_pad:
        in_specs.append(pl.BlockSpec((1, 1, L), lambda b: (b, 0, 0)))
        args.append(pad_mask.astype(jnp.float32))
    in_specs.append(pl.BlockSpec((1, L, D3), lambda b: (b, 0, 0)))
    args.append(qkv)
    return pl.pallas_call(
        functools.partial(_self_attn_kernel, n_heads=n_heads, causal=causal,
                          has_pad=has_pad),
        out_shape=jax.ShapeDtypeStruct((B, L, D), qkv.dtype),
        grid=(B,),
        in_specs=in_specs,
        out_specs=pl.BlockSpec((1, L, D), lambda b: (b, 0, 0)),
        compiler_params=pltpu.CompilerParams(
            dimension_semantics=("parallel",),
            vmem_limit_bytes=VMEM_LIMIT),
    )(*args)


def _cross_attn_kernel(q_ref, kv_ref, o_ref, *, n_heads):
    q = q_ref[0].astype(jnp.float32)                # (Lq, D)
    kv = kv_ref[0].astype(jnp.float32)              # (Lk, 2D)
    D = q.shape[1]
    dh = D // n_heads
    scale = 1.0 / math.sqrt(dh)
    outs = []
    for h in range(n_heads):
        qh = q[:, h * dh:(h + 1) * dh] * scale
        kh = kv[:, h * dh:(h + 1) * dh]
        vh = kv[:, D + h * dh: D + (h + 1) * dh]
        s = jax.lax.dot_general(qh, kh, (((1,), (1,)), ((), ())),
                                preferred_element_type=jnp.float32)
        s = s - jnp.max(s, axis=-1, keepdims=True)
        p = jnp.exp(s)
        p = p * pl.reciprocal(jnp.sum(p, axis=-1, keepdims=True), approx=True)
        outs.append(jnp.dot(p, vh, preferred_element_type=jnp.float32))
    o_ref[0] = jnp.concatenate(outs, axis=-1).astype(o_ref.dtype)


def cross_attention(q, kv, *, n_heads):
    """q: (B, Lq, D); kv: (B, Lk, 2D) fused K|V projection; src_mask is None (no mask)."""
    B, Lq, D = q.shape
    Lk = kv.shape[1]
    return pl.pallas_call(
        functools.partial(_cross_attn_kernel, n_heads=n_heads),
        out_shape=jax.ShapeDtypeStruct((B, Lq, D), q.dtype),
        grid=(B,),
        in_specs=[pl.BlockSpec((1, Lq, D), lambda b: (b, 0, 0)),
                  pl.BlockSpec((1, Lk, 2 * D), lambda b: (b, 0, 0))],
        out_specs=pl.BlockSpec((1, Lq, D), lambda b: (b, 0, 0)),
        compiler_params=pltpu.CompilerParams(
            dimension_semantics=("parallel",),
            vmem_limit_bytes=VMEM_LIMIT),
    )(q, kv)


# --------------------------------------------------------------------------
# Model glue (encoder / decoder layers)
# --------------------------------------------------------------------------

def encoder_layer(x, p, n_heads):
    B, L, D = x.shape
    x2d = x.reshape(B * L, D)
    qkv = linear(x2d, p["mha"]["wqkv"], p["mha"]["bqkv"])              # fused QKV
    attn = self_attention(qkv.reshape(B, L, 3 * D), n_heads=n_heads)   # no mask
    x2d = linear_residual_ln(attn.reshape(B * L, D), p["mha"]["wo"], p["mha"]["bo"],
                             x2d, p["ln1_g"], p["ln1_b"])
    h = linear(x2d, p["ffn_w1"], p["ffn_b1"], activation="relu")
    x2d = linear_residual_ln(h, p["ffn_w2"], p["ffn_b2"], x2d, p["ln2_g"], p["ln2_b"])
    return x2d.reshape(B, L, D)


def decoder_layer(y, p, enc_out, pad_mask, n_heads):
    B, T, D = y.shape
    S = enc_out.shape[1]
    y2d = y.reshape(B * T, D)

    # masked self-attention (pad mask streamed, causal mask generated in-kernel)
    qkv = linear(y2d, p["self_mha"]["wqkv"], p["self_mha"]["bqkv"])
    sa = self_attention(qkv.reshape(B, T, 3 * D), n_heads=n_heads,
                        pad_mask=pad_mask, causal=True)
    y2d = linear_residual_ln(sa.reshape(B * T, D), p["self_mha"]["wo"],
                             p["self_mha"]["bo"], y2d, p["ln1_g"], p["ln1_b"])

    # cross-attention over encoder output (src_mask is None -> no mask streamed)
    q = linear(y2d, p["cross_mha"]["wq"], p["cross_mha"]["bq"])
    kv = linear(enc_out.reshape(B * S, D), p["cross_mha"]["wkv"], p["cross_mha"]["bkv"])
    ca = cross_attention(q.reshape(B, T, D), kv.reshape(B, S, 2 * D), n_heads=n_heads)
    y2d = linear_residual_ln(ca.reshape(B * T, D), p["cross_mha"]["wo"],
                             p["cross_mha"]["bo"], y2d, p["ln2_g"], p["ln2_b"])

    # FFN
    h = linear(y2d, p["ffn_w1"], p["ffn_b1"], activation="relu")
    y2d = linear_residual_ln(h, p["ffn_w2"], p["ffn_b2"], y2d, p["ln3_g"], p["ln3_b"])
    return y2d.reshape(B, T, D)


def sinusoid_pe(length, dim):
    pos = jnp.arange(length, dtype=jnp.float32)[:, None]
    div = jnp.exp(jnp.arange(0, dim, 2, dtype=jnp.float32) * (-math.log(10000.0) / dim))
    pe = jnp.zeros((length, dim), dtype=jnp.float32)
    pe = pe.at[:, 0::2].set(jnp.sin(pos * div))
    pe = pe.at[:, 1::2].set(jnp.cos(pos * div))
    return pe


def transformer2d_forward(params, src, trg, cfg):
    B, Cin, H, W = src.shape
    D = cfg["hidden_dim"]
    n_heads = cfg["n_heads"]
    classes = cfg["classes"]
    T = trg.shape[1]
    S = H * W

    # ---- FeatureExtractor head (1x1 conv + ReLU) fused with 0.1*x + 2D PE epilogue ----
    tokens = src.transpose(0, 2, 3, 1).reshape(B * S, Cin).astype(COMPUTE_DTYPE)
    pe2d_tiled = jnp.tile(params["pe2d"], (B, 1))                      # (B*S, D) f32
    src_seq = linear(tokens, params["fe_w"], params["fe_b"],
                     activation="relu", scale=0.1, add=pe2d_tiled).reshape(B, S, D)

    # ---- target pad mask (causal part is generated inside the attention kernel) ----
    pad = (trg == classes)
    pad = pad.at[:, 0].set(False)
    pad_mask = pad[:, None, :].astype(jnp.float32)                     # (B, 1, T)

    # ---- target embedding + 1D positional encoding (tiny gather/add, JAX glue) ----
    trg_emb = (jnp.take(params["emb"], trg, axis=0).astype(jnp.float32)
               + params["pe1d"][:T]).astype(COMPUTE_DTYPE)             # (B, T, D)

    # ---- encoder / decoder stacks ----
    x = src_seq
    for p in params["enc_layers"]:
        x = encoder_layer(x, p, n_heads)
    enc_out = x

    y = trg_emb
    for p in params["dec_layers"]:
        y = decoder_layer(y, p, enc_out, pad_mask, n_heads)

    # ---- output projection (lane-padded weight -> lane-dense store, slice back) ----
    logits = linear(y.reshape(B * T, D), params["out_w"], params["out_b"],
                    out_dtype=jnp.float32)
    return logits[:, :classes].reshape(B, T, classes)


# --------------------------------------------------------------------------
# Deterministic parameter initialization (weights bf16, bias/LN/PE f32)
# --------------------------------------------------------------------------

def _init_linear(key, k_in, k_out, scale=0.02):
    w = (scale * jax.random.normal(key, (k_in, k_out), jnp.float32)).astype(COMPUTE_DTYPE)
    b = jnp.zeros((k_out,), jnp.float32)
    return w, b


def _init_self_mha(key, d):
    k1, k2 = jax.random.split(key)
    wqkv, bqkv = _init_linear(k1, d, 3 * d)
    wo, bo = _init_linear(k2, d, d)
    return dict(wqkv=wqkv, bqkv=bqkv, wo=wo, bo=bo)


def _init_cross_mha(key, d):
    k1, k2, k3 = jax.random.split(key, 3)
    wq, bq = _init_linear(k1, d, d)
    wkv, bkv = _init_linear(k2, d, 2 * d)
    wo, bo = _init_linear(k3, d, d)
    return dict(wq=wq, bq=bq, wkv=wkv, bkv=bkv, wo=wo, bo=bo)


def _ln_params(d):
    return jnp.ones((d,), jnp.float32), jnp.zeros((d,), jnp.float32)


def _init_enc_layer(key, d, f):
    ks = jax.random.split(key, 3)
    w1, b1 = _init_linear(ks[1], d, f)
    w2, b2 = _init_linear(ks[2], f, d)
    g1, bt1 = _ln_params(d)
    g2, bt2 = _ln_params(d)
    return dict(mha=_init_self_mha(ks[0], d),
                ffn_w1=w1, ffn_b1=b1, ffn_w2=w2, ffn_b2=b2,
                ln1_g=g1, ln1_b=bt1, ln2_g=g2, ln2_b=bt2)


def _init_dec_layer(key, d, f):
    ks = jax.random.split(key, 4)
    w1, b1 = _init_linear(ks[2], d, f)
    w2, b2 = _init_linear(ks[3], f, d)
    g1, bt1 = _ln_params(d)
    g2, bt2 = _ln_params(d)
    g3, bt3 = _ln_params(d)
    return dict(self_mha=_init_self_mha(ks[0], d), cross_mha=_init_cross_mha(ks[1], d),
                ffn_w1=w1, ffn_b1=b1, ffn_w2=w2, ffn_b2=b2,
                ln1_g=g1, ln1_b=bt1, ln2_g=g2, ln2_b=bt2, ln3_g=g3, ln3_b=bt3)


def init_params(key, cfg, H, W, max_trg_len):
    D, F, C = cfg["hidden_dim"], cfg["ffn_dim"], cfg["classes"]
    nl = cfg["num_layers"]
    keys = jax.random.split(key, 3 + 2 * nl)
    fe_w, fe_b = _init_linear(keys[0], cfg["in_features"], D)
    emb = (0.02 * jax.random.normal(keys[1], (C, D), jnp.float32)).astype(COMPUTE_DTYPE)

    # logits weight zero-padded to a multiple of 128 lanes (lane-dense output stores)
    c_pad = ((C + 127) // 128) * 128
    out_core = 0.02 * jax.random.normal(keys[2], (D, C), jnp.float32)
    out_w = jnp.zeros((D, c_pad), jnp.float32).at[:, :C].set(out_core).astype(COMPUTE_DTYPE)
    out_b = jnp.zeros((c_pad,), jnp.float32)

    enc_layers = [_init_enc_layer(keys[3 + i], D, F) for i in range(nl)]
    dec_layers = [_init_dec_layer(keys[3 + nl + i], D, F) for i in range(nl)]

    pe_h = sinusoid_pe(H, D)
    pe_w = sinusoid_pe(W, D)
    pe2d = (pe_h[:, None, :] + pe_w[None, :, :]).reshape(H * W, D)
    pe1d = sinusoid_pe(max_trg_len, D)
    return dict(fe_w=fe_w, fe_b=fe_b, emb=emb, out_w=out_w, out_b=out_b,
                enc_layers=enc_layers, dec_layers=dec_layers, pe2d=pe2d, pe1d=pe1d)


# --------------------------------------------------------------------------
# Main
# --------------------------------------------------------------------------

if __name__ == "__main__":
    cfg = dict(classes=10, in_features=16, hidden_dim=32, ffn_dim=64,
               n_heads=4, num_layers=2)
    B, Cin, H, W = 2, cfg["in_features"], 4, 4
    T = 8

    key = jax.random.PRNGKey(0)
    k_src, k_trg, k_params = jax.random.split(key, 3)

    # src: pre-extracted backbone feature map (NCHW); trg: token ids
    src = jax.random.normal(k_src, (B, Cin, H, W), jnp.float32)
    trg = jax.random.randint(k_trg, (B, T), 0, cfg["classes"], dtype=jnp.int32)

    params = init_params(k_params, cfg, H, W, max_trg_len=T)

    fwd = jax.jit(functools.partial(transformer2d_forward, cfg=cfg))
    logits = fwd(params, src, trg)
    logits = jax.block_until_ready(logits)

    assert logits.shape == (B, T, cfg["classes"])
    assert bool(jnp.all(jnp.isfinite(logits)))
    print("KERNEL_OK")
</pallas_src>

<mosaic_0001>
module attributes {stable_mosaic.version = 11 : i64} {
  func.func @_linear_kernel(%arg0: i32, %arg1: i32, %arg2: i32, %arg3: memref<32x32xbf16, #tpu.memory_space<vmem>>, %arg4: memref<32x96xbf16, #tpu.memory_space<vmem>>, %arg5: memref<1x96xf32, #tpu.memory_space<vmem>>, %arg6: memref<32x96xbf16, #tpu.memory_space<vmem>>, %arg7: memref<32x96xf32, #tpu.memory_space<vmem>>) attributes {dimension_semantics = [#tpu.dimension_semantics<parallel>, #tpu.dimension_semantics<parallel>, #tpu.dimension_semantics<arbitrary>], iteration_bounds = array<i64: 1, 1, 1>, scalar_prefetch = 0 : i64, scratch_operands = 1 : i64, tpu.core_type = #tpu.core_type<tc>, window_params = [{transform_indices = @transform_0, window_bounds = array<i64: 32, 32>}, {transform_indices = @transform_1, window_bounds = array<i64: 32, 96>}, {transform_indices = @transform_2, window_bounds = array<i64: 1, 96>}, {transform_indices = @transform_3, window_bounds = array<i64: 32, 96>}]} {
    %c0_i32 = arith.constant 0 : i32
    %0 = arith.cmpi eq, %arg2, %c0_i32 : i32
    %1 = arith.extui %0 : i1 to i32
    %c0_i32_0 = arith.constant 0 : i32
    %2 = arith.cmpi ne, %1, %c0_i32_0 : i32
    scf.if %2 {
      %cst_10 = arith.constant 0.000000e+00 : f32
      %12 = vector.broadcast %cst_10 : f32 to vector<32x96xf32>
      %c0_11 = arith.constant 0 : index
      %c0_12 = arith.constant 0 : index
      %13 = vector.load %arg7[%c0_11, %c0_12] : memref<32x96xf32, #tpu.memory_space<vmem>>, vector<32x96xf32>
      tpu.vector_store %arg7[%c0_11, %c0_12], %12 {strides = array<i32>} : memref<32x96xf32, #tpu.memory_space<vmem>>, vector<32x96xf32>,
    } else {
    }
    %c0 = arith.constant 0 : index
    %c0_1 = arith.constant 0 : index
    %3 = vector.load %arg7[%c0, %c0_1] : memref<32x96xf32, #tpu.memory_space<vmem>>, vector<32x96xf32>
    %c0_2 = arith.constant 0 : index
    %c0_3 = arith.constant 0 : index
    %4 = vector.load %arg3[%c0_2, %c0_3] : memref<32x32xbf16, #tpu.memory_space<vmem>>, vector<32x32xbf16>
    %c0_4 = arith.constant 0 : index
    %c0_5 = arith.constant 0 : index
    %5 = vector.load %arg4[%c0_4, %c0_5] : memref<32x96xbf16, #tpu.memory_space<vmem>>, vector<32x96xbf16>
    %cst = arith.constant dense<0.000000e+00> : vector<32x96xf32>
    %6 = tpu.matmul %4, %5, %cst {dimension_numbers = #tpu.dot_dimension_numbers<[1], [0], [0], [1], [0, 0, 1, 1], [], []>} : vector<32x32xbf16>, vector<32x96xbf16>, vector<32x96xf32> -> vector<32x96xf32>
    %7 = arith.addf %3, %6 : vector<32x96xf32>
    %c0_6 = arith.constant 0 : index
    %c0_7 = arith.constant 0 : index
    %8 = vector.load %arg7[%c0_6, %c0_7] : memref<32x96xf32, #tpu.memory_space<vmem>>, vector<32x96xf32>
    tpu.vector_store %arg7[%c0_6, %c0_7], %7 {strides = array<i32>} : memref<32x96xf32, #tpu.memory_space<vmem>>, vector<32x96xf32>,
    %c0_i32_8 = arith.constant 0 : i32
    %9 = arith.cmpi eq, %arg2, %c0_i32_8 : i32
    %10 = arith.extui %9 : i1 to i32
    %c0_i32_9 = arith.constant 0 : i32
    %11 = arith.cmpi ne, %10, %c0_i32_9 : i32
    scf.if %11 {
      %c0_10 = arith.constant 0 : index
      %c0_11 = arith.constant 0 : index
      %12 = vector.load %arg7[%c0_10, %c0_11] : memref<32x96xf32, #tpu.memory_space<vmem>>, vector<32x96xf32>
      %c0_12 = arith.constant 0 : index
      %c0_13 = arith.constant 0 : index
      %13 = vector.load %arg5[%c0_12, %c0_13] : memref<1x96xf32, #tpu.memory_space<vmem>>, vector<1x96xf32>
      %14 = vector.broadcast %13 : vector<1x96xf32> to vector<32x96xf32>
      %15 = arith.addf %12, %14 : vector<32x96xf32>
      %16 = arith.truncf %15 : vector<32x96xf32> to vector<32x96xbf16>
      %c0_14 = arith.constant 0 : index
      %c0_15 = arith.constant 0 : index
      %17 = vector.load %arg6[%c0_14, %c0_15] : memref<32x96xbf16, #tpu.memory_space<vmem>>, vector<32x96xbf16>
      tpu.vector_store %arg6[%c0_14, %c0_15], %16 {strides = array<i32>} : memref<32x96xbf16, #tpu.memory_space<vmem>>, vector<32x96xbf16>,
    } else {
    }
    return
  }
  func.func @transform_0(%arg0: i32, %arg1: i32, %arg2: i32) -> (i32, i32) {
    %c0_i32 = arith.constant 0 : i32
    return %arg0, %arg2 : i32, i32
  }
  func.func @transform_1(%arg0: i32, %arg1: i32, %arg2: i32) -> (i32, i32) {
    %c0_i32 = arith.constant 0 : i32
    return %arg2, %arg1 : i32, i32
  }
  func.func @transform_2(%arg0: i32, %arg1: i32, %arg2: i32) -> (i32, i32) {
    %c0_i32 = arith.constant 0 : i32
    %c0_i32_0 = arith.constant 0 : i32
    return %c0_i32, %arg1 : i32, i32
  }
  func.func @transform_3(%arg0: i32, %arg1: i32, %arg2: i32) -> (i32, i32) {
    %c0_i32 = arith.constant 0 : i32
    return %arg0, %arg1 : i32, i32
  }
}

module attributes {stable_mosaic.version = 11 : i64} {
  func.func @_linear_kernel(%arg0: i32, %arg1: i32, %arg2: i32, %arg3: memref<32x16xbf16, #tpu.memory_space<vmem>>, %arg4: memref<16x32xbf16, #tpu.memory_space<vmem>>, %arg5: memref<1x32xf32, #tpu.memory_space<vmem>>, %arg6: memref<32x32xf32, #tpu.memory_space<vmem>>, %arg7: memref<32x32xbf16, #tpu.memory_space<vmem>>, %arg8: memref<32x32xf32, #tpu.memory_space<vmem>>) attributes {dimension_semantics = [#tpu.dimension_semantics<parallel>, #tpu.dimension_semantics<parallel>, #tpu.dimension_semantics<arbitrary>], iteration_bounds = array<i64: 1, 1, 1>, scalar_prefetch = 0 : i64, scratch_operands = 1 : i64, tpu.core_type = #tpu.core_type<tc>, window_params = [{transform_indices = @transform_0, window_bounds = array<i64: 32, 16>}, {transform_indices = @transform_1, window_bounds = array<i64: 16, 32>}, {transform_indices = @transform_2, window_bounds = array<i64: 1, 32>}, {transform_indices = @transform_3, window_bounds = array<i64: 32, 32>}, {transform_indices = @transform_4, window_bounds = array<i64: 32, 32>}]} {
    %c0_i32 = arith.constant 0 : i32
    %0 = arith.cmpi eq, %arg2, %c0_i32 : i32
    %1 = arith.extui %0 : i1 to i32
    %c0_i32_0 = arith.constant 0 : i32
    %2 = arith.cmpi ne, %1, %c0_i32_0 : i32
    scf.if %2 {
      %cst_10 = arith.constant 0.000000e+00 : f32
      %12 = vector.broadcast %cst_10 : f32 to vector<32x32xf32>
      %c0_11 = arith.constant 0 : index
      %c0_12 = arith.constant 0 : index
      %13 = vector.load %arg8[%c0_11, %c0_12] : memref<32x32xf32, #tpu.memory_space<vmem>>, vector<32x32xf32>
      tpu.vector_store %arg8[%c0_11, %c0_12], %12 {strides = array<i32>} : memref<32x32xf32, #tpu.memory_space<vmem>>, vector<32x32xf32>,
    } else {
    }
    %c0 = arith.constant 0 : index
    %c0_1 = arith.constant 0 : index
    %3 = vector.load %arg8[%c0, %c0_1] : memref<32x32xf32, #tpu.memory_space<vmem>>, vector<32x32xf32>
    %c0_2 = arith.constant 0 : index
    %c0_3 = arith.constant 0 : index
    %4 = vector.load %arg3[%c0_2, %c0_3] : memref<32x16xbf16, #tpu.memory_space<vmem>>, vector<32x16xbf16>
    %c0_4 = arith.constant 0 : index
    %c0_5 = arith.constant 0 : index
    %5 = vector.load %arg4[%c0_4, %c0_5] : memref<16x32xbf16, #tpu.memory_space<vmem>>, vector<16x32xbf16>
    %cst = arith.constant dense<0.000000e+00> : vector<32x32xf32>
    %6 = tpu.matmul %4, %5, %cst {dimension_numbers = #tpu.dot_dimension_numbers<[1], [0], [0], [1], [0, 0, 1, 1], [], []>} : vector<32x16xbf16>, vector<16x32xbf16>, vector<32x32xf32> -> vector<32x32xf32>
    %7 = arith.addf %3, %6 : vector<32x32xf32>
    %c0_6 = arith.constant 0 : index
    %c0_7 = arith.constant 0 : index
    %8 = vector.load %arg8[%c0_6, %c0_7] : memref<32x32xf32, #tpu.memory_space<vmem>>, vector<32x32xf32>
    tpu.vector_store %arg8[%c0_6, %c0_7], %7 {strides = array<i32>} : memref<32x32xf32, #tpu.memory_space<vmem>>, vector<32x32xf32>,
    %c0_i32_8 = arith.constant 0 : i32
    %9 = arith.cmpi eq, %arg2, %c0_i32_8 : i32
    %10 = arith.extui %9 : i1 to i32
    %c0_i32_9 = arith.constant 0 : i32
    %11 = arith.cmpi ne, %10, %c0_i32_9 : i32
    scf.if %11 {
      %c0_10 = arith.constant 0 : index
      %c0_11 = arith.constant 0 : index
      %12 = vector.load %arg8[%c0_10, %c0_11] : memref<32x32xf32, #tpu.memory_space<vmem>>, vector<32x32xf32>
      %c0_12 = arith.constant 0 : index
      %c0_13 = arith.constant 0 : index
      %13 = vector.load %arg5[%c0_12, %c0_13] : memref<1x32xf32, #tpu.memory_space<vmem>>, vector<1x32xf32>
      %14 = vector.broadcast %13 : vector<1x32xf32> to vector<32x32xf32>
      %15 = arith.addf %12, %14 : vector<32x32xf32>
      %cst_14 = arith.constant 0.000000e+00 : f32
      %16 = vector.broadcast %cst_14 : f32 to vector<32x32xf32>
      %17 = arith.maximumf %15, %16 : vector<32x32xf32>
      %cst_15 = arith.constant 1.000000e-01 : f32
      %18 = vector.broadcast %cst_15 : f32 to vector<32x32xf32>
      %19 = arith.mulf %17, %18 : vector<32x32xf32>
      %c0_16 = arith.constant 0 : index
      %c0_17 = arith.constant 0 : index
      %20 = vector.load %arg6[%c0_16, %c0_17] : memref<32x32xf32, #tpu.memory_space<vmem>>, vector<32x32xf32>
      %21 = arith.addf %19, %20 : vector<32x32xf32>
      %22 = arith.truncf %21 : vector<32x32xf32> to vector<32x32xbf16>
      %c0_18 = arith.constant 0 : index
      %c0_19 = arith.constant 0 : index
      %23 = vector.load %arg7[%c0_18, %c0_19] : memref<32x32xbf16, #tpu.memory_space<vmem>>, vector<32x32xbf16>
      tpu.vector_store %arg7[%c0_18, %c0_19], %22 {strides = array<i32>} : memref<32x32xbf16, #tpu.memory_space<vmem>>, vector<32x32xbf16>,
    } else {
    }
    return
  }
  func.func @transform_0(%arg0: i32, %arg1: i32, %arg2: i32) -> (i32, i32) {
    %c0_i32 = arith.constant 0 : i32
    return %arg0, %arg2 : i32, i32
  }
  func.func @transform_1(%arg0: i32, %arg1: i32, %arg2: i32) -> (i32, i32) {
    %c0_i32 = arith.constant 0 : i32
    return %arg2, %arg1 : i32, i32
  }
  func.func @transform_2(%arg0: i32, %arg1: i32, %arg2: i32) -> (i32, i32) {
    %c0_i32 = arith.constant 0 : i32
    %c0_i32_0 = arith.constant 0 : i32
    return %c0_i32, %arg1 : i32, i32
  }
  func.func @transform_3(%arg0: i32, %arg1: i32, %arg2: i32) -> (i32, i32) {
    %c0_i32 = arith.constant 0 : i32
    return %arg0, %arg1 : i32, i32
  }
  func.func @transform_4(%arg0: i32, %arg1: i32, %arg2: i32) -> (i32, i32) {
    %c0_i32 = arith.constant 0 : i32
    return %arg0, %arg1 : i32, i32
  }
}

module attributes {stable_mosaic.version = 11 : i64} {
  func.func @_self_attn_kernel(%arg0: i32, %arg1: memref<1x16x96xbf16, #tpu.memory_space<vmem>>, %arg2: memref<1x16x32xbf16, #tpu.memory_space<vmem>>) attributes {dimension_semantics = [#tpu.dimension_semantics<parallel>], iteration_bounds = array<i64: 2>, scalar_prefetch = 0 : i64, scratch_operands = 0 : i64, tpu.core_type = #tpu.core_type<tc>, window_params = [{transform_indices = @transform_0, window_bounds = array<i64: 1, 16, 96>}, {transform_indices = @transform_1, window_bounds = array<i64: 1, 16, 32>}]} {
    %c0 = arith.constant 0 : index
    %c0_0 = arith.constant 0 : index
    %c0_1 = arith.constant 0 : index
    %0 = vector.load %arg1[%c0, %c0_0, %c0_1] : memref<1x16x96xbf16, #tpu.memory_space<vmem>>, vector<1x16x96xbf16>
    %1 = vector.shape_cast %0 : vector<1x16x96xbf16> to vector<16x96xbf16>
    %2 = arith.extf %1 : vector<16x96xbf16> to vector<16x96xf32>
    %3 = vector.extract_strided_slice %2 {offsets = [0, 0], sizes = [16, 8], strides = [1, 1]} : vector<16x96xf32> to vector<16x8xf32>
    %cst = arith.constant 0.353553385 : f32
    %4 = vector.broadcast %cst : f32 to vector<16x8xf32>
    %5 = arith.mulf %3, %4 : vector<16x8xf32>
    %6 = vector.extract_strided_slice %2 {offsets = [0, 32], sizes = [16, 8], strides = [1, 1]} : vector<16x96xf32> to vector<16x8xf32>
    %7 = vector.extract_strided_slice %2 {offsets = [0, 64], sizes = [16, 8], strides = [1, 1]} : vector<16x96xf32> to vector<16x8xf32>
    %cst_2 = arith.constant dense<0.000000e+00> : vector<16x16xf32>
    %8 = tpu.matmul %5, %6, %cst_2 {dimension_numbers = #tpu.dot_dimension_numbers<[1], [1], [0], [0], [0, 0, 1, 0], [], []>} : vector<16x8xf32>, vector<16x8xf32>, vector<16x16xf32> -> vector<16x16xf32>
    %cst_3 = arith.constant dense<0xFF800000> : vector<16xf32>
    %9 = vector.multi_reduction <maximumf>, %8, %cst_3 [1] : vector<16x16xf32> to vector<16xf32>
    %10 = vector.shape_cast %9 : vector<16xf32> to vector<16x1xf32>
    %11 = vector.broadcast %10 : vector<16x1xf32> to vector<16x16xf32>
    %12 = arith.subf %8, %11 : vector<16x16xf32>
    %13 = math.exp %12 : vector<16x16xf32>
    %cst_4 = arith.constant dense<0.000000e+00> : vector<16xf32>
    %14 = vector.multi_reduction <add>, %13, %cst_4 [1] : vector<16x16xf32> to vector<16xf32>
    %15 = vector.shape_cast %14 : vector<16xf32> to vector<16x1xf32>
    %16 = tpu.reciprocal %15 {approx = true} : vector<16x1xf32> -> vector<16x1xf32>
    %17 = vector.broadcast %16 : vector<16x1xf32> to vector<16x16xf32>
    %18 = arith.mulf %13, %17 : vector<16x16xf32>
    %cst_5 = arith.constant dense<0.000000e+00> : vector<16x8xf32>
    %19 = tpu.matmul %18, %7, %cst_5 {dimension_numbers = #tpu.dot_dimension_numbers<[1], [0], [0], [1], [0, 0, 1, 1], [], []>} : vector<16x16xf32>, vector<16x8xf32>, vector<16x8xf32> -> vector<16x8xf32>
    %20 = vector.extract_strided_slice %2 {offsets = [0, 8], sizes = [16, 8], strides = [1, 1]} : vector<16x96xf32> to vector<16x8xf32>
    %cst_6 = arith.constant 0.353553385 : f32
    %21 = vector.broadcast %cst_6 : f32 to vector<16x8xf32>
    %22 = arith.mulf %20, %21 : vector<16x8xf32>
    %23 = vector.extract_strided_slice %2 {offsets = [0, 40], sizes = [16, 8], strides = [1, 1]} : vector<16x96xf32> to vector<16x8xf32>
    %24 = vector.extract_strided_slice %2 {offsets = [0, 72], sizes = [16, 8], strides = [1, 1]} : vector<16x96xf32> to vector<16x8xf32>
    %cst_7 = arith.constant dense<0.000000e+00> : vector<16x16xf32>
    %25 = tpu.matmul %22, %23, %cst_7 {dimension_numbers = #tpu.dot_dimension_numbers<[1], [1], [0], [0], [0, 0, 1, 0], [], []>} : vector<16x8xf32>, vector<16x8xf32>, vector<16x16xf32> -> vector<16x16xf32>
    %cst_8 = arith.constant dense<0xFF800000> : vector<16xf32>
    %26 = vector.multi_reduction <maximumf>, %25, %cst_8 [1] : vector<16x16xf32> to vector<16xf32>
    %27 = vector.shape_cast %26 : vector<16xf32> to vector<16x1xf32>
    %28 = vector.broadcast %27 : vector<16x1xf32> to vector<16x16xf32>
    %29 = arith.subf %25, %28 : vector<16x16xf32>
    %30 = math.exp %29 : vector<16x16xf32>
    %cst_9 = arith.constant dense<0.000000e+00> : vector<16xf32>
    %31 = vector.multi_reduction <add>, %30, %cst_9 [1] : vector<16x16xf32> to vector<16xf32>
    %32 = vector.shape_cast %31 : vector<16xf32> to vector<16x1xf32>
    %33 = tpu.reciprocal %32 {approx = true} : vector<16x1xf32> -> vector<16x1xf32>
    %34 = vector.broadcast %33 : vector<16x1xf32> to vector<16x16xf32>
    %35 = arith.mulf %30, %34 : vector<16x16xf32>
    %cst_10 = arith.constant dense<0.000000e+00> : vector<16x8xf32>
    %36 = tpu.matmul %35, %24, %cst_10 {dimension_numbers = #tpu.dot_dimension_numbers<[1], [0], [0], [1], [0, 0, 1, 1], [], []>} : vector<16x16xf32>, vector<16x8xf32>, vector<16x8xf32> -> vector<16x8xf32>
    %37 = vector.extract_strided_slice %2 {offsets = [0, 16], sizes = [16, 8], strides = [1, 1]} : vector<16x96xf32> to vector<16x8xf32>
    %cst_11 = arith.constant 0.353553385 : f32
    %38 = vector.broadcast %cst_11 : f32 to vector<16x8xf32>
    %39 = arith.mulf %37, %38 : vector<16x8xf32>
    %40 = vector.extract_strided_slice %2 {offsets = [0, 48], sizes = [16, 8], strides = [1, 1]} : vector<16x96xf32> to vector<16x8xf32>
    %41 = vector.extract_strided_slice %2 {offsets = [0, 80], sizes = [16, 8], strides = [1, 1]} : vector<16x96xf32> to vector<16x8xf32>
    %cst_12 = arith.constant dense<0.000000e+00> : vector<16x16xf32>
    %42 = tpu.matmul %39, %40, %cst_12 {dimension_numbers = #tpu.dot_dimension_numbers<[1], [1], [0], [0], [0, 0, 1, 0], [], []>} : vector<16x8xf32>, vector<16x8xf32>, vector<16x16xf32> -> vector<16x16xf32>
    %cst_13 = arith.constant dense<0xFF800000> : vector<16xf32>
    %43 = vector.multi_reduction <maximumf>, %42, %cst_13 [1] : vector<16x16xf32> to vector<16xf32>
    %44 = vector.shape_cast %43 : vector<16xf32> to vector<16x1xf32>
    %45 = vector.broadcast %44 : vector<16x1xf32> to vector<16x16xf32>
    %46 = arith.subf %42, %45 : vector<16x16xf32>
    %47 = math.exp %46 : vector<16x16xf32>
    %cst_14 = arith.constant dense<0.000000e+00> : vector<16xf32>
    %48 = vector.multi_reduction <add>, %47, %cst_14 [1] : vector<16x16xf32> to vector<16xf32>
    %49 = vector.shape_cast %48 : vector<16xf32> to vector<16x1xf32>
    %50 = tpu.reciprocal %49 {approx = true} : vector<16x1xf32> -> vector<16x1xf32>
    %51 = vector.broadcast %50 : vector<16x1xf32> to vector<16x16xf32>
    %52 = arith.mulf %47, %51 : vector<16x16xf32>
    %cst_15 = arith.constant dense<0.000000e+00> : vector<16x8xf32>
    %53 = tpu.matmul %52, %41, %cst_15 {dimension_numbers = #tpu.dot_dimension_numbers<[1], [0], [0], [1], [0, 0, 1, 1], [], []>} : vector<16x16xf32>, vector<16x8xf32>, vector<16x8xf32> -> vector<16x8xf32>
    %54 = vector.extract_strided_slice %2 {offsets = [0, 24], sizes = [16, 8], strides = [1, 1]} : vector<16x96xf32> to vector<16x8xf32>
    %cst_16 = arith.constant 0.353553385 : f32
    %55 = vector.broadcast %cst_16 : f32 to vector<16x8xf32>
    %56 = arith.mulf %54, %55 : vector<16x8xf32>
    %57 = vector.extract_strided_slice %2 {offsets = [0, 56], sizes = [16, 8], strides = [1, 1]} : vector<16x96xf32> to vector<16x8xf32>
    %58 = vector.extract_strided_slice %2 {offsets = [0, 88], sizes = [16, 8], strides = [1, 1]} : vector<16x96xf32> to vector<16x8xf32>
    %cst_17 = arith.constant dense<0.000000e+00> : vector<16x16xf32>
    %59 = tpu.matmul %56, %57, %cst_17 {dimension_numbers = #tpu.dot_dimension_numbers<[1], [1], [0], [0], [0, 0, 1, 0], [], []>} : vector<16x8xf32>, vector<16x8xf32>, vector<16x16xf32> -> vector<16x16xf32>
    %cst_18 = arith.constant dense<0xFF800000> : vector<16xf32>
    %60 = vector.multi_reduction <maximumf>, %59, %cst_18 [1] : vector<16x16xf32> to vector<16xf32>
    %61 = vector.shape_cast %60 : vector<16xf32> to vector<16x1xf32>
    %62 = vector.broadcast %61 : vector<16x1xf32> to vector<16x16xf32>
    %63 = arith.subf %59, %62 : vector<16x16xf32>
    %64 = math.exp %63 : vector<16x16xf32>
    %cst_19 = arith.constant dense<0.000000e+00> : vector<16xf32>
    %65 = vector.multi_reduction <add>, %64, %cst_19 [1] : vector<16x16xf32> to vector<16xf32>
    %66 = vector.shape_cast %65 : vector<16xf32> to vector<16x1xf32>
    %67 = tpu.reciprocal %66 {approx = true} : vector<16x1xf32> -> vector<16x1xf32>
    %68 = vector.broadcast %67 : vector<16x1xf32> to vector<16x16xf32>
    %69 = arith.mulf %64, %68 : vector<16x16xf32>
    %cst_20 = arith.constant dense<0.000000e+00> : vector<16x8xf32>
    %70 = tpu.matmul %69, %58, %cst_20 {dimension_numbers = #tpu.dot_dimension_numbers<[1], [0], [0], [1], [0, 0, 1, 1], [], []>} : vector<16x16xf32>, vector<16x8xf32>, vector<16x8xf32> -> vector<16x8xf32>
    %71 = tpu.concatenate %19, %36, %53, %70 in 1 : vector<16x8xf32>, vector<16x8xf32>, vector<16x8xf32>, vector<16x8xf32> -> vector<16x32xf32>
    %72 = arith.truncf %71 : vector<16x32xf32> to vector<16x32xbf16>
    %c0_21 = arith.constant 0 : index
    %c0_22 = arith.constant 0 : index
    %c0_23 = arith.constant 0 : index
    %73 = vector.load %arg2[%c0_21, %c0_22, %c0_23] : memref<1x16x32xbf16, #tpu.memory_space<vmem>>, vector<1x16x32xbf16>
    %74 = vector.shape_cast %73 : vector<1x16x32xbf16> to vector<16x32xbf16>
    %75 = vector.shape_cast %72 : vector<16x32xbf16> to vector<1x16x32xbf16>
    tpu.vector_store %arg2[%c0_21, %c0_22, %c0_23], %75 {strides = array<i32>} : memref<1x16x32xbf16, #tpu.memory_space<vmem>>, vector<1x16x32xbf16>,
    return
  }
  func.func @transform_0(%arg0: i32) -> (i32, i32, i32) {
    %c0_i32 = arith.constant 0 : i32
    %c0_i32_0 = arith.constant 0 : i32
    %c0_i32_1 = arith.constant 0 : i32
    return %arg0, %c0_i32, %c0_i32_0 : i32, i32, i32
  }
  func.func @transform_1(%arg0: i32) -> (i32, i32, i32) {
    %c0_i32 = arith.constant 0 : i32
    %c0_i32_0 = arith.constant 0 : i32
    %c0_i32_1 = arith.constant 0 : i32
    return %arg0, %c0_i32, %c0_i32_0 : i32, i32, i32
  }
}

module attributes {stable_mosaic.version = 11 : i64} {
  func.func @_linear_res_ln_kernel(%arg0: i32, %arg1: i32, %arg2: memref<32x32xbf16, #tpu.memory_space<vmem>>, %arg3: memref<32x32xbf16, #tpu.memory_space<vmem>>, %arg4: memref<1x32xf32, #tpu.memory_space<vmem>>, %arg5: memref<32x32xbf16, #tpu.memory_space<vmem>>, %arg6: memref<1x32xf32, #tpu.memory_space<vmem>>, %arg7: memref<1x32xf32, #tpu.memory_space<vmem>>, %arg8: memref<32x32xbf16, #tpu.memory_space<vmem>>, %arg9: memref<32x32xf32, #tpu.memory_space<vmem>>) attributes {dimension_semantics = [#tpu.dimension_semantics<parallel>, #tpu.dimension_semantics<arbitrary>], iteration_bounds = array<i64: 1, 1>, scalar_prefetch = 0 : i64, scratch_operands = 1 : i64, tpu.core_type = #tpu.core_type<tc>, window_params = [{transform_indices = @transform_0, window_bounds = array<i64: 32, 32>}, {transform_indices = @transform_1, window_bounds = array<i64: 32, 32>}, {pipeline_mode = #tpu.pipeline_mode<synchronous>, transform_indices = @transform_2, window_bounds = array<i64: 1, 32>}, {transform_indices = @transform_3, window_bounds = array<i64: 32, 32>}, {pipeline_mode = #tpu.pipeline_mode<synchronous>, transform_indices = @transform_4, window_bounds = array<i64: 1, 32>}, {pipeline_mode = #tpu.pipeline_mode<synchronous>, transform_indices = @transform_5, window_bounds = array<i64: 1, 32>}, {transform_indices = @transform_6, window_bounds = array<i64: 32, 32>}]} {
    %c0_i32 = arith.constant 0 : i32
    %0 = arith.cmpi eq, %arg1, %c0_i32 : i32
    %1 = arith.extui %0 : i1 to i32
    %c0_i32_0 = arith.constant 0 : i32
    %2 = arith.cmpi ne, %1, %c0_i32_0 : i32
    scf.if %2 {
      %cst_10 = arith.constant 0.000000e+00 : f32
      %12 = vector.broadcast %cst_10 : f32 to vector<32x32xf32>
      %c0_11 = arith.constant 0 : index
      %c0_12 = arith.constant 0 : index
      %13 = vector.load %arg9[%c0_11, %c0_12] : memref<32x32xf32, #tpu.memory_space<vmem>>, vector<32x32xf32>
      tpu.vector_store %arg9[%c0_11, %c0_12], %12 {strides = array<i32>} : memref<32x32xf32, #tpu.memory_space<vmem>>, vector<32x32xf32>,
    } else {
    }
    %c0 = arith.constant 0 : index
    %c0_1 = arith.constant 0 : index
    %3 = vector.load %arg9[%c0, %c0_1] : memref<32x32xf32, #tpu.memory_space<vmem>>, vector<32x32xf32>
    %c0_2 = arith.constant 0 : index
    %c0_3 = arith.constant 0 : index
    %4 = vector.load %arg2[%c0_2, %c0_3] : memref<32x32xbf16, #tpu.memory_space<vmem>>, vector<32x32xbf16>
    %c0_4 = arith.constant 0 : index
    %c0_5 = arith.constant 0 : index
    %5 = vector.load %arg3[%c0_4, %c0_5] : memref<32x32xbf16, #tpu.memory_space<vmem>>, vector<32x32xbf16>
    %cst = arith.constant dense<0.000000e+00> : vector<32x32xf32>
    %6 = tpu.matmul %4, %5, %cst {dimension_numbers = #tpu.dot_dimension_numbers<[1], [0], [0], [1], [0, 0, 1, 1], [], []>} : vector<32x32xbf16>, vector<32x32xbf16>, vector<32x32xf32> -> vector<32x32xf32>
    %7 = arith.addf %3, %6 : vector<32x32xf32>
    %c0_6 = arith.constant 0 : index
    %c0_7 = arith.constant 0 : index
    %8 = vector.load %arg9[%c0_6, %c0_7] : memref<32x32xf32, #tpu.memory_space<vmem>>, vector<32x32xf32>
    tpu.vector_store %arg9[%c0_6, %c0_7], %7 {strides = array<i32>} : memref<32x32xf32, #tpu.memory_space<vmem>>, vector<32x32xf32>,
    %c0_i32_8 = arith.constant 0 : i32
    %9 = arith.cmpi eq, %arg1, %c0_i32_8 : i32
    %10 = arith.extui %9 : i1 to i32
    %c0_i32_9 = arith.constant 0 : i32
    %11 = arith.cmpi ne, %10, %c0_i32_9 : i32
    scf.if %11 {
      %c0_10 = arith.constant 0 : index
      %c0_11 = arith.constant 0 : index
      %12 = vector.load %arg9[%c0_10, %c0_11] : memref<32x32xf32, #tpu.memory_space<vmem>>, vector<32x32xf32>
      %c0_12 = arith.constant 0 : index
      %c0_13 = arith.constant 0 : index
      %13 = vector.load %arg4[%c0_12, %c0_13] : memref<1x32xf32, #tpu.memory_space<vmem>>, vector<1x32xf32>
      %14 = vector.broadcast %13 : vector<1x32xf32> to vector<32x32xf32>
      %15 = arith.addf %12, %14 : vector<32x32xf32>
      %c0_14 = arith.constant 0 : index
      %c0_15 = arith.constant 0 : index
      %16 = vector.load %arg5[%c0_14, %c0_15] : memref<32x32xbf16, #tpu.memory_space<vmem>>, vector<32x32xbf16>
      %17 = arith.extf %16 : vector<32x32xbf16> to vector<32x32xf32>
      %18 = arith.addf %15, %17 : vector<32x32xf32>
      %cst_16 = arith.constant dense<0.000000e+00> : vector<32xf32>
      %19 = vector.multi_reduction <add>, %18, %cst_16 [1] : vector<32x32xf32> to vector<32xf32>
      %20 = vector.shape_cast %19 : vector<32xf32> to vector<32x1xf32>
      %cst_17 = arith.constant 3.200000e+01 : f32
      %21 = vector.broadcast %cst_17 : f32 to vector<32x1xf32>
      %22 = arith.divf %20, %21 : vector<32x1xf32>
      %23 = vector.broadcast %22 : vector<32x1xf32> to vector<32x32xf32>
      %24 = arith.subf %18, %23 : vector<32x32xf32>
      %25 = vector.broadcast %22 : vector<32x1xf32> to vector<32x32xf32>
      %26 = arith.subf %18, %25 : vector<32x32xf32>
      %27 = arith.mulf %24, %26 : vector<32x32xf32>
      %cst_18 = arith.constant dense<0.000000e+00> : vector<32xf32>
      %28 = vector.multi_reduction <add>, %27, %cst_18 [1] : vector<32x32xf32> to vector<32xf32>
      %29 = vector.shape_cast %28 : vector<32xf32> to vector<32x1xf32>
      %cst_19 = arith.constant 3.200000e+01 : f32
      %30 = vector.broadcast %cst_19 : f32 to vector<32x1xf32>
      %31 = arith.divf %29, %30 : vector<32x1xf32>
      %32 = vector.broadcast %22 : vector<32x1xf32> to vector<32x32xf32>
      %33 = arith.subf %18, %32 : vector<32x32xf32>
      %cst_20 = arith.constant 9.99999974E-6 : f32
      %34 = vector.broadcast %cst_20 : f32 to vector<32x1xf32>
      %35 = arith.addf %31, %34 : vector<32x1xf32>
      %36 = math.rsqrt %35 : vector<32x1xf32>
      %37 = vector.broadcast %36 : vector<32x1xf32> to vector<32x32xf32>
      %38 = arith.mulf %33, %37 : vector<32x32xf32>
      %c0_21 = arith.constant 0 : index
      %c0_22 = arith.constant 0 : index
      %39 = vector.load %arg6[%c0_21, %c0_22] : memref<1x32xf32, #tpu.memory_space<vmem>>, vector<1x32xf32>
      %40 = vector.broadcast %39 : vector<1x32xf32> to vector<32x32xf32>
      %41 = arith.mulf %38, %40 : vector<32x32xf32>
      %c0_23 = arith.constant 0 : index
      %c0_24 = arith.constant 0 : index
      %42 = vector.load %arg7[%c0_23, %c0_24] : memref<1x32xf32, #tpu.memory_space<vmem>>, vector<1x32xf32>
      %43 = vector.broadcast %42 : vector<1x32xf32> to vector<32x32xf32>
      %44 = arith.addf %41, %43 : vector<32x32xf32>
      %45 = arith.truncf %44 : vector<32x32xf32> to vector<32x32xbf16>
      %c0_25 = arith.constant 0 : index
      %c0_26 = arith.constant 0 : index
      %46 = vector.load %arg8[%c0_25, %c0_26] : memref<32x32xbf16, #tpu.memory_space<vmem>>, vector<32x32xbf16>
      tpu.vector_store %arg8[%c0_25, %c0_26], %45 {strides = array<i32>} : memref<32x32xbf16, #tpu.memory_space<vmem>>, vector<32x32xbf16>,
    } else {
    }
    return
  }
  func.func @transform_0(%arg0: i32, %arg1: i32) -> (i32, i32) {
    %c0_i32 = arith.constant 0 : i32
    return %arg0, %arg1 : i32, i32
  }
  func.func @transform_1(%arg0: i32, %arg1: i32) -> (i32, i32) {
    %c0_i32 = arith.constant 0 : i32
    %c0_i32_0 = arith.constant 0 : i32
    return %arg1, %c0_i32 : i32, i32
  }
  func.func @transform_2(%arg0: i32, %arg1: i32) -> (i32, i32) {
    %c0_i32 = arith.constant 0 : i32
    %c0_i32_0 = arith.constant 0 : i32
    %c0_i32_1 = arith.constant 0 : i32
    return %c0_i32, %c0_i32_0 : i32, i32
  }
  func.func @transform_3(%arg0: i32, %arg1: i32) -> (i32, i32) {
    %c0_i32 = arith.constant 0 : i32
    %c0_i32_0 = arith.constant 0 : i32
    return %arg0, %c0_i32 : i32, i32
  }
  func.func @transform_4(%arg0: i32, %arg1: i32) -> (i32, i32) {
    %c0_i32 = arith.constant 0 : i32
    %c0_i32_0 = arith.constant 0 : i32
    %c0_i32_1 = arith.constant 0 : i32
    return %c0_i32, %c0_i32_0 : i32, i32
  }
  func.func @transform_5(%arg0: i32, %arg1: i32) -> (i32, i32) {
    %c0_i32 = arith.constant 0 : i32
    %c0_i32_0 = arith.constant 0 : i32
    %c0_i32_1 = arith.constant 0 : i32
    return %c0_i32, %c0_i32_0 : i32, i32
  }
  func.func @transform_6(%arg0: i32, %arg1: i32) -> (i32, i32) {
    %c0_i32 = arith.constant 0 : i32
    %c0_i32_0 = arith.constant 0 : i32
    return %arg0, %c0_i32 : i32, i32
  }
}

module attributes {stable_mosaic.version = 11 : i64} {
  func.func @_linear_kernel(%arg0: i32, %arg1: i32, %arg2: i32, %arg3: memref<32x32xbf16, #tpu.memory_space<vmem>>, %arg4: memref<32x64xbf16, #tpu.memory_space<vmem>>, %arg5: memref<1x64xf32, #tpu.memory_space<vmem>>, %arg6: memref<32x64xbf16, #tpu.memory_space<vmem>>, %arg7: memref<32x64xf32, #tpu.memory_space<vmem>>) attributes {dimension_semantics = [#tpu.dimension_semantics<parallel>, #tpu.dimension_semantics<parallel>, #tpu.dimension_semantics<arbitrary>], iteration_bounds = array<i64: 1, 1, 1>, scalar_prefetch = 0 : i64, scratch_operands = 1 : i64, tpu.core_type = #tpu.core_type<tc>, window_params = [{transform_indices = @transform_0, window_bounds = array<i64: 32, 32>}, {transform_indices = @transform_1, window_bounds = array<i64: 32, 64>}, {transform_indices = @transform_2, window_bounds = array<i64: 1, 64>}, {transform_indices = @transform_3, window_bounds = array<i64: 32, 64>}]} {
    %c0_i32 = arith.constant 0 : i32
    %0 = arith.cmpi eq, %arg2, %c0_i32 : i32
    %1 = arith.extui %0 : i1 to i32
    %c0_i32_0 = arith.constant 0 : i32
    %2 = arith.cmpi ne, %1, %c0_i32_0 : i32
    scf.if %2 {
      %cst_10 = arith.constant 0.000000e+00 : f32
      %12 = vector.broadcast %cst_10 : f32 to vector<32x64xf32>
      %c0_11 = arith.constant 0 : index
      %c0_12 = arith.constant 0 : index
      %13 = vector.load %arg7[%c0_11, %c0_12] : memref<32x64xf32, #tpu.memory_space<vmem>>, vector<32x64xf32>
      tpu.vector_store %arg7[%c0_11, %c0_12], %12 {strides = array<i32>} : memref<32x64xf32, #tpu.memory_space<vmem>>, vector<32x64xf32>,
    } else {
    }
    %c0 = arith.constant 0 : index
    %c0_1 = arith.constant 0 : index
    %3 = vector.load %arg7[%c0, %c0_1] : memref<32x64xf32, #tpu.memory_space<vmem>>, vector<32x64xf32>
    %c0_2 = arith.constant 0 : index
    %c0_3 = arith.constant 0 : index
    %4 = vector.load %arg3[%c0_2, %c0_3] : memref<32x32xbf16, #tpu.memory_space<vmem>>, vector<32x32xbf16>
    %c0_4 = arith.constant 0 : index
    %c0_5 = arith.constant 0 : index
    %5 = vector.load %arg4[%c0_4, %c0_5] : memref<32x64xbf16, #tpu.memory_space<vmem>>, vector<32x64xbf16>
    %cst = arith.constant dense<0.000000e+00> : vector<32x64xf32>
    %6 = tpu.matmul %4, %5, %cst {dimension_numbers = #tpu.dot_dimension_numbers<[1], [0], [0], [1], [0, 0, 1, 1], [], []>} : vector<32x32xbf16>, vector<32x64xbf16>, vector<32x64xf32> -> vector<32x64xf32>
    %7 = arith.addf %3, %6 : vector<32x64xf32>
    %c0_6 = arith.constant 0 : index
    %c0_7 = arith.constant 0 : index
    %8 = vector.load %arg7[%c0_6, %c0_7] : memref<32x64xf32, #tpu.memory_space<vmem>>, vector<32x64xf32>
    tpu.vector_store %arg7[%c0_6, %c0_7], %7 {strides = array<i32>} : memref<32x64xf32, #tpu.memory_space<vmem>>, vector<32x64xf32>,
    %c0_i32_8 = arith.constant 0 : i32
    %9 = arith.cmpi eq, %arg2, %c0_i32_8 : i32
    %10 = arith.extui %9 : i1 to i32
    %c0_i32_9 = arith.constant 0 : i32
    %11 = arith.cmpi ne, %10, %c0_i32_9 : i32
    scf.if %11 {
      %c0_10 = arith.constant 0 : index
      %c0_11 = arith.constant 0 : index
      %12 = vector.load %arg7[%c0_10, %c0_11] : memref<32x64xf32, #tpu.memory_space<vmem>>, vector<32x64xf32>
      %c0_12 = arith.constant 0 : index
      %c0_13 = arith.constant 0 : index
      %13 = vector.load %arg5[%c0_12, %c0_13] : memref<1x64xf32, #tpu.memory_space<vmem>>, vector<1x64xf32>
      %14 = vector.broadcast %13 : vector<1x64xf32> to vector<32x64xf32>
      %15 = arith.addf %12, %14 : vector<32x64xf32>
      %cst_14 = arith.constant 0.000000e+00 : f32
      %16 = vector.broadcast %cst_14 : f32 to vector<32x64xf32>
      %17 = arith.maximumf %15, %16 : vector<32x64xf32>
      %18 = arith.truncf %17 : vector<32x64xf32> to vector<32x64xbf16>
      %c0_15 = arith.constant 0 : index
      %c0_16 = arith.constant 0 : index
      %19 = vector.load %arg6[%c0_15, %c0_16] : memref<32x64xbf16, #tpu.memory_space<vmem>>, vector<32x64xbf16>
      tpu.vector_store %arg6[%c0_15, %c0_16], %18 {strides = array<i32>} : memref<32x64xbf16, #tpu.memory_space<vmem>>, vector<32x64xbf16>,
    } else {
    }
    return
  }
  func.func @transform_0(%arg0: i32, %arg1: i32, %arg2: i32) -> (i32, i32) {
    %c0_i32 = arith.constant 0 : i32
    return %arg0, %arg2 : i32, i32
  }
  func.func @transform_1(%arg0: i32, %arg1: i32, %arg2: i32) -> (i32, i32) {
    %c0_i32 = arith.constant 0 : i32
    return %arg2, %arg1 : i32, i32
  }
  func.func @transform_2(%arg0: i32, %arg1: i32, %arg2: i32) -> (i32, i32) {
    %c0_i32 = arith.constant 0 : i32
    %c0_i32_0 = arith.constant 0 : i32
    return %c0_i32, %arg1 : i32, i32
  }
  func.func @transform_3(%arg0: i32, %arg1: i32, %arg2: i32) -> (i32, i32) {
    %c0_i32 = arith.constant 0 : i32
    return %arg0, %arg1 : i32, i32
  }
}

module attributes {stable_mosaic.version = 11 : i64} {
  func.func @_linear_res_ln_kernel(%arg0: i32, %arg1: i32, %arg2: memref<32x64xbf16, #tpu.memory_space<vmem>>, %arg3: memref<64x32xbf16, #tpu.memory_space<vmem>>, %arg4: memref<1x32xf32, #tpu.memory_space<vmem>>, %arg5: memref<32x32xbf16, #tpu.memory_space<vmem>>, %arg6: memref<1x32xf32, #tpu.memory_space<vmem>>, %arg7: memref<1x32xf32, #tpu.memory_space<vmem>>, %arg8: memref<32x32xbf16, #tpu.memory_space<vmem>>, %arg9: memref<32x32xf32, #tpu.memory_space<vmem>>) attributes {dimension_semantics = [#tpu.dimension_semantics<parallel>, #tpu.dimension_semantics<arbitrary>], iteration_bounds = array<i64: 1, 1>, scalar_prefetch = 0 : i64, scratch_operands = 1 : i64, tpu.core_type = #tpu.core_type<tc>, window_params = [{transform_indices = @transform_0, window_bounds = array<i64: 32, 64>}, {transform_indices = @transform_1, window_bounds = array<i64: 64, 32>}, {pipeline_mode = #tpu.pipeline_mode<synchronous>, transform_indices = @transform_2, window_bounds = array<i64: 1, 32>}, {transform_indices = @transform_3, window_bounds = array<i64: 32, 32>}, {pipeline_mode = #tpu.pipeline_mode<synchronous>, transform_indices = @transform_4, window_bounds = array<i64: 1, 32>}, {pipeline_mode = #tpu.pipeline_mode<synchronous>, transform_indices = @transform_5, window_bounds = array<i64: 1, 32>}, {transform_indices = @transform_6, window_bounds = array<i64: 32, 32>}]} {
    %c0_i32 = arith.constant 0 : i32
    %0 = arith.cmpi eq, %arg1, %c0_i32 : i32
    %1 = arith.extui %0 : i1 to i32
    %c0_i32_0 = arith.constant 0 : i32
    %2 = arith.cmpi ne, %1, %c0_i32_0 : i32
    scf.if %2 {
      %cst_10 = arith.constant 0.000000e+00 : f32
      %12 = vector.broadcast %cst_10 : f32 to vector<32x32xf32>
      %c0_11 = arith.constant 0 : index
      %c0_12 = arith.constant 0 : index
      %13 = vector.load %arg9[%c0_11, %c0_12] : memref<32x32xf32, #tpu.memory_space<vmem>>, vector<32x32xf32>
      tpu.vector_store %arg9[%c0_11, %c0_12], %12 {strides = array<i32>} : memref<32x32xf32, #tpu.memory_space<vmem>>, vector<32x32xf32>,
    } else {
    }
    %c0 = arith.constant 0 : index
    %c0_1 = arith.constant 0 : index
    %3 = vector.load %arg9[%c0, %c0_1] : memref<32x32xf32, #tpu.memory_space<vmem>>, vector<32x32xf32>
    %c0_2 = arith.constant 0 : index
    %c0_3 = arith.constant 0 : index
    %4 = vector.load %arg2[%c0_2, %c0_3] : memref<32x64xbf16, #tpu.memory_space<vmem>>, vector<32x64xbf16>
    %c0_4 = arith.constant 0 : index
    %c0_5 = arith.constant 0 : index
    %5 = vector.load %arg3[%c0_4, %c0_5] : memref<64x32xbf16, #tpu.memory_space<vmem>>, vector<64x32xbf16>
    %cst = arith.constant dense<0.000000e+00> : vector<32x32xf32>
    %6 = tpu.matmul %4, %5, %cst {dimension_numbers = #tpu.dot_dimension_numbers<[1], [0], [0], [1], [0, 0, 1, 1], [], []>} : vector<32x64xbf16>, vector<64x32xbf16>, vector<32x32xf32> -> vector<32x32xf32>
    %7 = arith.addf %3, %6 : vector<32x32xf32>
    %c0_6 = arith.constant 0 : index
    %c0_7 = arith.constant 0 : index
    %8 = vector.load %arg9[%c0_6, %c0_7] : memref<32x32xf32, #tpu.memory_space<vmem>>, vector<32x32xf32>
    tpu.vector_store %arg9[%c0_6, %c0_7], %7 {strides = array<i32>} : memref<32x32xf32, #tpu.memory_space<vmem>>, vector<32x32xf32>,
    %c0_i32_8 = arith.constant 0 : i32
    %9 = arith.cmpi eq, %arg1, %c0_i32_8 : i32
    %10 = arith.extui %9 : i1 to i32
    %c0_i32_9 = arith.constant 0 : i32
    %11 = arith.cmpi ne, %10, %c0_i32_9 : i32
    scf.if %11 {
      %c0_10 = arith.constant 0 : index
      %c0_11 = arith.constant 0 : index
      %12 = vector.load %arg9[%c0_10, %c0_11] : memref<32x32xf32, #tpu.memory_space<vmem>>, vector<32x32xf32>
      %c0_12 = arith.constant 0 : index
      %c0_13 = arith.constant 0 : index
      %13 = vector.load %arg4[%c0_12, %c0_13] : memref<1x32xf32, #tpu.memory_space<vmem>>, vector<1x32xf32>
      %14 = vector.broadcast %13 : vector<1x32xf32> to vector<32x32xf32>
      %15 = arith.addf %12, %14 : vector<32x32xf32>
      %c0_14 = arith.constant 0 : index
      %c0_15 = arith.constant 0 : index
      %16 = vector.load %arg5[%c0_14, %c0_15] : memref<32x32xbf16, #tpu.memory_space<vmem>>, vector<32x32xbf16>
      %17 = arith.extf %16 : vector<32x32xbf16> to vector<32x32xf32>
      %18 = arith.addf %15, %17 : vector<32x32xf32>
      %cst_16 = arith.constant dense<0.000000e+00> : vector<32xf32>
      %19 = vector.multi_reduction <add>, %18, %cst_16 [1] : vector<32x32xf32> to vector<32xf32>
      %20 = vector.shape_cast %19 : vector<32xf32> to vector<32x1xf32>
      %cst_17 = arith.constant 3.200000e+01 : f32
      %21 = vector.broadcast %cst_17 : f32 to vector<32x1xf32>
      %22 = arith.divf %20, %21 : vector<32x1xf32>
      %23 = vector.broadcast %22 : vector<32x1xf32> to vector<32x32xf32>
      %24 = arith.subf %18, %23 : vector<32x32xf32>
      %25 = vector.broadcast %22 : vector<32x1xf32> to vector<32x32xf32>
      %26 = arith.subf %18, %25 : vector<32x32xf32>
      %27 = arith.mulf %24, %26 : vector<32x32xf32>
      %cst_18 = arith.constant dense<0.000000e+00> : vector<32xf32>
      %28 = vector.multi_reduction <add>, %27, %cst_18 [1] : vector<32x32xf32> to vector<32xf32>
      %29 = vector.shape_cast %28 : vector<32xf32> to vector<32x1xf32>
      %cst_19 = arith.constant 3.200000e+01 : f32
      %30 = vector.broadcast %cst_19 : f32 to vector<32x1xf32>
      %31 = arith.divf %29, %30 : vector<32x1xf32>
      %32 = vector.broadcast %22 : vector<32x1xf32> to vector<32x32xf32>
      %33 = arith.subf %18, %32 : vector<32x32xf32>
      %cst_20 = arith.constant 9.99999974E-6 : f32
      %34 = vector.broadcast %cst_20 : f32 to vector<32x1xf32>
      %35 = arith.addf %31, %34 : vector<32x1xf32>
      %36 = math.rsqrt %35 : vector<32x1xf32>
      %37 = vector.broadcast %36 : vector<32x1xf32> to vector<32x32xf32>
      %38 = arith.mulf %33, %37 : vector<32x32xf32>
      %c0_21 = arith.constant 0 : index
      %c0_22 = arith.constant 0 : index
      %39 = vector.load %arg6[%c0_21, %c0_22] : memref<1x32xf32, #tpu.memory_space<vmem>>, vector<1x32xf32>
      %40 = vector.broadcast %39 : vector<1x32xf32> to vector<32x32xf32>
      %41 = arith.mulf %38, %40 : vector<32x32xf32>
      %c0_23 = arith.constant 0 : index
      %c0_24 = arith.constant 0 : index
      %42 = vector.load %arg7[%c0_23, %c0_24] : memref<1x32xf32, #tpu.memory_space<vmem>>, vector<1x32xf32>
      %43 = vector.broadcast %42 : vector<1x32xf32> to vector<32x32xf32>
      %44 = arith.addf %41, %43 : vector<32x32xf32>
      %45 = arith.truncf %44 : vector<32x32xf32> to vector<32x32xbf16>
      %c0_25 = arith.constant 0 : index
      %c0_26 = arith.constant 0 : index
      %46 = vector.load %arg8[%c0_25, %c0_26] : memref<32x32xbf16, #tpu.memory_space<vmem>>, vector<32x32xbf16>
      tpu.vector_store %arg8[%c0_25, %c0_26], %45 {strides = array<i32>} : memref<32x32xbf16, #tpu.memory_space<vmem>>, vector<32x32xbf16>,
    } else {
    }
    return
  }
  func.func @transform_0(%arg0: i32, %arg1: i32) -> (i32, i32) {
    %c0_i32 = arith.constant 0 : i32
    return %arg0, %arg1 : i32, i32
  }
  func.func @transform_1(%arg0: i32, %arg1: i32) -> (i32, i32) {
    %c0_i32 = arith.constant 0 : i32
    %c0_i32_0 = arith.constant 0 : i32
    return %arg1, %c0_i32 : i32, i32
  }
  func.func @transform_2(%arg0: i32, %arg1: i32) -> (i32, i32) {
    %c0_i32 = arith.constant 0 : i32
    %c0_i32_0 = arith.constant 0 : i32
    %c0_i32_1 = arith.constant 0 : i32
    return %c0_i32, %c0_i32_0 : i32, i32
  }
  func.func @transform_3(%arg0: i32, %arg1: i32) -> (i32, i32) {
    %c0_i32 = arith.constant 0 : i32
    %c0_i32_0 = arith.constant 0 : i32
    return %arg0, %c0_i32 : i32, i32
  }
  func.func @transform_4(%arg0: i32, %arg1: i32) -> (i32, i32) {
    %c0_i32 = arith.constant 0 : i32
    %c0_i32_0 = arith.constant 0 : i32
    %c0_i32_1 = arith.constant 0 : i32
    return %c0_i32, %c0_i32_0 : i32, i32
  }
  func.func @transform_5(%arg0: i32, %arg1: i32) -> (i32, i32) {
    %c0_i32 = arith.constant 0 : i32
    %c0_i32_0 = arith.constant 0 : i32
    %c0_i32_1 = arith.constant 0 : i32
    return %c0_i32, %c0_i32_0 : i32, i32
  }
  func.func @transform_6(%arg0: i32, %arg1: i32) -> (i32, i32) {
    %c0_i32 = arith.constant 0 : i32
    %c0_i32_0 = arith.constant 0 : i32
    return %arg0, %c0_i32 : i32, i32
  }
}

module attributes {stable_mosaic.version = 11 : i64} {
  func.func @_linear_kernel(%arg0: i32, %arg1: i32, %arg2: i32, %arg3: memref<32x32xbf16, #tpu.memory_space<vmem>>, %arg4: memref<32x64xbf16, #tpu.memory_space<vmem>>, %arg5: memref<1x64xf32, #tpu.memory_space<vmem>>, %arg6: memref<32x64xbf16, #tpu.memory_space<vmem>>, %arg7: memref<32x64xf32, #tpu.memory_space<vmem>>) attributes {dimension_semantics = [#tpu.dimension_semantics<parallel>, #tpu.dimension_semantics<parallel>, #tpu.dimension_semantics<arbitrary>], iteration_bounds = array<i64: 1, 1, 1>, scalar_prefetch = 0 : i64, scratch_operands = 1 : i64, tpu.core_type = #tpu.core_type<tc>, window_params = [{transform_indices = @transform_0, window_bounds = array<i64: 32, 32>}, {transform_indices = @transform_1, window_bounds = array<i64: 32, 64>}, {transform_indices = @transform_2, window_bounds = array<i64: 1, 64>}, {transform_indices = @transform_3, window_bounds = array<i64: 32, 64>}]} {
    %c0_i32 = arith.constant 0 : i32
    %0 = arith.cmpi eq, %arg2, %c0_i32 : i32
    %1 = arith.extui %0 : i1 to i32
    %c0_i32_0 = arith.constant 0 : i32
    %2 = arith.cmpi ne, %1, %c0_i32_0 : i32
    scf.if %2 {
      %cst_10 = arith.constant 0.000000e+00 : f32
      %12 = vector.broadcast %cst_10 : f32 to vector<32x64xf32>
      %c0_11 = arith.constant 0 : index
      %c0_12 = arith.constant 0 : index
      %13 = vector.load %arg7[%c0_11, %c0_12] : memref<32x64xf32, #tpu.memory_space<vmem>>, vector<32x64xf32>
      tpu.vector_store %arg7[%c0_11, %c0_12], %12 {strides = array<i32>} : memref<32x64xf32, #tpu.memory_space<vmem>>, vector<32x64xf32>,
    } else {
    }
    %c0 = arith.constant 0 : index
    %c0_1 = arith.constant 0 : index
    %3 = vector.load %arg7[%c0, %c0_1] : memref<32x64xf32, #tpu.memory_space<vmem>>, vector<32x64xf32>
    %c0_2 = arith.constant 0 : index
    %c0_3 = arith.constant 0 : index
    %4 = vector.load %arg3[%c0_2, %c0_3] : memref<32x32xbf16, #tpu.memory_space<vmem>>, vector<32x32xbf16>
    %c0_4 = arith.constant 0 : index
    %c0_5 = arith.constant 0 : index
    %5 = vector.load %arg4[%c0_4, %c0_5] : memref<32x64xbf16, #tpu.memory_space<vmem>>, vector<32x64xbf16>
    %cst = arith.constant dense<0.000000e+00> : vector<32x64xf32>
    %6 = tpu.matmul %4, %5, %cst {dimension_numbers = #tpu.dot_dimension_numbers<[1], [0], [0], [1], [0, 0, 1, 1], [], []>} : vector<32x32xbf16>, vector<32x64xbf16>, vector<32x64xf32> -> vector<32x64xf32>
    %7 = arith.addf %3, %6 : vector<32x64xf32>
    %c0_6 = arith.constant 0 : index
    %c0_7 = arith.constant 0 : index
    %8 = vector.load %arg7[%c0_6, %c0_7] : memref<32x64xf32, #tpu.memory_space<vmem>>, vector<32x64xf32>
    tpu.vector_store %arg7[%c0_6, %c0_7], %7 {strides = array<i32>} : memref<32x64xf32, #tpu.memory_space<vmem>>, vector<32x64xf32>,
    %c0_i32_8 = arith.constant 0 : i32
    %9 = arith.cmpi eq, %arg2, %c0_i32_8 : i32
    %10 = arith.extui %9 : i1 to i32
    %c0_i32_9 = arith.constant 0 : i32
    %11 = arith.cmpi ne, %10, %c0_i32_9 : i32
    scf.if %11 {
      %c0_10 = arith.constant 0 : index
      %c0_11 = arith.constant 0 : index
      %12 = vector.load %arg7[%c0_10, %c0_11] : memref<32x64xf32, #tpu.memory_space<vmem>>, vector<32x64xf32>
      %c0_12 = arith.constant 0 : index
      %c0_13 = arith.constant 0 : index
      %13 = vector.load %arg5[%c0_12, %c0_13] : memref<1x64xf32, #tpu.memory_space<vmem>>, vector<1x64xf32>
      %14 = vector.broadcast %13 : vector<1x64xf32> to vector<32x64xf32>
      %15 = arith.addf %12, %14 : vector<32x64xf32>
      %16 = arith.truncf %15 : vector<32x64xf32> to vector<32x64xbf16>
      %c0_14 = arith.constant 0 : index
      %c0_15 = arith.constant 0 : index
      %17 = vector.load %arg6[%c0_14, %c0_15] : memref<32x64xbf16, #tpu.memory_space<vmem>>, vector<32x64xbf16>
      tpu.vector_store %arg6[%c0_14, %c0_15], %16 {strides = array<i32>} : memref<32x64xbf16, #tpu.memory_space<vmem>>, vector<32x64xbf16>,
    } else {
    }
    return
  }
  func.func @transform_0(%arg0: i32, %arg1: i32, %arg2: i32) -> (i32, i32) {
    %c0_i32 = arith.constant 0 : i32
    return %arg0, %arg2 : i32, i32
  }
  func.func @transform_1(%arg0: i32, %arg1: i32, %arg2: i32) -> (i32, i32) {
    %c0_i32 = arith.constant 0 : i32
    return %arg2, %arg1 : i32, i32
  }
  func.func @transform_2(%arg0: i32, %arg1: i32, %arg2: i32) -> (i32, i32) {
    %c0_i32 = arith.constant 0 : i32
    %c0_i32_0 = arith.constant 0 : i32
    return %c0_i32, %arg1 : i32, i32
  }
  func.func @transform_3(%arg0: i32, %arg1: i32, %arg2: i32) -> (i32, i32) {
    %c0_i32 = arith.constant 0 : i32
    return %arg0, %arg1 : i32, i32
  }
}

module attributes {stable_mosaic.version = 11 : i64} {
  func.func @_self_attn_kernel(%arg0: i32, %arg1: memref<1x1x8xf32, #tpu.memory_space<vmem>>, %arg2: memref<1x8x96xbf16, #tpu.memory_space<vmem>>, %arg3: memref<1x8x32xbf16, #tpu.memory_space<vmem>>) attributes {dimension_semantics = [#tpu.dimension_semantics<parallel>], iteration_bounds = array<i64: 2>, scalar_prefetch = 0 : i64, scratch_operands = 0 : i64, tpu.core_type = #tpu.core_type<tc>, window_params = [{transform_indices = @transform_0, window_bounds = array<i64: 1, 1, 8>}, {transform_indices = @transform_1, window_bounds = array<i64: 1, 8, 96>}, {transform_indices = @transform_2, window_bounds = array<i64: 1, 8, 32>}]} {
    %c0 = arith.constant 0 : index
    %c0_0 = arith.constant 0 : index
    %c0_1 = arith.constant 0 : index
    %0 = vector.load %arg2[%c0, %c0_0, %c0_1] : memref<1x8x96xbf16, #tpu.memory_space<vmem>>, vector<1x8x96xbf16>
    %1 = vector.shape_cast %0 : vector<1x8x96xbf16> to vector<8x96xbf16>
    %2 = arith.extf %1 : vector<8x96xbf16> to vector<8x96xf32>
    %3 = tpu.iota {dimensions = array<i32: 0>} : vector<8x8xi32>
    %4 = tpu.iota {dimensions = array<i32: 1>} : vector<8x8xi32>
    %5 = arith.cmpi sgt, %4, %3 : vector<8x8xi32>
    %c0_2 = arith.constant 0 : index
    %c0_3 = arith.constant 0 : index
    %c0_4 = arith.constant 0 : index
    %6 = vector.load %arg1[%c0_2, %c0_3, %c0_4] : memref<1x1x8xf32, #tpu.memory_space<vmem>>, vector<1x1x8xf32>
    %7 = vector.shape_cast %6 : vector<1x1x8xf32> to vector<1x8xf32>
    %cst = arith.constant 5.000000e-01 : f32
    %8 = vector.broadcast %cst : f32 to vector<1x8xf32>
    %9 = arith.cmpf ogt, %7, %8 : vector<1x8xf32>
    %10 = vector.broadcast %9 : vector<1x8xi1> to vector<8x8xi1>
    %11 = arith.ori %5, %10 : vector<8x8xi1>
    %12 = vector.extract_strided_slice %2 {offsets = [0, 0], sizes = [8, 8], strides = [1, 1]} : vector<8x96xf32> to vector<8x8xf32>
    %cst_5 = arith.constant 0.353553385 : f32
    %13 = vector.broadcast %cst_5 : f32 to vector<8x8xf32>
    %14 = arith.mulf %12, %13 : vector<8x8xf32>
    %15 = vector.extract_strided_slice %2 {offsets = [0, 32], sizes = [8, 8], strides = [1, 1]} : vector<8x96xf32> to vector<8x8xf32>
    %16 = vector.extract_strided_slice %2 {offsets = [0, 64], sizes = [8, 8], strides = [1, 1]} : vector<8x96xf32> to vector<8x8xf32>
    %cst_6 = arith.constant dense<0.000000e+00> : vector<8x8xf32>
    %17 = tpu.matmul %14, %15, %cst_6 {dimension_numbers = #tpu.dot_dimension_numbers<[1], [1], [0], [0], [0, 0, 1, 0], [], []>} : vector<8x8xf32>, vector<8x8xf32>, vector<8x8xf32> -> vector<8x8xf32>
    %cst_7 = arith.constant -1.000000e+30 : f32
    %18 = vector.broadcast %cst_7 : f32 to vector<8x8xf32>
    %19 = arith.select %11, %18, %17 : vector<8x8xi1>, vector<8x8xf32>
    %cst_8 = arith.constant dense<0xFF800000> : vector<8xf32>
    %20 = vector.multi_reduction <maximumf>, %19, %cst_8 [1] : vector<8x8xf32> to vector<8xf32>
    %21 = vector.shape_cast %20 : vector<8xf32> to vector<8x1xf32>
    %22 = vector.broadcast %21 : vector<8x1xf32> to vector<8x8xf32>
    %23 = arith.subf %19, %22 : vector<8x8xf32>
    %24 = math.exp %23 : vector<8x8xf32>
    %cst_9 = arith.constant dense<0.000000e+00> : vector<8xf32>
    %25 = vector.multi_reduction <add>, %24, %cst_9 [1] : vector<8x8xf32> to vector<8xf32>
    %26 = vector.shape_cast %25 : vector<8xf32> to vector<8x1xf32>
    %27 = tpu.reciprocal %26 {approx = true} : vector<8x1xf32> -> vector<8x1xf32>
    %28 = vector.broadcast %27 : vector<8x1xf32> to vector<8x8xf32>
    %29 = arith.mulf %24, %28 : vector<8x8xf32>
    %cst_10 = arith.constant dense<0.000000e+00> : vector<8x8xf32>
    %30 = tpu.matmul %29, %16, %cst_10 {dimension_numbers = #tpu.dot_dimension_numbers<[1], [0], [0], [1], [0, 0, 1, 1], [], []>} : vector<8x8xf32>, vector<8x8xf32>, vector<8x8xf32> -> vector<8x8xf32>
    %31 = vector.extract_strided_slice %2 {offsets = [0, 8], sizes = [8, 8], strides = [1, 1]} : vector<8x96xf32> to vector<8x8xf32>
    %cst_11 = arith.constant 0.353553385 : f32
    %32 = vector.broadcast %cst_11 : f32 to vector<8x8xf32>
    %33 = arith.mulf %31, %32 : vector<8x8xf32>
    %34 = vector.extract_strided_slice %2 {offsets = [0, 40], sizes = [8, 8], strides = [1, 1]} : vector<8x96xf32> to vector<8x8xf32>
    %35 = vector.extract_strided_slice %2 {offsets = [0, 72], sizes = [8, 8], strides = [1, 1]} : vector<8x96xf32> to vector<8x8xf32>
    %cst_12 = arith.constant dense<0.000000e+00> : vector<8x8xf32>
    %36 = tpu.matmul %33, %34, %cst_12 {dimension_numbers = #tpu.dot_dimension_numbers<[1], [1], [0], [0], [0, 0, 1, 0], [], []>} : vector<8x8xf32>, vector<8x8xf32>, vector<8x8xf32> -> vector<8x8xf32>
    %cst_13 = arith.constant -1.000000e+30 : f32
    %37 = vector.broadcast %cst_13 : f32 to vector<8x8xf32>
    %38 = arith.select %11, %37, %36 : vector<8x8xi1>, vector<8x8xf32>
    %cst_14 = arith.constant dense<0xFF800000> : vector<8xf32>
    %39 = vector.multi_reduction <maximumf>, %38, %cst_14 [1] : vector<8x8xf32> to vector<8xf32>
    %40 = vector.shape_cast %39 : vector<8xf32> to vector<8x1xf32>
    %41 = vector.broadcast %40 : vector<8x1xf32> to vector<8x8xf32>
    %42 = arith.subf %38, %41 : vector<8x8xf32>
    %43 = math.exp %42 : vector<8x8xf32>
    %cst_15 = arith.constant dense<0.000000e+00> : vector<8xf32>
    %44 = vector.multi_reduction <add>, %43, %cst_15 [1] : vector<8x8xf32> to vector<8xf32>
    %45 = vector.shape_cast %44 : vector<8xf32> to vector<8x1xf32>
    %46 = tpu.reciprocal %45 {approx = true} : vector<8x1xf32> -> vector<8x1xf32>
    %47 = vector.broadcast %46 : vector<8x1xf32> to vector<8x8xf32>
    %48 = arith.mulf %43, %47 : vector<8x8xf32>
    %cst_16 = arith.constant dense<0.000000e+00> : vector<8x8xf32>
    %49 = tpu.matmul %48, %35, %cst_16 {dimension_numbers = #tpu.dot_dimension_numbers<[1], [0], [0], [1], [0, 0, 1, 1], [], []>} : vector<8x8xf32>, vector<8x8xf32>, vector<8x8xf32> -> vector<8x8xf32>
    %50 = vector.extract_strided_slice %2 {offsets = [0, 16], sizes = [8, 8], strides = [1, 1]} : vector<8x96xf32> to vector<8x8xf32>
    %cst_17 = arith.constant 0.353553385 : f32
    %51 = vector.broadcast %cst_17 : f32 to vector<8x8xf32>
    %52 = arith.mulf %50, %51 : vector<8x8xf32>
    %53 = vector.extract_strided_slice %2 {offsets = [0, 48], sizes = [8, 8], strides = [1, 1]} : vector<8x96xf32> to vector<8x8xf32>
    %54 = vector.extract_strided_slice %2 {offsets = [0, 80], sizes = [8, 8], strides = [1, 1]} : vector<8x96xf32> to vector<8x8xf32>
    %cst_18 = arith.constant dense<0.000000e+00> : vector<8x8xf32>
    %55 = tpu.matmul %52, %53, %cst_18 {dimension_numbers = #tpu.dot_dimension_numbers<[1], [1], [0], [0], [0, 0, 1, 0], [], []>} : vector<8x8xf32>, vector<8x8xf32>, vector<8x8xf32> -> vector<8x8xf32>
    %cst_19 = arith.constant -1.000000e+30 : f32
    %56 = vector.broadcast %cst_19 : f32 to vector<8x8xf32>
    %57 = arith.select %11, %56, %55 : vector<8x8xi1>, vector<8x8xf32>
    %cst_20 = arith.constant dense<0xFF800000> : vector<8xf32>
    %58 = vector.multi_reduction <maximumf>, %57, %cst_20 [1] : vector<8x8xf32> to vector<8xf32>
    %59 = vector.shape_cast %58 : vector<8xf32> to vector<8x1xf32>
    %60 = vector.broadcast %59 : vector<8x1xf32> to vector<8x8xf32>
    %61 = arith.subf %57, %60 : vector<8x8xf32>
    %62 = math.exp %61 : vector<8x8xf32>
    %cst_21 = arith.constant dense<0.000000e+00> : vector<8xf32>
    %63 = vector.multi_reduction <add>, %62, %cst_21 [1] : vector<8x8xf32> to vector<8xf32>
    %64 = vector.shape_cast %63 : vector<8xf32> to vector<8x1xf32>
    %65 = tpu.reciprocal %64 {approx = true} : vector<8x1xf32> -> vector<8x1xf32>
    %66 = vector.broadcast %65 : vector<8x1xf32> to vector<8x8xf32>
    %67 = arith.mulf %62, %66 : vector<8x8xf32>
    %cst_22 = arith.constant dense<0.000000e+00> : vector<8x8xf32>
    %68 = tpu.matmul %67, %54, %cst_22 {dimension_numbers = #tpu.dot_dimension_numbers<[1], [0], [0], [1], [0, 0, 1, 1], [], []>} : vector<8x8xf32>, vector<8x8xf32>, vector<8x8xf32> -> vector<8x8xf32>
    %69 = vector.extract_strided_slice %2 {offsets = [0, 24], sizes = [8, 8], strides = [1, 1]} : vector<8x96xf32> to vector<8x8xf32>
    %cst_23 = arith.constant 0.353553385 : f32
    %70 = vector.broadcast %cst_23 : f32 to vector<8x8xf32>
    %71 = arith.mulf %69, %70 : vector<8x8xf32>
    %72 = vector.extract_strided_slice %2 {offsets = [0, 56], sizes = [8, 8], strides = [1, 1]} : vector<8x96xf32> to vector<8x8xf32>
    %73 = vector.extract_strided_slice %2 {offsets = [0, 88], sizes = [8, 8], strides = [1, 1]} : vector<8x96xf32> to vector<8x8xf32>
    %cst_24 = arith.constant dense<0.000000e+00> : vector<8x8xf32>
    %74 = tpu.matmul %71, %72, %cst_24 {dimension_numbers = #tpu.dot_dimension_numbers<[1], [1], [0], [0], [0, 0, 1, 0], [], []>} : vector<8x8xf32>, vector<8x8xf32>, vector<8x8xf32> -> vector<8x8xf32>
    %cst_25 = arith.constant -1.000000e+30 : f32
    %75 = vector.broadcast %cst_25 : f32 to vector<8x8xf32>
    %76 = arith.select %11, %75, %74 : vector<8x8xi1>, vector<8x8xf32>
    %cst_26 = arith.constant dense<0xFF800000> : vector<8xf32>
    %77 = vector.multi_reduction <maximumf>, %76, %cst_26 [1] : vector<8x8xf32> to vector<8xf32>
    %78 = vector.shape_cast %77 : vector<8xf32> to vector<8x1xf32>
    %79 = vector.broadcast %78 : vector<8x1xf32> to vector<8x8xf32>
    %80 = arith.subf %76, %79 : vector<8x8xf32>
    %81 = math.exp %80 : vector<8x8xf32>
    %cst_27 = arith.constant dense<0.000000e+00> : vector<8xf32>
    %82 = vector.multi_reduction <add>, %81, %cst_27 [1] : vector<8x8xf32> to vector<8xf32>
    %83 = vector.shape_cast %82 : vector<8xf32> to vector<8x1xf32>
    %84 = tpu.reciprocal %83 {approx = true} : vector<8x1xf32> -> vector<8x1xf32>
    %85 = vector.broadcast %84 : vector<8x1xf32> to vector<8x8xf32>
    %86 = arith.mulf %81, %85 : vector<8x8xf32>
    %cst_28 = arith.constant dense<0.000000e+00> : vector<8x8xf32>
    %87 = tpu.matmul %86, %73, %cst_28 {dimension_numbers = #tpu.dot_dimension_numbers<[1], [0], [0], [1], [0, 0, 1, 1], [], []>} : vector<8x8xf32>, vector<8x8xf32>, vector<8x8xf32> -> vector<8x8xf32>
    %88 = tpu.concatenate %30, %49, %68, %87 in 1 : vector<8x8xf32>, vector<8x8xf32>, vector<8x8xf32>, vector<8x8xf32> -> vector<8x32xf32>
    %89 = arith.truncf %88 : vector<8x32xf32> to vector<8x32xbf16>
    %c0_29 = arith.constant 0 : index
    %c0_30 = arith.constant 0 : index
    %c0_31 = arith.constant 0 : index
    %90 = vector.load %arg3[%c0_29, %c0_30, %c0_31] : memref<1x8x32xbf16, #tpu.memory_space<vmem>>, vector<1x8x32xbf16>
    %91 = vector.shape_cast %90 : vector<1x8x32xbf16> to vector<8x32xbf16>
    %92 = vector.shape_cast %89 : vector<8x32xbf16> to vector<1x8x32xbf16>
    tpu.vector_store %arg3[%c0_29, %c0_30, %c0_31], %92 {strides = array<i32>} : memref<1x8x32xbf16, #tpu.memory_space<vmem>>, vector<1x8x32xbf16>,
    return
  }
  func.func @transform_0(%arg0: i32) -> (i32, i32, i32) {
    %c0_i32 = arith.constant 0 : i32
    %c0_i32_0 = arith.constant 0 : i32
    %c0_i32_1 = arith.constant 0 : i32
    return %arg0, %c0_i32, %c0_i32_0 : i32, i32, i32
  }
  func.func @transform_1(%arg0: i32) -> (i32, i32, i32) {
    %c0_i32 = arith.constant 0 : i32
    %c0_i32_0 = arith.constant 0 : i32
    %c0_i32_1 = arith.constant 0 : i32
    return %arg0, %c0_i32, %c0_i32_0 : i32, i32, i32
  }
  func.func @transform_2(%arg0: i32) -> (i32, i32, i32) {
    %c0_i32 = arith.constant 0 : i32
    %c0_i32_0 = arith.constant 0 : i32
    %c0_i32_1 = arith.constant 0 : i32
    return %arg0, %c0_i32, %c0_i32_0 : i32, i32, i32
  }
}

module attributes {stable_mosaic.version = 11 : i64} {
  func.func @_linear_res_ln_kernel(%arg0: i32, %arg1: i32, %arg2: memref<16x32xbf16, #tpu.memory_space<vmem>>, %arg3: memref<32x32xbf16, #tpu.memory_space<vmem>>, %arg4: memref<1x32xf32, #tpu.memory_space<vmem>>, %arg5: memref<16x32xbf16, #tpu.memory_space<vmem>>, %arg6: memref<1x32xf32, #tpu.memory_space<vmem>>, %arg7: memref<1x32xf32, #tpu.memory_space<vmem>>, %arg8: memref<16x32xbf16, #tpu.memory_space<vmem>>, %arg9: memref<16x32xf32, #tpu.memory_space<vmem>>) attributes {dimension_semantics = [#tpu.dimension_semantics<parallel>, #tpu.dimension_semantics<arbitrary>], iteration_bounds = array<i64: 1, 1>, scalar_prefetch = 0 : i64, scratch_operands = 1 : i64, tpu.core_type = #tpu.core_type<tc>, window_params = [{transform_indices = @transform_0, window_bounds = array<i64: 16, 32>}, {transform_indices = @transform_1, window_bounds = array<i64: 32, 32>}, {pipeline_mode = #tpu.pipeline_mode<synchronous>, transform_indices = @transform_2, window_bounds = array<i64: 1, 32>}, {transform_indices = @transform_3, window_bounds = array<i64: 16, 32>}, {pipeline_mode = #tpu.pipeline_mode<synchronous>, transform_indices = @transform_4, window_bounds = array<i64: 1, 32>}, {pipeline_mode = #tpu.pipeline_mode<synchronous>, transform_indices = @transform_5, window_bounds = array<i64: 1, 32>}, {transform_indices = @transform_6, window_bounds = array<i64: 16, 32>}]} {
    %c0_i32 = arith.constant 0 : i32
    %0 = arith.cmpi eq, %arg1, %c0_i32 : i32
    %1 = arith.extui %0 : i1 to i32
    %c0_i32_0 = arith.constant 0 : i32
    %2 = arith.cmpi ne, %1, %c0_i32_0 : i32
    scf.if %2 {
      %cst_10 = arith.constant 0.000000e+00 : f32
      %12 = vector.broadcast %cst_10 : f32 to vector<16x32xf32>
      %c0_11 = arith.constant 0 : index
      %c0_12 = arith.constant 0 : index
      %13 = vector.load %arg9[%c0_11, %c0_12] : memref<16x32xf32, #tpu.memory_space<vmem>>, vector<16x32xf32>
      tpu.vector_store %arg9[%c0_11, %c0_12], %12 {strides = array<i32>} : memref<16x32xf32, #tpu.memory_space<vmem>>, vector<16x32xf32>,
    } else {
    }
    %c0 = arith.constant 0 : index
    %c0_1 = arith.constant 0 : index
    %3 = vector.load %arg9[%c0, %c0_1] : memref<16x32xf32, #tpu.memory_space<vmem>>, vector<16x32xf32>
    %c0_2 = arith.constant 0 : index
    %c0_3 = arith.constant 0 : index
    %4 = vector.load %arg2[%c0_2, %c0_3] : memref<16x32xbf16, #tpu.memory_space<vmem>>, vector<16x32xbf16>
    %c0_4 = arith.constant 0 : index
    %c0_5 = arith.constant 0 : index
    %5 = vector.load %arg3[%c0_4, %c0_5] : memref<32x32xbf16, #tpu.memory_space<vmem>>, vector<32x32xbf16>
    %cst = arith.constant dense<0.000000e+00> : vector<16x32xf32>
    %6 = tpu.matmul %4, %5, %cst {dimension_numbers = #tpu.dot_dimension_numbers<[1], [0], [0], [1], [0, 0, 1, 1], [], []>} : vector<16x32xbf16>, vector<32x32xbf16>, vector<16x32xf32> -> vector<16x32xf32>
    %7 = arith.addf %3, %6 : vector<16x32xf32>
    %c0_6 = arith.constant 0 : index
    %c0_7 = arith.constant 0 : index
    %8 = vector.load %arg9[%c0_6, %c0_7] : memref<16x32xf32, #tpu.memory_space<vmem>>, vector<16x32xf32>
    tpu.vector_store %arg9[%c0_6, %c0_7], %7 {strides = array<i32>} : memref<16x32xf32, #tpu.memory_space<vmem>>, vector<16x32xf32>,
    %c0_i32_8 = arith.constant 0 : i32
    %9 = arith.cmpi eq, %arg1, %c0_i32_8 : i32
    %10 = arith.extui %9 : i1 to i32
    %c0_i32_9 = arith.constant 0 : i32
    %11 = arith.cmpi ne, %10, %c0_i32_9 : i32
    scf.if %11 {
      %c0_10 = arith.constant 0 : index
      %c0_11 = arith.constant 0 : index
      %12 = vector.load %arg9[%c0_10, %c0_11] : memref<16x32xf32, #tpu.memory_space<vmem>>, vector<16x32xf32>
      %c0_12 = arith.constant 0 : index
      %c0_13 = arith.constant 0 : index
      %13 = vector.load %arg4[%c0_12, %c0_13] : memref<1x32xf32, #tpu.memory_space<vmem>>, vector<1x32xf32>
      %14 = vector.broadcast %13 : vector<1x32xf32> to vector<16x32xf32>
      %15 = arith.addf %12, %14 : vector<16x32xf32>
      %c0_14 = arith.constant 0 : index
      %c0_15 = arith.constant 0 : index
      %16 = vector.load %arg5[%c0_14, %c0_15] : memref<16x32xbf16, #tpu.memory_space<vmem>>, vector<16x32xbf16>
      %17 = arith.extf %16 : vector<16x32xbf16> to vector<16x32xf32>
      %18 = arith.addf %15, %17 : vector<16x32xf32>
      %cst_16 = arith.constant dense<0.000000e+00> : vector<16xf32>
      %19 = vector.multi_reduction <add>, %18, %cst_16 [1] : vector<16x32xf32> to vector<16xf32>
      %20 = vector.shape_cast %19 : vector<16xf32> to vector<16x1xf32>
      %cst_17 = arith.constant 3.200000e+01 : f32
      %21 = vector.broadcast %cst_17 : f32 to vector<16x1xf32>
      %22 = arith.divf %20, %21 : vector<16x1xf32>
      %23 = vector.broadcast %22 : vector<16x1xf32> to vector<16x32xf32>
      %24 = arith.subf %18, %23 : vector<16x32xf32>
      %25 = vector.broadcast %22 : vector<16x1xf32> to vector<16x32xf32>
      %26 = arith.subf %18, %25 : vector<16x32xf32>
      %27 = arith.mulf %24, %26 : vector<16x32xf32>
      %cst_18 = arith.constant dense<0.000000e+00> : vector<16xf32>
      %28 = vector.multi_reduction <add>, %27, %cst_18 [1] : vector<16x32xf32> to vector<16xf32>
      %29 = vector.shape_cast %28 : vector<16xf32> to vector<16x1xf32>
      %cst_19 = arith.constant 3.200000e+01 : f32
      %30 = vector.broadcast %cst_19 : f32 to vector<16x1xf32>
      %31 = arith.divf %29, %30 : vector<16x1xf32>
      %32 = vector.broadcast %22 : vector<16x1xf32> to vector<16x32xf32>
      %33 = arith.subf %18, %32 : vector<16x32xf32>
      %cst_20 = arith.constant 9.99999974E-6 : f32
      %34 = vector.broadcast %cst_20 : f32 to vector<16x1xf32>
      %35 = arith.addf %31, %34 : vector<16x1xf32>
      %36 = math.rsqrt %35 : vector<16x1xf32>
      %37 = vector.broadcast %36 : vector<16x1xf32> to vector<16x32xf32>
      %38 = arith.mulf %33, %37 : vector<16x32xf32>
      %c0_21 = arith.constant 0 : index
      %c0_22 = arith.constant 0 : index
      %39 = vector.load %arg6[%c0_21, %c0_22] : memref<1x32xf32, #tpu.memory_space<vmem>>, vector<1x32xf32>
      %40 = vector.broadcast %39 : vector<1x32xf32> to vector<16x32xf32>
      %41 = arith.mulf %38, %40 : vector<16x32xf32>
      %c0_23 = arith.constant 0 : index
      %c0_24 = arith.constant 0 : index
      %42 = vector.load %arg7[%c0_23, %c0_24] : memref<1x32xf32, #tpu.memory_space<vmem>>, vector<1x32xf32>
      %43 = vector.broadcast %42 : vector<1x32xf32> to vector<16x32xf32>
      %44 = arith.addf %41, %43 : vector<16x32xf32>
      %45 = arith.truncf %44 : vector<16x32xf32> to vector<16x32xbf16>
      %c0_25 = arith.constant 0 : index
      %c0_26 = arith.constant 0 : index
      %46 = vector.load %arg8[%c0_25, %c0_26] : memref<16x32xbf16, #tpu.memory_space<vmem>>, vector<16x32xbf16>
      tpu.vector_store %arg8[%c0_25, %c0_26], %45 {strides = array<i32>} : memref<16x32xbf16, #tpu.memory_space<vmem>>, vector<16x32xbf16>,
    } else {
    }
    return
  }
  func.func @transform_0(%arg0: i32, %arg1: i32) -> (i32, i32) {
    %c0_i32 = arith.constant 0 : i32
    return %arg0, %arg1 : i32, i32
  }
  func.func @transform_1(%arg0: i32, %arg1: i32) -> (i32, i32) {
    %c0_i32 = arith.constant 0 : i32
    %c0_i32_0 = arith.constant 0 : i32
    return %arg1, %c0_i32 : i32, i32
  }
  func.func @transform_2(%arg0: i32, %arg1: i32) -> (i32, i32) {
    %c0_i32 = arith.constant 0 : i32
    %c0_i32_0 = arith.constant 0 : i32
    %c0_i32_1 = arith.constant 0 : i32
    return %c0_i32, %c0_i32_0 : i32, i32
  }
  func.func @transform_3(%arg0: i32, %arg1: i32) -> (i32, i32) {
    %c0_i32 = arith.constant 0 : i32
    %c0_i32_0 = arith.constant 0 : i32
    return %arg0, %c0_i32 : i32, i32
  }
  func.func @transform_4(%arg0: i32, %arg1: i32) -> (i32, i32) {
    %c0_i32 = arith.constant 0 : i32
    %c0_i32_0 = arith.constant 0 : i32
    %c0_i32_1 = arith.constant 0 : i32
    return %c0_i32, %c0_i32_0 : i32, i32
  }
  func.func @transform_5(%arg0: i32, %arg1: i32) -> (i32, i32) {
    %c0_i32 = arith.constant 0 : i32
    %c0_i32_0 = arith.constant 0 : i32
    %c0_i32_1 = arith.constant 0 : i32
    return %c0_i32, %c0_i32_0 : i32, i32
  }
  func.func @transform_6(%arg0: i32, %arg1: i32) -> (i32, i32) {
    %c0_i32 = arith.constant 0 : i32
    %c0_i32_0 = arith.constant 0 : i32
    return %arg0, %c0_i32 : i32, i32
  }
}

module attributes {stable_mosaic.version = 11 : i64} {
  func.func @_linear_kernel(%arg0: i32, %arg1: i32, %arg2: i32, %arg3: memref<16x32xbf16, #tpu.memory_space<vmem>>, %arg4: memref<32x32xbf16, #tpu.memory_space<vmem>>, %arg5: memref<1x32xf32, #tpu.memory_space<vmem>>, %arg6: memref<16x32xbf16, #tpu.memory_space<vmem>>, %arg7: memref<16x32xf32, #tpu.memory_space<vmem>>) attributes {dimension_semantics = [#tpu.dimension_semantics<parallel>, #tpu.dimension_semantics<parallel>, #tpu.dimension_semantics<arbitrary>], iteration_bounds = array<i64: 1, 1, 1>, scalar_prefetch = 0 : i64, scratch_operands = 1 : i64, tpu.core_type = #tpu.core_type<tc>, window_params = [{transform_indices = @transform_0, window_bounds = array<i64: 16, 32>}, {transform_indices = @transform_1, window_bounds = array<i64: 32, 32>}, {transform_indices = @transform_2, window_bounds = array<i64: 1, 32>}, {transform_indices = @transform_3, window_bounds = array<i64: 16, 32>}]} {
    %c0_i32 = arith.constant 0 : i32
    %0 = arith.cmpi eq, %arg2, %c0_i32 : i32
    %1 = arith.extui %0 : i1 to i32
    %c0_i32_0 = arith.constant 0 : i32
    %2 = arith.cmpi ne, %1, %c0_i32_0 : i32
    scf.if %2 {
      %cst_10 = arith.constant 0.000000e+00 : f32
      %12 = vector.broadcast %cst_10 : f32 to vector<16x32xf32>
      %c0_11 = arith.constant 0 : index
      %c0_12 = arith.constant 0 : index
      %13 = vector.load %arg7[%c0_11, %c0_12] : memref<16x32xf32, #tpu.memory_space<vmem>>, vector<16x32xf32>
      tpu.vector_store %arg7[%c0_11, %c0_12], %12 {strides = array<i32>} : memref<16x32xf32, #tpu.memory_space<vmem>>, vector<16x32xf32>,
    } else {
    }
    %c0 = arith.constant 0 : index
    %c0_1 = arith.constant 0 : index
    %3 = vector.load %arg7[%c0, %c0_1] : memref<16x32xf32, #tpu.memory_space<vmem>>, vector<16x32xf32>
    %c0_2 = arith.constant 0 : index
    %c0_3 = arith.constant 0 : index
    %4 = vector.load %arg3[%c0_2, %c0_3] : memref<16x32xbf16, #tpu.memory_space<vmem>>, vector<16x32xbf16>
    %c0_4 = arith.constant 0 : index
    %c0_5 = arith.constant 0 : index
    %5 = vector.load %arg4[%c0_4, %c0_5] : memref<32x32xbf16, #tpu.memory_space<vmem>>, vector<32x32xbf16>
    %cst = arith.constant dense<0.000000e+00> : vector<16x32xf32>
    %6 = tpu.matmul %4, %5, %cst {dimension_numbers = #tpu.dot_dimension_numbers<[1], [0], [0], [1], [0, 0, 1, 1], [], []>} : vector<16x32xbf16>, vector<32x32xbf16>, vector<16x32xf32> -> vector<16x32xf32>
    %7 = arith.addf %3, %6 : vector<16x32xf32>
    %c0_6 = arith.constant 0 : index
    %c0_7 = arith.constant 0 : index
    %8 = vector.load %arg7[%c0_6, %c0_7] : memref<16x32xf32, #tpu.memory_space<vmem>>, vector<16x32xf32>
    tpu.vector_store %arg7[%c0_6, %c0_7], %7 {strides = array<i32>} : memref<16x32xf32, #tpu.memory_space<vmem>>, vector<16x32xf32>,
    %c0_i32_8 = arith.constant 0 : i32
    %9 = arith.cmpi eq, %arg2, %c0_i32_8 : i32
    %10 = arith.extui %9 : i1 to i32
    %c0_i32_9 = arith.constant 0 : i32
    %11 = arith.cmpi ne, %10, %c0_i32_9 : i32
    scf.if %11 {
      %c0_10 = arith.constant 0 : index
      %c0_11 = arith.constant 0 : index
      %12 = vector.load %arg7[%c0_10, %c0_11] : memref<16x32xf32, #tpu.memory_space<vmem>>, vector<16x32xf32>
      %c0_12 = arith.constant 0 : index
      %c0_13 = arith.constant 0 : index
      %13 = vector.load %arg5[%c0_12, %c0_13] : memref<1x32xf32, #tpu.memory_space<vmem>>, vector<1x32xf32>
      %14 = vector.broadcast %13 : vector<1x32xf32> to vector<16x32xf32>
      %15 = arith.addf %12, %14 : vector<16x32xf32>
      %16 = arith.truncf %15 : vector<16x32xf32> to vector<16x32xbf16>
      %c0_14 = arith.constant 0 : index
      %c0_15 = arith.constant 0 : index
      %17 = vector.load %arg6[%c0_14, %c0_15] : memref<16x32xbf16, #tpu.memory_space<vmem>>, vector<16x32xbf16>
      tpu.vector_store %arg6[%c0_14, %c0_15], %16 {strides = array<i32>} : memref<16x32xbf16, #tpu.memory_space<vmem>>, vector<16x32xbf16>,
    } else {
    }
    return
  }
  func.func @transform_0(%arg0: i32, %arg1: i32, %arg2: i32) -> (i32, i32) {
    %c0_i32 = arith.constant 0 : i32
    return %arg0, %arg2 : i32, i32
  }
  func.func @transform_1(%arg0: i32, %arg1: i32, %arg2: i32) -> (i32, i32) {
    %c0_i32 = arith.constant 0 : i32
    return %arg2, %arg1 : i32, i32
  }
  func.func @transform_2(%arg0: i32, %arg1: i32, %arg2: i32) -> (i32, i32) {
    %c0_i32 = arith.constant 0 : i32
    %c0_i32_0 = arith.constant 0 : i32
    return %c0_i32, %arg1 : i32, i32
  }
  func.func @transform_3(%arg0: i32, %arg1: i32, %arg2: i32) -> (i32, i32) {
    %c0_i32 = arith.constant 0 : i32
    return %arg0, %arg1 : i32, i32
  }
}

module attributes {stable_mosaic.version = 11 : i64} {
  func.func @_linear_kernel(%arg0: i32, %arg1: i32, %arg2: i32, %arg3: memref<16x32xbf16, #tpu.memory_space<vmem>>, %arg4: memref<32x96xbf16, #tpu.memory_space<vmem>>, %arg5: memref<1x96xf32, #tpu.memory_space<vmem>>, %arg6: memref<16x96xbf16, #tpu.memory_space<vmem>>, %arg7: memref<16x96xf32, #tpu.memory_space<vmem>>) attributes {dimension_semantics = [#tpu.dimension_semantics<parallel>, #tpu.dimension_semantics<parallel>, #tpu.dimension_semantics<arbitrary>], iteration_bounds = array<i64: 1, 1, 1>, scalar_prefetch = 0 : i64, scratch_operands = 1 : i64, tpu.core_type = #tpu.core_type<tc>, window_params = [{transform_indices = @transform_0, window_bounds = array<i64: 16, 32>}, {transform_indices = @transform_1, window_bounds = array<i64: 32, 96>}, {transform_indices = @transform_2, window_bounds = array<i64: 1, 96>}, {transform_indices = @transform_3, window_bounds = array<i64: 16, 96>}]} {
    %c0_i32 = arith.constant 0 : i32
    %0 = arith.cmpi eq, %arg2, %c0_i32 : i32
    %1 = arith.extui %0 : i1 to i32
    %c0_i32_0 = arith.constant 0 : i32
    %2 = arith.cmpi ne, %1, %c0_i32_0 : i32
    scf.if %2 {
      %cst_10 = arith.constant 0.000000e+00 : f32
      %12 = vector.broadcast %cst_10 : f32 to vector<16x96xf32>
      %c0_11 = arith.constant 0 : index
      %c0_12 = arith.constant 0 : index
      %13 = vector.load %arg7[%c0_11, %c0_12] : memref<16x96xf32, #tpu.memory_space<vmem>>, vector<16x96xf32>
      tpu.vector_store %arg7[%c0_11, %c0_12], %12 {strides = array<i32>} : memref<16x96xf32, #tpu.memory_space<vmem>>, vector<16x96xf32>,
    } else {
    }
    %c0 = arith.constant 0 : index
    %c0_1 = arith.constant 0 : index
    %3 = vector.load %arg7[%c0, %c0_1] : memref<16x96xf32, #tpu.memory_space<vmem>>, vector<16x96xf32>
    %c0_2 = arith.constant 0 : index
    %c0_3 = arith.constant 0 : index
    %4 = vector.load %arg3[%c0_2, %c0_3] : memref<16x32xbf16, #tpu.memory_space<vmem>>, vector<16x32xbf16>
    %c0_4 = arith.constant 0 : index
    %c0_5 = arith.constant 0 : index
    %5 = vector.load %arg4[%c0_4, %c0_5] : memref<32x96xbf16, #tpu.memory_space<vmem>>, vector<32x96xbf16>
    %cst = arith.constant dense<0.000000e+00> : vector<16x96xf32>
    %6 = tpu.matmul %4, %5, %cst {dimension_numbers = #tpu.dot_dimension_numbers<[1], [0], [0], [1], [0, 0, 1, 1], [], []>} : vector<16x32xbf16>, vector<32x96xbf16>, vector<16x96xf32> -> vector<16x96xf32>
    %7 = arith.addf %3, %6 : vector<16x96xf32>
    %c0_6 = arith.constant 0 : index
    %c0_7 = arith.constant 0 : index
    %8 = vector.load %arg7[%c0_6, %c0_7] : memref<16x96xf32, #tpu.memory_space<vmem>>, vector<16x96xf32>
    tpu.vector_store %arg7[%c0_6, %c0_7], %7 {strides = array<i32>} : memref<16x96xf32, #tpu.memory_space<vmem>>, vector<16x96xf32>,
    %c0_i32_8 = arith.constant 0 : i32
    %9 = arith.cmpi eq, %arg2, %c0_i32_8 : i32
    %10 = arith.extui %9 : i1 to i32
    %c0_i32_9 = arith.constant 0 : i32
    %11 = arith.cmpi ne, %10, %c0_i32_9 : i32
    scf.if %11 {
      %c0_10 = arith.constant 0 : index
      %c0_11 = arith.constant 0 : index
      %12 = vector.load %arg7[%c0_10, %c0_11] : memref<16x96xf32, #tpu.memory_space<vmem>>, vector<16x96xf32>
      %c0_12 = arith.constant 0 : index
      %c0_13 = arith.constant 0 : index
      %13 = vector.load %arg5[%c0_12, %c0_13] : memref<1x96xf32, #tpu.memory_space<vmem>>, vector<1x96xf32>
      %14 = vector.broadcast %13 : vector<1x96xf32> to vector<16x96xf32>
      %15 = arith.addf %12, %14 : vector<16x96xf32>
      %16 = arith.truncf %15 : vector<16x96xf32> to vector<16x96xbf16>
      %c0_14 = arith.constant 0 : index
      %c0_15 = arith.constant 0 : index
      %17 = vector.load %arg6[%c0_14, %c0_15] : memref<16x96xbf16, #tpu.memory_space<vmem>>, vector<16x96xbf16>
      tpu.vector_store %arg6[%c0_14, %c0_15], %16 {strides = array<i32>} : memref<16x96xbf16, #tpu.memory_space<vmem>>, vector<16x96xbf16>,
    } else {
    }
    return
  }
  func.func @transform_0(%arg0: i32, %arg1: i32, %arg2: i32) -> (i32, i32) {
    %c0_i32 = arith.constant 0 : i32
    return %arg0, %arg2 : i32, i32
  }
  func.func @transform_1(%arg0: i32, %arg1: i32, %arg2: i32) -> (i32, i32) {
    %c0_i32 = arith.constant 0 : i32
    return %arg2, %arg1 : i32, i32
  }
  func.func @transform_2(%arg0: i32, %arg1: i32, %arg2: i32) -> (i32, i32) {
    %c0_i32 = arith.constant 0 : i32
    %c0_i32_0 = arith.constant 0 : i32
    return %c0_i32, %arg1 : i32, i32
  }
  func.func @transform_3(%arg0: i32, %arg1: i32, %arg2: i32) -> (i32, i32) {
    %c0_i32 = arith.constant 0 : i32
    return %arg0, %arg1 : i32, i32
  }
}

module attributes {stable_mosaic.version = 11 : i64} {
  func.func @_linear_kernel(%arg0: i32, %arg1: i32, %arg2: i32, %arg3: memref<16x32xbf16, #tpu.memory_space<vmem>>, %arg4: memref<32x64xbf16, #tpu.memory_space<vmem>>, %arg5: memref<1x64xf32, #tpu.memory_space<vmem>>, %arg6: memref<16x64xbf16, #tpu.memory_space<vmem>>, %arg7: memref<16x64xf32, #tpu.memory_space<vmem>>) attributes {dimension_semantics = [#tpu.dimension_semantics<parallel>, #tpu.dimension_semantics<parallel>, #tpu.dimension_semantics<arbitrary>], iteration_bounds = array<i64: 1, 1, 1>, scalar_prefetch = 0 : i64, scratch_operands = 1 : i64, tpu.core_type = #tpu.core_type<tc>, window_params = [{transform_indices = @transform_0, window_bounds = array<i64: 16, 32>}, {transform_indices = @transform_1, window_bounds = array<i64: 32, 64>}, {transform_indices = @transform_2, window_bounds = array<i64: 1, 64>}, {transform_indices = @transform_3, window_bounds = array<i64: 16, 64>}]} {
    %c0_i32 = arith.constant 0 : i32
    %0 = arith.cmpi eq, %arg2, %c0_i32 : i32
    %1 = arith.extui %0 : i1 to i32
    %c0_i32_0 = arith.constant 0 : i32
    %2 = arith.cmpi ne, %1, %c0_i32_0 : i32
    scf.if %2 {
      %cst_10 = arith.constant 0.000000e+00 : f32
      %12 = vector.broadcast %cst_10 : f32 to vector<16x64xf32>
      %c0_11 = arith.constant 0 : index
      %c0_12 = arith.constant 0 : index
      %13 = vector.load %arg7[%c0_11, %c0_12] : memref<16x64xf32, #tpu.memory_space<vmem>>, vector<16x64xf32>
      tpu.vector_store %arg7[%c0_11, %c0_12], %12 {strides = array<i32>} : memref<16x64xf32, #tpu.memory_space<vmem>>, vector<16x64xf32>,
    } else {
    }
    %c0 = arith.constant 0 : index
    %c0_1 = arith.constant 0 : index
    %3 = vector.load %arg7[%c0, %c0_1] : memref<16x64xf32, #tpu.memory_space<vmem>>, vector<16x64xf32>
    %c0_2 = arith.constant 0 : index
    %c0_3 = arith.constant 0 : index
    %4 = vector.load %arg3[%c0_2, %c0_3] : memref<16x32xbf16, #tpu.memory_space<vmem>>, vector<16x32xbf16>
    %c0_4 = arith.constant 0 : index
    %c0_5 = arith.constant 0 : index
    %5 = vector.load %arg4[%c0_4, %c0_5] : memref<32x64xbf16, #tpu.memory_space<vmem>>, vector<32x64xbf16>
    %cst = arith.constant dense<0.000000e+00> : vector<16x64xf32>
    %6 = tpu.matmul %4, %5, %cst {dimension_numbers = #tpu.dot_dimension_numbers<[1], [0], [0], [1], [0, 0, 1, 1], [], []>} : vector<16x32xbf16>, vector<32x64xbf16>, vector<16x64xf32> -> vector<16x64xf32>
    %7 = arith.addf %3, %6 : vector<16x64xf32>
    %c0_6 = arith.constant 0 : index
    %c0_7 = arith.constant 0 : index
    %8 = vector.load %arg7[%c0_6, %c0_7] : memref<16x64xf32, #tpu.memory_space<vmem>>, vector<16x64xf32>
    tpu.vector_store %arg7[%c0_6, %c0_7], %7 {strides = array<i32>} : memref<16x64xf32, #tpu.memory_space<vmem>>, vector<16x64xf32>,
    %c0_i32_8 = arith.constant 0 : i32
    %9 = arith.cmpi eq, %arg2, %c0_i32_8 : i32
    %10 = arith.extui %9 : i1 to i32
    %c0_i32_9 = arith.constant 0 : i32
    %11 = arith.cmpi ne, %10, %c0_i32_9 : i32
    scf.if %11 {
      %c0_10 = arith.constant 0 : index
      %c0_11 = arith.constant 0 : index
      %12 = vector.load %arg7[%c0_10, %c0_11] : memref<16x64xf32, #tpu.memory_space<vmem>>, vector<16x64xf32>
      %c0_12 = arith.constant 0 : index
      %c0_13 = arith.constant 0 : index
      %13 = vector.load %arg5[%c0_12, %c0_13] : memref<1x64xf32, #tpu.memory_space<vmem>>, vector<1x64xf32>
      %14 = vector.broadcast %13 : vector<1x64xf32> to vector<16x64xf32>
      %15 = arith.addf %12, %14 : vector<16x64xf32>
      %cst_14 = arith.constant 0.000000e+00 : f32
      %16 = vector.broadcast %cst_14 : f32 to vector<16x64xf32>
      %17 = arith.maximumf %15, %16 : vector<16x64xf32>
      %18 = arith.truncf %17 : vector<16x64xf32> to vector<16x64xbf16>
      %c0_15 = arith.constant 0 : index
      %c0_16 = arith.constant 0 : index
      %19 = vector.load %arg6[%c0_15, %c0_16] : memref<16x64xbf16, #tpu.memory_space<vmem>>, vector<16x64xbf16>
      tpu.vector_store %arg6[%c0_15, %c0_16], %18 {strides = array<i32>} : memref<16x64xbf16, #tpu.memory_space<vmem>>, vector<16x64xbf16>,
    } else {
    }
    return
  }
  func.func @transform_0(%arg0: i32, %arg1: i32, %arg2: i32) -> (i32, i32) {
    %c0_i32 = arith.constant 0 : i32
    return %arg0, %arg2 : i32, i32
  }
  func.func @transform_1(%arg0: i32, %arg1: i32, %arg2: i32) -> (i32, i32) {
    %c0_i32 = arith.constant 0 : i32
    return %arg2, %arg1 : i32, i32
  }
  func.func @transform_2(%arg0: i32, %arg1: i32, %arg2: i32) -> (i32, i32) {
    %c0_i32 = arith.constant 0 : i32
    %c0_i32_0 = arith.constant 0 : i32
    return %c0_i32, %arg1 : i32, i32
  }
  func.func @transform_3(%arg0: i32, %arg1: i32, %arg2: i32) -> (i32, i32) {
    %c0_i32 = arith.constant 0 : i32
    return %arg0, %arg1 : i32, i32
  }
}

module attributes {stable_mosaic.version = 11 : i64} {
  func.func @_cross_attn_kernel(%arg0: i32, %arg1: memref<1x8x32xbf16, #tpu.memory_space<vmem>>, %arg2: memref<1x16x64xbf16, #tpu.memory_space<vmem>>, %arg3: memref<1x8x32xbf16, #tpu.memory_space<vmem>>) attributes {dimension_semantics = [#tpu.dimension_semantics<parallel>], iteration_bounds = array<i64: 2>, scalar_prefetch = 0 : i64, scratch_operands = 0 : i64, tpu.core_type = #tpu.core_type<tc>, window_params = [{transform_indices = @transform_0, window_bounds = array<i64: 1, 8, 32>}, {transform_indices = @transform_1, window_bounds = array<i64: 1, 16, 64>}, {transform_indices = @transform_2, window_bounds = array<i64: 1, 8, 32>}]} {
    %c0 = arith.constant 0 : index
    %c0_0 = arith.constant 0 : index
    %c0_1 = arith.constant 0 : index
    %0 = vector.load %arg1[%c0, %c0_0, %c0_1] : memref<1x8x32xbf16, #tpu.memory_space<vmem>>, vector<1x8x32xbf16>
    %1 = vector.shape_cast %0 : vector<1x8x32xbf16> to vector<8x32xbf16>
    %2 = arith.extf %1 : vector<8x32xbf16> to vector<8x32xf32>
    %c0_2 = arith.constant 0 : index
    %c0_3 = arith.constant 0 : index
    %c0_4 = arith.constant 0 : index
    %3 = vector.load %arg2[%c0_2, %c0_3, %c0_4] : memref<1x16x64xbf16, #tpu.memory_space<vmem>>, vector<1x16x64xbf16>
    %4 = vector.shape_cast %3 : vector<1x16x64xbf16> to vector<16x64xbf16>
    %5 = arith.extf %4 : vector<16x64xbf16> to vector<16x64xf32>
    %6 = vector.extract_strided_slice %2 {offsets = [0, 0], sizes = [8, 8], strides = [1, 1]} : vector<8x32xf32> to vector<8x8xf32>
    %cst = arith.constant 0.353553385 : f32
    %7 = vector.broadcast %cst : f32 to vector<8x8xf32>
    %8 = arith.mulf %6, %7 : vector<8x8xf32>
    %9 = vector.extract_strided_slice %5 {offsets = [0, 0], sizes = [16, 8], strides = [1, 1]} : vector<16x64xf32> to vector<16x8xf32>
    %10 = vector.extract_strided_slice %5 {offsets = [0, 32], sizes = [16, 8], strides = [1, 1]} : vector<16x64xf32> to vector<16x8xf32>
    %cst_5 = arith.constant dense<0.000000e+00> : vector<8x16xf32>
    %11 = tpu.matmul %8, %9, %cst_5 {dimension_numbers = #tpu.dot_dimension_numbers<[1], [1], [0], [0], [0, 0, 1, 0], [], []>} : vector<8x8xf32>, vector<16x8xf32>, vector<8x16xf32> -> vector<8x16xf32>
    %cst_6 = arith.constant dense<0xFF800000> : vector<8xf32>
    %12 = vector.multi_reduction <maximumf>, %11, %cst_6 [1] : vector<8x16xf32> to vector<8xf32>
    %13 = vector.shape_cast %12 : vector<8xf32> to vector<8x1xf32>
    %14 = vector.broadcast %13 : vector<8x1xf32> to vector<8x16xf32>
    %15 = arith.subf %11, %14 : vector<8x16xf32>
    %16 = math.exp %15 : vector<8x16xf32>
    %cst_7 = arith.constant dense<0.000000e+00> : vector<8xf32>
    %17 = vector.multi_reduction <add>, %16, %cst_7 [1] : vector<8x16xf32> to vector<8xf32>
    %18 = vector.shape_cast %17 : vector<8xf32> to vector<8x1xf32>
    %19 = tpu.reciprocal %18 {approx = true} : vector<8x1xf32> -> vector<8x1xf32>
    %20 = vector.broadcast %19 : vector<8x1xf32> to vector<8x16xf32>
    %21 = arith.mulf %16, %20 : vector<8x16xf32>
    %cst_8 = arith.constant dense<0.000000e+00> : vector<8x8xf32>
    %22 = tpu.matmul %21, %10, %cst_8 {dimension_numbers = #tpu.dot_dimension_numbers<[1], [0], [0], [1], [0, 0, 1, 1], [], []>} : vector<8x16xf32>, vector<16x8xf32>, vector<8x8xf32> -> vector<8x8xf32>
    %23 = vector.extract_strided_slice %2 {offsets = [0, 8], sizes = [8, 8], strides = [1, 1]} : vector<8x32xf32> to vector<8x8xf32>
    %cst_9 = arith.constant 0.353553385 : f32
    %24 = vector.broadcast %cst_9 : f32 to vector<8x8xf32>
    %25 = arith.mulf %23, %24 : vector<8x8xf32>
    %26 = vector.extract_strided_slice %5 {offsets = [0, 8], sizes = [16, 8], strides = [1, 1]} : vector<16x64xf32> to vector<16x8xf32>
    %27 = vector.extract_strided_slice %5 {offsets = [0, 40], sizes = [16, 8], strides = [1, 1]} : vector<16x64xf32> to vector<16x8xf32>
    %cst_10 = arith.constant dense<0.000000e+00> : vector<8x16xf32>
    %28 = tpu.matmul %25, %26, %cst_10 {dimension_numbers = #tpu.dot_dimension_numbers<[1], [1], [0], [0], [0, 0, 1, 0], [], []>} : vector<8x8xf32>, vector<16x8xf32>, vector<8x16xf32> -> vector<8x16xf32>
    %cst_11 = arith.constant dense<0xFF800000> : vector<8xf32>
    %29 = vector.multi_reduction <maximumf>, %28, %cst_11 [1] : vector<8x16xf32> to vector<8xf32>
    %30 = vector.shape_cast %29 : vector<8xf32> to vector<8x1xf32>
    %31 = vector.broadcast %30 : vector<8x1xf32> to vector<8x16xf32>
    %32 = arith.subf %28, %31 : vector<8x16xf32>
    %33 = math.exp %32 : vector<8x16xf32>
    %cst_12 = arith.constant dense<0.000000e+00> : vector<8xf32>
    %34 = vector.multi_reduction <add>, %33, %cst_12 [1] : vector<8x16xf32> to vector<8xf32>
    %35 = vector.shape_cast %34 : vector<8xf32> to vector<8x1xf32>
    %36 = tpu.reciprocal %35 {approx = true} : vector<8x1xf32> -> vector<8x1xf32>
    %37 = vector.broadcast %36 : vector<8x1xf32> to vector<8x16xf32>
    %38 = arith.mulf %33, %37 : vector<8x16xf32>
    %cst_13 = arith.constant dense<0.000000e+00> : vector<8x8xf32>
    %39 = tpu.matmul %38, %27, %cst_13 {dimension_numbers = #tpu.dot_dimension_numbers<[1], [0], [0], [1], [0, 0, 1, 1], [], []>} : vector<8x16xf32>, vector<16x8xf32>, vector<8x8xf32> -> vector<8x8xf32>
    %40 = vector.extract_strided_slice %2 {offsets = [0, 16], sizes = [8, 8], strides = [1, 1]} : vector<8x32xf32> to vector<8x8xf32>
    %cst_14 = arith.constant 0.353553385 : f32
    %41 = vector.broadcast %cst_14 : f32 to vector<8x8xf32>
    %42 = arith.mulf %40, %41 : vector<8x8xf32>
    %43 = vector.extract_strided_slice %5 {offsets = [0, 16], sizes = [16, 8], strides = [1, 1]} : vector<16x64xf32> to vector<16x8xf32>
    %44 = vector.extract_strided_slice %5 {offsets = [0, 48], sizes = [16, 8], strides = [1, 1]} : vector<16x64xf32> to vector<16x8xf32>
    %cst_15 = arith.constant dense<0.000000e+00> : vector<8x16xf32>
    %45 = tpu.matmul %42, %43, %cst_15 {dimension_numbers = #tpu.dot_dimension_numbers<[1], [1], [0], [0], [0, 0, 1, 0], [], []>} : vector<8x8xf32>, vector<16x8xf32>, vector<8x16xf32> -> vector<8x16xf32>
    %cst_16 = arith.constant dense<0xFF800000> : vector<8xf32>
    %46 = vector.multi_reduction <maximumf>, %45, %cst_16 [1] : vector<8x16xf32> to vector<8xf32>
    %47 = vector.shape_cast %46 : vector<8xf32> to vector<8x1xf32>
    %48 = vector.broadcast %47 : vector<8x1xf32> to vector<8x16xf32>
    %49 = arith.subf %45, %48 : vector<8x16xf32>
    %50 = math.exp %49 : vector<8x16xf32>
    %cst_17 = arith.constant dense<0.000000e+00> : vector<8xf32>
    %51 = vector.multi_reduction <add>, %50, %cst_17 [1] : vector<8x16xf32> to vector<8xf32>
    %52 = vector.shape_cast %51 : vector<8xf32> to vector<8x1xf32>
    %53 = tpu.reciprocal %52 {approx = true} : vector<8x1xf32> -> vector<8x1xf32>
    %54 = vector.broadcast %53 : vector<8x1xf32> to vector<8x16xf32>
    %55 = arith.mulf %50, %54 : vector<8x16xf32>
    %cst_18 = arith.constant dense<0.000000e+00> : vector<8x8xf32>
    %56 = tpu.matmul %55, %44, %cst_18 {dimension_numbers = #tpu.dot_dimension_numbers<[1], [0], [0], [1], [0, 0, 1, 1], [], []>} : vector<8x16xf32>, vector<16x8xf32>, vector<8x8xf32> -> vector<8x8xf32>
    %57 = vector.extract_strided_slice %2 {offsets = [0, 24], sizes = [8, 8], strides = [1, 1]} : vector<8x32xf32> to vector<8x8xf32>
    %cst_19 = arith.constant 0.353553385 : f32
    %58 = vector.broadcast %cst_19 : f32 to vector<8x8xf32>
    %59 = arith.mulf %57, %58 : vector<8x8xf32>
    %60 = vector.extract_strided_slice %5 {offsets = [0, 24], sizes = [16, 8], strides = [1, 1]} : vector<16x64xf32> to vector<16x8xf32>
    %61 = vector.extract_strided_slice %5 {offsets = [0, 56], sizes = [16, 8], strides = [1, 1]} : vector<16x64xf32> to vector<16x8xf32>
    %cst_20 = arith.constant dense<0.000000e+00> : vector<8x16xf32>
    %62 = tpu.matmul %59, %60, %cst_20 {dimension_numbers = #tpu.dot_dimension_numbers<[1], [1], [0], [0], [0, 0, 1, 0], [], []>} : vector<8x8xf32>, vector<16x8xf32>, vector<8x16xf32> -> vector<8x16xf32>
    %cst_21 = arith.constant dense<0xFF800000> : vector<8xf32>
    %63 = vector.multi_reduction <maximumf>, %62, %cst_21 [1] : vector<8x16xf32> to vector<8xf32>
    %64 = vector.shape_cast %63 : vector<8xf32> to vector<8x1xf32>
    %65 = vector.broadcast %64 : vector<8x1xf32> to vector<8x16xf32>
    %66 = arith.subf %62, %65 : vector<8x16xf32>
    %67 = math.exp %66 : vector<8x16xf32>
    %cst_22 = arith.constant dense<0.000000e+00> : vector<8xf32>
    %68 = vector.multi_reduction <add>, %67, %cst_22 [1] : vector<8x16xf32> to vector<8xf32>
    %69 = vector.shape_cast %68 : vector<8xf32> to vector<8x1xf32>
    %70 = tpu.reciprocal %69 {approx = true} : vector<8x1xf32> -> vector<8x1xf32>
    %71 = vector.broadcast %70 : vector<8x1xf32> to vector<8x16xf32>
    %72 = arith.mulf %67, %71 : vector<8x16xf32>
    %cst_23 = arith.constant dense<0.000000e+00> : vector<8x8xf32>
    %73 = tpu.matmul %72, %61, %cst_23 {dimension_numbers = #tpu.dot_dimension_numbers<[1], [0], [0], [1], [0, 0, 1, 1], [], []>} : vector<8x16xf32>, vector<16x8xf32>, vector<8x8xf32> -> vector<8x8xf32>
    %74 = tpu.concatenate %22, %39, %56, %73 in 1 : vector<8x8xf32>, vector<8x8xf32>, vector<8x8xf32>, vector<8x8xf32> -> vector<8x32xf32>
    %75 = arith.truncf %74 : vector<8x32xf32> to vector<8x32xbf16>
    %c0_24 = arith.constant 0 : index
    %c0_25 = arith.constant 0 : index
    %c0_26 = arith.constant 0 : index
    %76 = vector.load %arg3[%c0_24, %c0_25, %c0_26] : memref<1x8x32xbf16, #tpu.memory_space<vmem>>, vector<1x8x32xbf16>
    %77 = vector.shape_cast %76 : vector<1x8x32xbf16> to vector<8x32xbf16>
    %78 = vector.shape_cast %75 : vector<8x32xbf16> to vector<1x8x32xbf16>
    tpu.vector_store %arg3[%c0_24, %c0_25, %c0_26], %78 {strides = array<i32>} : memref<1x8x32xbf16, #tpu.memory_space<vmem>>, vector<1x8x32xbf16>,
    return
  }
  func.func @transform_0(%arg0: i32) -> (i32, i32, i32) {
    %c0_i32 = arith.constant 0 : i32
    %c0_i32_0 = arith.constant 0 : i32
    %c0_i32_1 = arith.constant 0 : i32
    return %arg0, %c0_i32, %c0_i32_0 : i32, i32, i32
  }
  func.func @transform_1(%arg0: i32) -> (i32, i32, i32) {
    %c0_i32 = arith.constant 0 : i32
    %c0_i32_0 = arith.constant 0 : i32
    %c0_i32_1 = arith.constant 0 : i32
    return %arg0, %c0_i32, %c0_i32_0 : i32, i32, i32
  }
  func.func @transform_2(%arg0: i32) -> (i32, i32, i32) {
    %c0_i32 = arith.constant 0 : i32
    %c0_i32_0 = arith.constant 0 : i32
    %c0_i32_1 = arith.constant 0 : i32
    return %arg0, %c0_i32, %c0_i32_0 : i32, i32, i32
  }
}

module attributes {stable_mosaic.version = 11 : i64} {
  func.func @_linear_res_ln_kernel(%arg0: i32, %arg1: i32, %arg2: memref<16x64xbf16, #tpu.memory_space<vmem>>, %arg3: memref<64x32xbf16, #tpu.memory_space<vmem>>, %arg4: memref<1x32xf32, #tpu.memory_space<vmem>>, %arg5: memref<16x32xbf16, #tpu.memory_space<vmem>>, %arg6: memref<1x32xf32, #tpu.memory_space<vmem>>, %arg7: memref<1x32xf32, #tpu.memory_space<vmem>>, %arg8: memref<16x32xbf16, #tpu.memory_space<vmem>>, %arg9: memref<16x32xf32, #tpu.memory_space<vmem>>) attributes {dimension_semantics = [#tpu.dimension_semantics<parallel>, #tpu.dimension_semantics<arbitrary>], iteration_bounds = array<i64: 1, 1>, scalar_prefetch = 0 : i64, scratch_operands = 1 : i64, tpu.core_type = #tpu.core_type<tc>, window_params = [{transform_indices = @transform_0, window_bounds = array<i64: 16, 64>}, {transform_indices = @transform_1, window_bounds = array<i64: 64, 32>}, {pipeline_mode = #tpu.pipeline_mode<synchronous>, transform_indices = @transform_2, window_bounds = array<i64: 1, 32>}, {transform_indices = @transform_3, window_bounds = array<i64: 16, 32>}, {pipeline_mode = #tpu.pipeline_mode<synchronous>, transform_indices = @transform_4, window_bounds = array<i64: 1, 32>}, {pipeline_mode = #tpu.pipeline_mode<synchronous>, transform_indices = @transform_5, window_bounds = array<i64: 1, 32>}, {transform_indices = @transform_6, window_bounds = array<i64: 16, 32>}]} {
    %c0_i32 = arith.constant 0 : i32
    %0 = arith.cmpi eq, %arg1, %c0_i32 : i32
    %1 = arith.extui %0 : i1 to i32
    %c0_i32_0 = arith.constant 0 : i32
    %2 = arith.cmpi ne, %1, %c0_i32_0 : i32
    scf.if %2 {
      %cst_10 = arith.constant 0.000000e+00 : f32
      %12 = vector.broadcast %cst_10 : f32 to vector<16x32xf32>
      %c0_11 = arith.constant 0 : index
      %c0_12 = arith.constant 0 : index
      %13 = vector.load %arg9[%c0_11, %c0_12] : memref<16x32xf32, #tpu.memory_space<vmem>>, vector<16x32xf32>
      tpu.vector_store %arg9[%c0_11, %c0_12], %12 {strides = array<i32>} : memref<16x32xf32, #tpu.memory_space<vmem>>, vector<16x32xf32>,
    } else {
    }
    %c0 = arith.constant 0 : index
    %c0_1 = arith.constant 0 : index
    %3 = vector.load %arg9[%c0, %c0_1] : memref<16x32xf32, #tpu.memory_space<vmem>>, vector<16x32xf32>
    %c0_2 = arith.constant 0 : index
    %c0_3 = arith.constant 0 : index
    %4 = vector.load %arg2[%c0_2, %c0_3] : memref<16x64xbf16, #tpu.memory_space<vmem>>, vector<16x64xbf16>
    %c0_4 = arith.constant 0 : index
    %c0_5 = arith.constant 0 : index
    %5 = vector.load %arg3[%c0_4, %c0_5] : memref<64x32xbf16, #tpu.memory_space<vmem>>, vector<64x32xbf16>
    %cst = arith.constant dense<0.000000e+00> : vector<16x32xf32>
    %6 = tpu.matmul %4, %5, %cst {dimension_numbers = #tpu.dot_dimension_numbers<[1], [0], [0], [1], [0, 0, 1, 1], [], []>} : vector<16x64xbf16>, vector<64x32xbf16>, vector<16x32xf32> -> vector<16x32xf32>
    %7 = arith.addf %3, %6 : vector<16x32xf32>
    %c0_6 = arith.constant 0 : index
    %c0_7 = arith.constant 0 : index
    %8 = vector.load %arg9[%c0_6, %c0_7] : memref<16x32xf32, #tpu.memory_space<vmem>>, vector<16x32xf32>
    tpu.vector_store %arg9[%c0_6, %c0_7], %7 {strides = array<i32>} : memref<16x32xf32, #tpu.memory_space<vmem>>, vector<16x32xf32>,
    %c0_i32_8 = arith.constant 0 : i32
    %9 = arith.cmpi eq, %arg1, %c0_i32_8 : i32
    %10 = arith.extui %9 : i1 to i32
    %c0_i32_9 = arith.constant 0 : i32
    %11 = arith.cmpi ne, %10, %c0_i32_9 : i32
    scf.if %11 {
      %c0_10 = arith.constant 0 : index
      %c0_11 = arith.constant 0 : index
      %12 = vector.load %arg9[%c0_10, %c0_11] : memref<16x32xf32, #tpu.memory_space<vmem>>, vector<16x32xf32>
      %c0_12 = arith.constant 0 : index
      %c0_13 = arith.constant 0 : index
      %13 = vector.load %arg4[%c0_12, %c0_13] : memref<1x32xf32, #tpu.memory_space<vmem>>, vector<1x32xf32>
      %14 = vector.broadcast %13 : vector<1x32xf32> to vector<16x32xf32>
      %15 = arith.addf %12, %14 : vector<16x32xf32>
      %c0_14 = arith.constant 0 : index
      %c0_15 = arith.constant 0 : index
      %16 = vector.load %arg5[%c0_14, %c0_15] : memref<16x32xbf16, #tpu.memory_space<vmem>>, vector<16x32xbf16>
      %17 = arith.extf %16 : vector<16x32xbf16> to vector<16x32xf32>
      %18 = arith.addf %15, %17 : vector<16x32xf32>
      %cst_16 = arith.constant dense<0.000000e+00> : vector<16xf32>
      %19 = vector.multi_reduction <add>, %18, %cst_16 [1] : vector<16x32xf32> to vector<16xf32>
      %20 = vector.shape_cast %19 : vector<16xf32> to vector<16x1xf32>
      %cst_17 = arith.constant 3.200000e+01 : f32
      %21 = vector.broadcast %cst_17 : f32 to vector<16x1xf32>
      %22 = arith.divf %20, %21 : vector<16x1xf32>
      %23 = vector.broadcast %22 : vector<16x1xf32> to vector<16x32xf32>
      %24 = arith.subf %18, %23 : vector<16x32xf32>
      %25 = vector.broadcast %22 : vector<16x1xf32> to vector<16x32xf32>
      %26 = arith.subf %18, %25 : vector<16x32xf32>
      %27 = arith.mulf %24, %26 : vector<16x32xf32>
      %cst_18 = arith.constant dense<0.000000e+00> : vector<16xf32>
      %28 = vector.multi_reduction <add>, %27, %cst_18 [1] : vector<16x32xf32> to vector<16xf32>
      %29 = vector.shape_cast %28 : vector<16xf32> to vector<16x1xf32>
      %cst_19 = arith.constant 3.200000e+01 : f32
      %30 = vector.broadcast %cst_19 : f32 to vector<16x1xf32>
      %31 = arith.divf %29, %30 : vector<16x1xf32>
      %32 = vector.broadcast %22 : vector<16x1xf32> to vector<16x32xf32>
      %33 = arith.subf %18, %32 : vector<16x32xf32>
      %cst_20 = arith.constant 9.99999974E-6 : f32
      %34 = vector.broadcast %cst_20 : f32 to vector<16x1xf32>
      %35 = arith.addf %31, %34 : vector<16x1xf32>
      %36 = math.rsqrt %35 : vector<16x1xf32>
      %37 = vector.broadcast %36 : vector<16x1xf32> to vector<16x32xf32>
      %38 = arith.mulf %33, %37 : vector<16x32xf32>
      %c0_21 = arith.constant 0 : index
      %c0_22 = arith.constant 0 : index
      %39 = vector.load %arg6[%c0_21, %c0_22] : memref<1x32xf32, #tpu.memory_space<vmem>>, vector<1x32xf32>
      %40 = vector.broadcast %39 : vector<1x32xf32> to vector<16x32xf32>
      %41 = arith.mulf %38, %40 : vector<16x32xf32>
      %c0_23 = arith.constant 0 : index
      %c0_24 = arith.constant 0 : index
      %42 = vector.load %arg7[%c0_23, %c0_24] : memref<1x32xf32, #tpu.memory_space<vmem>>, vector<1x32xf32>
      %43 = vector.broadcast %42 : vector<1x32xf32> to vector<16x32xf32>
      %44 = arith.addf %41, %43 : vector<16x32xf32>
      %45 = arith.truncf %44 : vector<16x32xf32> to vector<16x32xbf16>
      %c0_25 = arith.constant 0 : index
      %c0_26 = arith.constant 0 : index
      %46 = vector.load %arg8[%c0_25, %c0_26] : memref<16x32xbf16, #tpu.memory_space<vmem>>, vector<16x32xbf16>
      tpu.vector_store %arg8[%c0_25, %c0_26], %45 {strides = array<i32>} : memref<16x32xbf16, #tpu.memory_space<vmem>>, vector<16x32xbf16>,
    } else {
    }
    return
  }
  func.func @transform_0(%arg0: i32, %arg1: i32) -> (i32, i32) {
    %c0_i32 = arith.constant 0 : i32
    return %arg0, %arg1 : i32, i32
  }
  func.func @transform_1(%arg0: i32, %arg1: i32) -> (i32, i32) {
    %c0_i32 = arith.constant 0 : i32
    %c0_i32_0 = arith.constant 0 : i32
    return %arg1, %c0_i32 : i32, i32
  }
  func.func @transform_2(%arg0: i32, %arg1: i32) -> (i32, i32) {
    %c0_i32 = arith.constant 0 : i32
    %c0_i32_0 = arith.constant 0 : i32
    %c0_i32_1 = arith.constant 0 : i32
    return %c0_i32, %c0_i32_0 : i32, i32
  }
  func.func @transform_3(%arg0: i32, %arg1: i32) -> (i32, i32) {
    %c0_i32 = arith.constant 0 : i32
    %c0_i32_0 = arith.constant 0 : i32
    return %arg0, %c0_i32 : i32, i32
  }
  func.func @transform_4(%arg0: i32, %arg1: i32) -> (i32, i32) {
    %c0_i32 = arith.constant 0 : i32
    %c0_i32_0 = arith.constant 0 : i32
    %c0_i32_1 = arith.constant 0 : i32
    return %c0_i32, %c0_i32_0 : i32, i32
  }
  func.func @transform_5(%arg0: i32, %arg1: i32) -> (i32, i32) {
    %c0_i32 = arith.constant 0 : i32
    %c0_i32_0 = arith.constant 0 : i32
    %c0_i32_1 = arith.constant 0 : i32
    return %c0_i32, %c0_i32_0 : i32, i32
  }
  func.func @transform_6(%arg0: i32, %arg1: i32) -> (i32, i32) {
    %c0_i32 = arith.constant 0 : i32
    %c0_i32_0 = arith.constant 0 : i32
    return %arg0, %c0_i32 : i32, i32
  }
}

module attributes {stable_mosaic.version = 11 : i64} {
  func.func @_linear_kernel(%arg0: i32, %arg1: i32, %arg2: i32, %arg3: memref<16x32xbf16, #tpu.memory_space<vmem>>, %arg4: memref<32x128xbf16, #tpu.memory_space<vmem>>, %arg5: memref<1x128xf32, #tpu.memory_space<vmem>>, %arg6: memref<16x128xf32, #tpu.memory_space<vmem>>, %arg7: memref<16x128xf32, #tpu.memory_space<vmem>>) attributes {dimension_semantics = [#tpu.dimension_semantics<parallel>, #tpu.dimension_semantics<parallel>, #tpu.dimension_semantics<arbitrary>], iteration_bounds = array<i64: 1, 1, 1>, scalar_prefetch = 0 : i64, scratch_operands = 1 : i64, tpu.core_type = #tpu.core_type<tc>, window_params = [{transform_indices = @transform_0, window_bounds = array<i64: 16, 32>}, {transform_indices = @transform_1, window_bounds = array<i64: 32, 128>}, {transform_indices = @transform_2, window_bounds = array<i64: 1, 128>}, {transform_indices = @transform_3, window_bounds = array<i64: 16, 128>}]} {
    %c0_i32 = arith.constant 0 : i32
    %0 = arith.cmpi eq, %arg2, %c0_i32 : i32
    %1 = arith.extui %0 : i1 to i32
    %c0_i32_0 = arith.constant 0 : i32
    %2 = arith.cmpi ne, %1, %c0_i32_0 : i32
    scf.if %2 {
      %cst_10 = arith.constant 0.000000e+00 : f32
      %12 = vector.broadcast %cst_10 : f32 to vector<16x128xf32>
      %c0_11 = arith.constant 0 : index
      %c0_12 = arith.constant 0 : index
      %13 = vector.load %arg7[%c0_11, %c0_12] : memref<16x128xf32, #tpu.memory_space<vmem>>, vector<16x128xf32>
      tpu.vector_store %arg7[%c0_11, %c0_12], %12 {strides = array<i32>} : memref<16x128xf32, #tpu.memory_space<vmem>>, vector<16x128xf32>,
    } else {
    }
    %c0 = arith.constant 0 : index
    %c0_1 = arith.constant 0 : index
    %3 = vector.load %arg7[%c0, %c0_1] : memref<16x128xf32, #tpu.memory_space<vmem>>, vector<16x128xf32>
    %c0_2 = arith.constant 0 : index
    %c0_3 = arith.constant 0 : index
    %4 = vector.load %arg3[%c0_2, %c0_3] : memref<16x32xbf16, #tpu.memory_space<vmem>>, vector<16x32xbf16>
    %c0_4 = arith.constant 0 : index
    %c0_5 = arith.constant 0 : index
    %5 = vector.load %arg4[%c0_4, %c0_5] : memref<32x128xbf16, #tpu.memory_space<vmem>>, vector<32x128xbf16>
    %cst = arith.constant dense<0.000000e+00> : vector<16x128xf32>
    %6 = tpu.matmul %4, %5, %cst {dimension_numbers = #tpu.dot_dimension_numbers<[1], [0], [0], [1], [0, 0, 1, 1], [], []>} : vector<16x32xbf16>, vector<32x128xbf16>, vector<16x128xf32> -> vector<16x128xf32>
    %7 = arith.addf %3, %6 : vector<16x128xf32>
    %c0_6 = arith.constant 0 : index
    %c0_7 = arith.constant 0 : index
    %8 = vector.load %arg7[%c0_6, %c0_7] : memref<16x128xf32, #tpu.memory_space<vmem>>, vector<16x128xf32>
    tpu.vector_store %arg7[%c0_6, %c0_7], %7 {strides = array<i32>} : memref<16x128xf32, #tpu.memory_space<vmem>>, vector<16x128xf32>,
    %c0_i32_8 = arith.constant 0 : i32
    %9 = arith.cmpi eq, %arg2, %c0_i32_8 : i32
    %10 = arith.extui %9 : i1 to i32
    %c0_i32_9 = arith.constant 0 : i32
    %11 = arith.cmpi ne, %10, %c0_i32_9 : i32
    scf.if %11 {
      %c0_10 = arith.constant 0 : index
      %c0_11 = arith.constant 0 : index
      %12 = vector.load %arg7[%c0_10, %c0_11] : memref<16x128xf32, #tpu.memory_space<vmem>>, vector<16x128xf32>
      %c0_12 = arith.constant 0 : index
      %c0_13 = arith.constant 0 : index
      %13 = vector.load %arg5[%c0_12, %c0_13] : memref<1x128xf32, #tpu.memory_space<vmem>>, vector<1x128xf32>
      %14 = vector.broadcast %13 : vector<1x128xf32> to vector<16x128xf32>
      %15 = arith.addf %12, %14 : vector<16x128xf32>
      %c0_14 = arith.constant 0 : index
      %c0_15 = arith.constant 0 : index
      %16 = vector.load %arg6[%c0_14, %c0_15] : memref<16x128xf32, #tpu.memory_space<vmem>>, vector<16x128xf32>
      tpu.vector_store %arg6[%c0_14, %c0_15], %15 {strides = array<i32>} : memref<16x128xf32, #tpu.memory_space<vmem>>, vector<16x128xf32>,
    } else {
    }
    return
  }
  func.func @transform_0(%arg0: i32, %arg1: i32, %arg2: i32) -> (i32, i32) {
    %c0_i32 = arith.constant 0 : i32
    return %arg0, %arg2 : i32, i32
  }
  func.func @transform_1(%arg0: i32, %arg1: i32, %arg2: i32) -> (i32, i32) {
    %c0_i32 = arith.constant 0 : i32
    return %arg2, %arg1 : i32, i32
  }
  func.func @transform_2(%arg0: i32, %arg1: i32, %arg2: i32) -> (i32, i32) {
    %c0_i32 = arith.constant 0 : i32
    %c0_i32_0 = arith.constant 0 : i32
    return %c0_i32, %arg1 : i32, i32
  }
  func.func @transform_3(%arg0: i32, %arg1: i32, %arg2: i32) -> (i32, i32) {
    %c0_i32 = arith.constant 0 : i32
    return %arg0, %arg1 : i32, i32
  }
}

</mosaic_0001>

<bundles_post_ra>
// kernel: transformer2d_forward.31
= control target key start
LH: loop header
LB: loop body
LE: loop exit
PB: predicated region body
PF: predicated region fallthrough
CT: control target
= control target key end

     0   :  { %vm19_vm0 = vcmask 785408   ;;  %v147_v1 = vmov 0.0   ;;  %vm58_vm1 = vcmask 261120   ;;  %vm112_vm2 = vcmask 781312   ;;  %s203_s1 = inlined_call_operand.vmem [shape: bf16[32,96], index: 1, kind: input, shape index: {}]   ;;  %s204_s2 = inlined_call_operand.vmem [shape: f32[1,96], index: 2, kind: input, shape index: {}]   ;;  %s205_s0 = inlined_call_operand.vmem [shape: bf16[32,32], index: 0, kind: input, shape index: {}]   ;;  %s206_s3 = inlined_call_operand.vmem [shape: bf16[32,96], index: 3, kind: output, shape index: {}]  }
   0x1   :  { %v142_v0 = vld [vmem:[%s203_s1 + $0x8] sm:$0xff]  ;;  %20 = vst.msk [vmem:[#allocation2] sm:$0xff] %vm19_vm0, %v147_v1  ;;  %v141_v2 = vld [vmem:[%s203_s1] sm:$0xff] }
   0x2   :  { %21 = vst.msk [vmem:[#allocation2 + $0x8] sm:$0xff] %vm19_vm0, %v147_v1  ;;  %71 = vmatpush.bf16.msra.mxu0 %v142_v0  ;;  %143 = vmatpush.bf16.msra.mxu1 %v142_v0  ;;  %v139_v3 = vld [vmem:[%s205_s0] sm:$0xff]  ;;  %v140_v4 = vld [vmem:[%s205_s0 + $0x8] sm:$0xff] }
   0x3   :  { %22 = vst.msk [vmem:[#allocation2 + $0x10] sm:$0xff] %vm19_vm0, %v147_v1  ;;  %v146_v13 = vld [vmem:[%s204_s2] ss:$0 sm:$0xff] }
   0x4   :  { %23 = vst.msk [vmem:[#allocation2 + $0x18] sm:$0xff] %vm19_vm0, %v147_v1 }
   0x6   :  { %72 = vmatpush.bf16.msra.mxu0 %v141_v2  ;;  %144 = vmatpush.bf16.msra.mxu1 %v141_v2 }
   0x8   :  { %v24_v5 = vld [vmem:[#allocation2] sm:$0xff] }
   0x9   :  { %137 = vmatmul.msk.bf16.vlgmr.msra.gmra.mxu0 %vm58_vm1, %v139_v3  ;;  %138 = vmatmul.msk.bf16.vlgmr.msra.gmra.mxu1 %vm58_vm1, %v140_v4  ;;  %v25_v11 = vld [vmem:[#allocation2 + $0x8] sm:$0xff] }
   0xa   :  { %v26_v6 = vld [vmem:[#allocation2 + $0x10] sm:$0xff] }
   0xb   :  { %v27_v12 = vld [vmem:[#allocation2 + $0x18] sm:$0xff] }
  0x86   :  { %v74_v7 = vpop.f32.mrf.mxu0  ;;  %v79_v8 = vpop.f32.mrf.mxu1 }
  0x87   :  { %v84_v9 = vadd.f32 %v74_v7, %v24_v5  ;;  %v86_v10 = vadd.f32 %v79_v8, %v26_v6 }
  0x89   :  { %89 = vst.msk [vmem:[#allocation2] sm:$0xff] %vm19_vm0, %v84_v9 }
  0x8a   :  { %91 = vst.msk [vmem:[#allocation2 + $0x10] sm:$0xff] %vm19_vm0, %v86_v10 }
  0x8e   :  { %v76_v14 = vpop.f32.mrf.mxu0  ;;  %v81_v15 = vpop.f32.mrf.mxu1 }
  0x8f   :  { %v85_v16 = vadd.f32 %v76_v14, %v25_v11  ;;  %v87_v17 = vadd.f32 %v81_v15, %v27_v12 }
  0x90   :  { %v96_v18 = vld [vmem:[#allocation2] sm:$0xff] }
  0x91   :  { %v104_v19 = vadd.f32 %v146_v13, %v96_v18  ;;  %v98_v20 = vld [vmem:[#allocation2 + $0x10] sm:$0xff]  ;;  %90 = vst.msk [vmem:[#allocation2 + $0x8] sm:$0xff] %vm19_vm0, %v85_v16 }
  0x92   :  { %v106_v21 = vadd.f32 %v146_v13, %v98_v20  ;;  %92 = vst.msk [vmem:[#allocation2 + $0x18] sm:$0xff] %vm19_vm0, %v87_v17 }
  0x93   :  { %v108_v22 = vpack.c.bf16 %v104_v19, %v104_v19 }
  0x94   :  { %v110_v23 = vpack.c.bf16 %v106_v21, %v106_v21 }
  0x95   :  { %113 = vst.msk [vmem:[%s206_s3] sm:$0xf] %vm112_vm2, %v108_v22 }
  0x96   :  { %115 = vst.msk [vmem:[%s206_s3 + $0x8] sm:$0xf] %vm112_vm2, %v110_v23 }
  0x98   :  { %v97_v24 = vld [vmem:[#allocation2 + $0x8] sm:$0xff] }
  0x99   :  { %v105_v25 = vadd.f32 %v146_v13, %v97_v24  ;;  %v99_v26 = vld [vmem:[#allocation2 + $0x18] sm:$0xff] }
  0x9a   :  { %v107_v27 = vadd.f32 %v146_v13, %v99_v26 }
  0x9b   :  { %v109_v28 = vpack.c.bf16 %v105_v25, %v105_v25 }
  0x9c   :  { %v111_v29 = vpack.c.bf16 %v107_v27, %v107_v27 }
  0x9d   :  { %114 = vst.msk [vmem:[%s206_s3 + $0x4] sm:$0xf] %vm112_vm2, %v109_v28 }
  0x9e   :  { %116 = vst.msk [vmem:[%s206_s3 + $0xc] sm:$0xf] %vm112_vm2, %v111_v29 }

// kernel: transformer2d_forward.30
= control target key start
LH: loop header
LB: loop body
LE: loop exit
PB: predicated region body
PF: predicated region fallthrough
CT: control target
= control target key end

     0   :  { %vm22_vm0 = vcmask 261120   ;;  %v152_v1 = vmov 0.0   ;;  %vm53_vm1 = vcmask 130048   ;;  %vm123_vm2 = vcmask 257024   ;;  %s226_s1 = inlined_call_operand.vmem [shape: bf16[16,32], index: 1, kind: input, shape index: {}]   ;;  %s227_s0 = inlined_call_operand.vmem [shape: bf16[32,16], index: 0, kind: input, shape index: {}]   ;;  %s228_s2 = inlined_call_operand.vmem [shape: f32[1,32], index: 2, kind: input, shape index: {}]   ;;  %s229_s3 = inlined_call_operand.vmem [shape: f32[32,32], index: 3, kind: input, shape index: {}]   ;;  %s230_s4 = inlined_call_operand.vmem [shape: bf16[32,32], index: 4, kind: output, shape index: {}]  }
   0x1   :  { %v148_v0 = vld [vmem:[%s226_s1] sm:$0xff]  ;;  %23 = vst.msk [vmem:[#allocation2] sm:$0xff] %vm22_vm0, %v152_v1  ;;  %v147_v3 = vld [vmem:[%s227_s0 + $0x8] sm:$0xff]  ;;  %v113_v25 = vld [vmem:[%s229_s3 + $0x10] sm:$0xff] }
   0x2   :  { %v146_v2 = vld [vmem:[%s227_s0] sm:$0xff]  ;;  %24 = vst.msk [vmem:[#allocation2 + $0x8] sm:$0xff] %vm22_vm0, %v152_v1  ;;  %67 = vmatpush.bf16.msra.mxu0 %v148_v0  ;;  %149 = vmatpush.bf16.msra.mxu1 %v148_v0  ;;  %v112_v36 = vld [vmem:[%s229_s3 + $0x8] sm:$0xff]  ;;  %v114_v39 = vld [vmem:[%s229_s3 + $0x18] sm:$0xff] }
   0x3   :  { %25 = vst.msk [vmem:[#allocation2 + $0x10] sm:$0xff] %vm22_vm0, %v152_v1  ;;  %v151_v12 = vld [vmem:[%s228_s2] ss:$0 sm:$0xff] }
   0x4   :  { %26 = vst.msk [vmem:[#allocation2 + $0x18] sm:$0xff] %vm22_vm0, %v152_v1  ;;  %v111_v22 = vld [vmem:[%s229_s3] sm:$0xff] }
   0x5   :  { %144 = vmatmul.msk.bf16.vlgmr.msra.gmra.mxu0 %vm53_vm1, %v146_v2  ;;  %145 = vmatmul.msk.bf16.vlgmr.msra.gmra.mxu1 %vm53_vm1, %v147_v3 }
   0x8   :  { %v27_v4 = vld [vmem:[#allocation2] sm:$0xff] }
   0x9   :  { %v28_v10 = vld [vmem:[#allocation2 + $0x8] sm:$0xff] }
   0xa   :  { %v29_v5 = vld [vmem:[#allocation2 + $0x10] sm:$0xff] }
   0xb   :  { %v30_v11 = vld [vmem:[#allocation2 + $0x18] sm:$0xff] }
  0x82   :  { %v69_v6 = vpop.f32.mrf.mxu0  ;;  %v74_v7 = vpop.f32.mrf.mxu1 }
  0x83   :  { %v79_v8 = vadd.f32 %v69_v6, %v27_v4  ;;  %v81_v9 = vadd.f32 %v74_v7, %v29_v5 }
  0x85   :  { %84 = vst.msk [vmem:[#allocation2] sm:$0xff] %vm22_vm0, %v79_v8 }
  0x86   :  { %86 = vst.msk [vmem:[#allocation2 + $0x10] sm:$0xff] %vm22_vm0, %v81_v9 }
  0x8a   :  { %v71_v13 = vpop.f32.mrf.mxu0  ;;  %v76_v14 = vpop.f32.mrf.mxu1 }
  0x8b   :  { %v80_v15 = vadd.f32 %v71_v13, %v28_v10  ;;  %v82_v16 = vadd.f32 %v76_v14, %v30_v11 }
  0x8c   :  { %v91_v17 = vld [vmem:[#allocation2] sm:$0xff] }
  0x8d   :  { %v99_v18 = vadd.f32 %v151_v12, %v91_v17  ;;  %v93_v19 = vld [vmem:[#allocation2 + $0x10] sm:$0xff]  ;;  %85 = vst.msk [vmem:[#allocation2 + $0x8] sm:$0xff] %vm22_vm0, %v80_v15 }
  0x8e   :  { %v101_v20 = vadd.f32 %v151_v12, %v93_v19  ;;  %87 = vst.msk [vmem:[#allocation2 + $0x18] sm:$0xff] %vm22_vm0, %v82_v16 }
  0x8f   :  { %v103_v21 = vmax.f32 %v99_v18, 0.0 }
  0x90   :  { %v105_v23 = vmax.f32 %v101_v20, 0.0 }
  0x91   :  { %v107_v24 = vmul.f32 0.1, %v103_v21 }
  0x92   :  { %v109_v26 = vmul.f32 0.1, %v105_v23 }
  0x93   :  { %v115_v27 = vadd.f32 %v111_v22, %v107_v24 }
  0x94   :  { %v117_v28 = vadd.f32 %v113_v25, %v109_v26  ;;  %v92_v29 = vld [vmem:[#allocation2 + $0x8] sm:$0xff] }
  0x95   :  { %v119_v30 = vpack.c.bf16 %v115_v27, %v115_v27  ;;  %v100_v31 = vadd.f32 %v151_v12, %v92_v29  ;;  %v94_v32 = vld [vmem:[#allocation2 + $0x18] sm:$0xff] }
  0x96   :  { %v121_v33 = vpack.c.bf16 %v117_v28, %v117_v28  ;;  %v102_v34 = vadd.f32 %v151_v12, %v94_v32 }
  0x97   :  { %124 = vst.msk [vmem:[%s230_s4] sm:$0xf] %vm123_vm2, %v119_v30  ;;  %v104_v35 = vmax.f32 %v100_v31, 0.0 }
  0x98   :  { %126 = vst.msk [vmem:[%s230_s4 + $0x8] sm:$0xf] %vm123_vm2, %v121_v33  ;;  %v106_v37 = vmax.f32 %v102_v34, 0.0 }
  0x99   :  { %v108_v38 = vmul.f32 0.1, %v104_v35 }
  0x9a   :  { %v110_v40 = vmul.f32 0.1, %v106_v37 }
  0x9b   :  { %v116_v41 = vadd.f32 %v112_v36, %v108_v38 }
  0x9c   :  { %v118_v42 = vadd.f32 %v114_v39, %v110_v40 }
  0x9d   :  { %v120_v43 = vpack.c.bf16 %v116_v41, %v116_v41 }
  0x9e   :  { %v122_v44 = vpack.c.bf16 %v118_v42, %v118_v42 }
  0x9f   :  { %125 = vst.msk [vmem:[%s230_s4 + $0x4] sm:$0xf] %vm123_vm2, %v120_v43 }
  0xa0   :  { %127 = vst.msk [vmem:[%s230_s4 + $0xc] sm:$0xf] %vm123_vm2, %v122_v44 }

// kernel: transformer2d_forward.33
= control target key start
LH: loop header
LB: loop body
LE: loop exit
PB: predicated region body
PF: predicated region fallthrough
CT: control target
= control target key end

     0   :  { %vm28_vm0 = vcmask 261120   ;;  %v300_v1 = vmov 0.0   ;;  %v301_v40 = vmov 32.0   ;;  %vm243_vm10 = vcmask 257024   ;;  %s413_s1 = inlined_call_operand.vmem [shape: bf16[32,32], index: 1, kind: input, shape index: {}]   ;;  %s414_s0 = inlined_call_operand.vmem [shape: bf16[32,32], index: 0, kind: input, shape index: {}]   ;;  %s415_s2 = inlined_call_operand.vmem [shape: f32[1,32], index: 2, kind: input, shape index: {}]   ;;  %s416_s3 = inlined_call_operand.vmem [shape: bf16[32,32], index: 3, kind: input, shape index: {}]   ;;  %s417_s4 = inlined_call_operand.vmem [shape: f32[1,32], index: 4, kind: input, shape index: {}]   ;;  %s418_s5 = inlined_call_operand.vmem [shape: f32[1,32], index: 5, kind: input, shape index: {}]   ;;  %s419_s6 = inlined_call_operand.vmem [shape: bf16[32,32], index: 6, kind: output, shape index: {}]  }
   0x1   :  { %v273_v0 = vld [vmem:[%s413_s1 + $0x8] sm:$0xff]  ;;  %29 = vst.msk [vmem:[#allocation2] sm:$0xff] %vm28_vm0, %v300_v1  ;;  %v272_v2 = vld [vmem:[%s413_s1] sm:$0xff]  ;;  %290 = vrcp.f32 %v301_v40 }
   0x2   :  { %30 = vst.msk [vmem:[#allocation2 + $0x8] sm:$0xff] %vm28_vm0, %v300_v1  ;;  %80 = vmatpush.bf16.msra.mxu0 %v273_v0  ;;  %283 = vmatpush.bf16.msra.mxu1 %v273_v0  ;;  %v270_v3 = vld [vmem:[%s414_s0] sm:$0xff]  ;;  %v271_v4 = vld [vmem:[%s414_s0 + $0x8] sm:$0xff] }
   0x3   :  { %31 = vst.msk [vmem:[#allocation2 + $0x10] sm:$0xff] %vm28_vm0, %v300_v1  ;;  %v275_v13 = vld [vmem:[%s416_s3] sm:$0xff]   ;;  %v282_v15 = vld [vmem:[%s416_s3 + $0x8] sm:$0xff]  }
   0x4   :  { %32 = vst.msk [vmem:[#allocation2 + $0x18] sm:$0xff] %vm28_vm0, %v300_v1  ;;  %v287_v14 = vld [vmem:[%s415_s2] ss:$0 sm:$0xff]  ;;  %v276_v20 = vunpack.c.l.bf16 %v275_v13  ;;  %v280_v21 = vunpack.c.l.bf16 %v282_v15  ;;  %v277_v30 = vunpack.c.h.bf16 %v275_v13  ;;  %v281_v31 = vunpack.c.h.bf16 %v282_v15 }
   0x6   :  { %81 = vmatpush.bf16.msra.mxu0 %v272_v2  ;;  %284 = vmatpush.bf16.msra.mxu1 %v272_v2 }
   0x7   :  { %v291_v41 = vpop.eup %290 }
   0x8   :  { %v33_v5 = vld [vmem:[#allocation2] sm:$0xff]  ;;  %v141_v42 = vmul.f32 32.0, %v291_v41  ;;  %vm145_vm1 = vweird.f32 %v291_v41 }
   0x9   :  { %268 = vmatmul.msk.bf16.vlgmr.msra.gmra.mxu0 %vm28_vm0, %v270_v3  ;;  %269 = vmatmul.msk.bf16.vlgmr.msra.gmra.mxu1 %vm28_vm0, %v271_v4  ;;  %v34_v11 = vld [vmem:[#allocation2 + $0x8] sm:$0xff] }
   0xa   :  { %v35_v6 = vld [vmem:[#allocation2 + $0x10] sm:$0xff]  ;;  %v142_v43 = vsub.f32 1.0, %v141_v42 }
   0xb   :  { %v36_v12 = vld [vmem:[#allocation2 + $0x18] sm:$0xff] }
   0xc   :  { %v143_v44 = vmul.f32 %v291_v41, %v142_v43 }
   0xe   :  { %v144_v45 = vadd.f32 %v291_v41, %v143_v44 }
  0x10   :  { %v146_v46 = vsel %vm145_vm1, %v291_v41, %v144_v45 }
  0x86   :  { %v83_v7 = vpop.f32.mrf.mxu0  ;;  %v88_v8 = vpop.f32.mrf.mxu1 }
  0x87   :  { %v93_v9 = vadd.f32 %v83_v7, %v33_v5  ;;  %v95_v10 = vadd.f32 %v88_v8, %v35_v6 }
  0x89   :  { %97 = vst.msk [vmem:[#allocation2] sm:$0xff] %vm28_vm0, %v93_v9 }
  0x8a   :  { %99 = vst.msk [vmem:[#allocation2 + $0x10] sm:$0xff] %vm28_vm0, %v95_v10 }
  0x8e   :  { %v85_v16 = vpop.f32.mrf.mxu0  ;;  %v90_v17 = vpop.f32.mrf.mxu1 }
  0x8f   :  { %v94_v18 = vadd.f32 %v85_v16, %v34_v11  ;;  %v96_v19 = vadd.f32 %v90_v17, %v36_v12 }
  0x90   :  { %v104_v22 = vld [vmem:[#allocation2] sm:$0xff] }
  0x91   :  { %98 = vst.msk [vmem:[#allocation2 + $0x8] sm:$0xff] %vm28_vm0, %v94_v18  ;;  %v106_v23 = vld [vmem:[#allocation2 + $0x10] sm:$0xff]  ;;  %v112_v24 = vadd.f32 %v287_v14, %v104_v22 }
  0x92   :  { %100 = vst.msk [vmem:[#allocation2 + $0x18] sm:$0xff] %vm28_vm0, %v96_v19  ;;  %v114_v25 = vadd.f32 %v287_v14, %v106_v23 }
  0x93   :  { %v124_v26 = vadd.f32 %v276_v20, %v112_v24 }
  0x94   :  { %v126_v27 = vadd.f32 %v280_v21, %v114_v25 }
  0x95   :  { %v128_v28 = vsel %vm28_vm0, %v124_v26, 0.0 }
  0x96   :  { %v134_v29 = vsel %vm28_vm0, %v126_v27, 0.0  ;;  %129 = vadd.xlane.f32.xlu0 %v128_v28 }
  0x97   :  { %135 = vadd.xlane.f32.xlu1 %v134_v29  ;;  %v288_v29 = vld [vmem:[%s417_s4] ss:$0 sm:$0xff] }
  0x98   :  { %v105_v32 = vld [vmem:[#allocation2 + $0x8] sm:$0xff] }
  0x99   :  { %v107_v33 = vld [vmem:[#allocation2 + $0x18] sm:$0xff]  ;;  %v113_v34 = vadd.f32 %v287_v14, %v105_v32 }
  0x9a   :  { %v115_v35 = vadd.f32 %v287_v14, %v107_v33 }
  0x9b   :  { %v125_v36 = vadd.f32 %v277_v30, %v113_v34  ;;  %v289_v34 = vld [vmem:[%s418_s5] ss:$0 sm:$0xff] }
  0x9c   :  { %v127_v37 = vadd.f32 %v281_v31, %v115_v35 }
  0x9d   :  { %v131_v38 = vsel %vm28_vm0, %v125_v36, 0.0 }
  0x9e   :  { %v137_v39 = vsel %vm28_vm0, %v127_v37, 0.0  ;;  %132 = vadd.xlane.f32.xlu0 %v131_v38 }
  0x9f   :  { %138 = vadd.xlane.f32.xlu1 %v137_v39 }
 0x109   :  { %v130_v47 = vpop.xlane.xlu0 %129 }
 0x10a   :  { %v136_v48 = vpop.xlane.xlu1 %135  ;;  %v147_v49 = vmul.f32 %v146_v46, %v130_v47 }
 0x10b   :  { %v149_v50 = vmul.f32 %v146_v46, %v136_v48 }
 0x10c   :  { %v151_v51 = vsub.f32 %v124_v26, %v147_v49 }
 0x10d   :  { %v372_v52 = vsub.f32 %v126_v27, %v149_v50 }
 0x10e   :  { %v155_v53 = vmul.f32 %v151_v51, %v151_v51 }
 0x10f   :  { %v157_v54 = vmul.f32 %v372_v52, %v372_v52 }
 0x110   :  { %v159_v55 = vsel %vm28_vm0, %v155_v53, 0.0 }
 0x111   :  { %160 = vadd.xlane.f32.xlu2 %v159_v55  ;;  %v165_v56 = vsel %vm28_vm0, %v157_v54, 0.0  ;;  %v133_v57 = vpop.xlane.xlu0 %132 }
 0x112   :  { %v139_v58 = vpop.xlane.xlu1 %138  ;;  %166 = vadd.xlane.f32.xlu0 %v165_v56  ;;  %v148_v59 = vmul.f32 %v146_v46, %v133_v57 }
 0x113   :  { %v150_v60 = vmul.f32 %v146_v46, %v139_v58 }
 0x114   :  { %v378_v61 = vsub.f32 %v125_v36, %v148_v59 }
 0x115   :  { %v380_v62 = vsub.f32 %v127_v37, %v150_v60 }
 0x116   :  { %v156_v63 = vmul.f32 %v378_v61, %v378_v61 }
 0x117   :  { %v158_v0 = vmul.f32 %v380_v62, %v380_v62 }
 0x118   :  { %v162_v1 = vsel %vm28_vm0, %v156_v63, 0.0 }
 0x119   :  { %v168_v2 = vsel %vm28_vm0, %v158_v0, 0.0  ;;  %163 = vadd.xlane.f32.xlu2 %v162_v1 }
 0x11a   :  { %169 = vadd.xlane.f32.xlu1 %v168_v2 }
 0x184   :  { %v161_v3 = vpop.xlane.xlu2 %160 }
 0x185   :  { %v171_v4 = vmul.f32 %v161_v3, %v146_v46  ;;  %v167_v5 = vpop.xlane.xlu0 %166 }
 0x186   :  { %v173_v6 = vmul.f32 %v167_v5, %v146_v46 }
 0x187   :  { %v175_v7 = vadd.f32 1e-05, %v171_v4 }
 0x188   :  { %v177_v8 = vadd.f32 1e-05, %v173_v6 }
 0x189   :  { %292 = vrsqrt.f32 %v175_v7  ;;  %vm185_vm4 = vweird.f32 %v175_v7 }
 0x18a   :  { %294 = vrsqrt.f32 %v177_v8  ;;  %vm205_vm6 = vweird.f32 %v177_v8 }
 0x18c   :  { %v164_v9 = vpop.xlane.xlu2 %163 }
 0x18d   :  { %v170_v10 = vpop.xlane.xlu1 %169  ;;  %v172_v11 = vmul.f32 %v164_v9, %v146_v46 }
 0x18e   :  { %v174_v12 = vmul.f32 %v170_v10, %v146_v46 }
 0x18f   :  { %v293_v13 = vpop.eup %292  ;;  %v176_v14 = vadd.f32 1e-05, %v172_v11 }
 0x190   :  { %v295_v15 = vpop.eup %294  ;;  %v180_v16 = vmul.f32 %v293_v13, %v175_v7  ;;  %v178_v17 = vadd.f32 1e-05, %v174_v12  ;;  %vm186_vm2 = vweird.f32 %v293_v13 }
 0x191   :  { %v200_v18 = vmul.f32 %v295_v15, %v177_v8  ;;  %296 = vrsqrt.f32 %v176_v14  ;;  %vm206_vm3 = vweird.f32 %v295_v15  ;;  %vm187_vm5 = vmor %vm185_vm4, %vm186_vm2  ;;  %vm195_vm11 = vweird.f32 %v176_v14 }
 0x192   :  { %v181_v19 = vmul.f32 %v293_v13, %v180_v16  ;;  %298 = vrsqrt.f32 %v178_v17  ;;  %vm207_vm7 = vmor %vm205_vm6, %vm206_vm3  ;;  %vm215_vm12 = vweird.f32 %v178_v17 }
 0x193   :  { %v201_v20 = vmul.f32 %v295_v15, %v200_v18 }
 0x194   :  { %v182_v21 = vmul.f32 0.5, %v181_v19 }
 0x195   :  { %v202_v22 = vmul.f32 0.5, %v201_v20 }
 0x196   :  { %v183_v23 = vsub.f32 1.5, %v182_v21 }
 0x197   :  { %v297_v24 = vpop.eup %296  ;;  %v203_v25 = vsub.f32 1.5, %v202_v22 }
 0x198   :  { %v299_v26 = vpop.eup %298  ;;  %v184_v27 = vmul.f32 %v293_v13, %v183_v23  ;;  %v190_v28 = vmul.f32 %v297_v24, %v176_v14  ;;  %vm196_vm8 = vweird.f32 %v297_v24 }
 0x199   :  { %v204_v30 = vmul.f32 %v295_v15, %v203_v25  ;;  %v210_v31 = vmul.f32 %v299_v26, %v178_v17  ;;  %vm216_vm9 = vweird.f32 %v299_v26  ;;  %vm197_vm13 = vmor %vm195_vm11, %vm196_vm8 }
 0x19a   :  { %v188_v32 = vsel %vm187_vm5, %v293_v13, %v184_v27  ;;  %v191_v33 = vmul.f32 %v297_v24, %v190_v28  ;;  %vm217_vm14 = vmor %vm215_vm12, %vm216_vm9 }
 0x19b   :  { %v219_v35 = vmul.f32 %v188_v32, %v151_v51  ;;  %v208_v36 = vsel %vm207_vm7, %v295_v15, %v204_v30  ;;  %v211_v37 = vmul.f32 %v299_v26, %v210_v31 }
 0x19c   :  { %v221_v38 = vmul.f32 %v208_v36, %v372_v52  ;;  %v192_v39 = vmul.f32 0.5, %v191_v33 }
 0x19d   :  { %v227_v40 = vmul.f32 %v288_v29, %v219_v35  ;;  %v212_v41 = vmul.f32 0.5, %v211_v37 }
 0x19e   :  { %v229_v42 = vmul.f32 %v288_v29, %v221_v38  ;;  %v193_v43 = vsub.f32 1.5, %v192_v39 }
 0x19f   :  { %v235_v44 = vadd.f32 %v289_v34, %v227_v40  ;;  %v213_v45 = vsub.f32 1.5, %v212_v41 }
 0x1a0   :  { %v237_v46 = vadd.f32 %v289_v34, %v229_v42  ;;  %v194_v47 = vmul.f32 %v297_v24, %v193_v43 }
 0x1a1   :  { %v239_v48 = vpack.c.bf16 %v235_v44, %v235_v44  ;;  %v214_v49 = vmul.f32 %v299_v26, %v213_v45 }
 0x1a2   :  { %v241_v50 = vpack.c.bf16 %v237_v46, %v237_v46  ;;  %v198_v51 = vsel %vm197_vm13, %v297_v24, %v194_v47 }
 0x1a3   :  { %244 = vst.msk [vmem:[%s419_s6] sm:$0xf] %vm243_vm10, %v239_v48  ;;  %v218_v52 = vsel %vm217_vm14, %v299_v26, %v214_v49  ;;  %v220_v53 = vmul.f32 %v198_v51, %v378_v61 }
 0x1a4   :  { %246 = vst.msk [vmem:[%s419_s6 + $0x8] sm:$0xf] %vm243_vm10, %v241_v50  ;;  %v222_v54 = vmul.f32 %v218_v52, %v380_v62 }
 0x1a5   :  { %v228_v55 = vmul.f32 %v288_v29, %v220_v53 }
 0x1a6   :  { %v230_v56 = vmul.f32 %v288_v29, %v222_v54 }
 0x1a7   :  { %v236_v57 = vadd.f32 %v289_v34, %v228_v55 }
 0x1a8   :  { %v238_v58 = vadd.f32 %v289_v34, %v230_v56 }
 0x1a9   :  { %v240_v59 = vpack.c.bf16 %v236_v57, %v236_v57 }
 0x1aa   :  { %v242_v60 = vpack.c.bf16 %v238_v58, %v238_v58 }
 0x1ab   :  { %245 = vst.msk [vmem:[%s419_s6 + $0x4] sm:$0xf] %vm243_vm10, %v240_v59 }
 0x1ac   :  { %247 = vst.msk [vmem:[%s419_s6 + $0xc] sm:$0xf] %vm243_vm10, %v242_v60 }

// kernel: transformer2d_forward.32
= control target key start
LH: loop header
LB: loop body
LE: loop exit
PB: predicated region body
PF: predicated region fallthrough
CT: control target
= control target key end

     0   :  { %s777_s6 = smov 0   ;;  %s860_s0 = inlined_call_operand.vmem [shape: bf16[2,16,96], index: 0, kind: input, shape index: {}]   ;;  %s861_s1 = inlined_call_operand.vmem [shape: bf16[2,16,32], index: 1, kind: output, shape index: {}]  }
   0x1 LB: > { %s600_s7 = sadd.s32 4294967295, %s751_s6   ;;  %p604_p0 = scmp.ge.s32.totalorder %s751_s6, 1  ;;  %s751_s6 = sphi %s777_s6, %s11_s6  }
   0x2   : > { %p87_p1 = scmp.lt.s32.totalorder %s751_s6, 3 }
   0x4   : > { %p88_p2 = pnand %p604_p0, %p87_p1 }
   0x5   : > { %p107_p3 = scmp.lt.s32.totalorder (!%p88_p2), %s600_s7, 1  ;;  %s753_s12 = smov (!%p88_p2), 96  }
   0x6   : > { %91 = sbr.rel (%p88_p2) target bundleno = 1199 (0x4af), region = 24  ;;  %s754_s13 = smov (!%p88_p2), 120  }
   0x7   : > { %s755_s14 = smov (!%p88_p2), 88   ;;  %s756_s15 = smov (!%p88_p2), 64  }
   0x8   : > { %s757_s16 = smov (!%p88_p2), 80   ;;  %s758_s17 = smov (!%p88_p2), 112  }
   0x9   : > { %s759_s18 = smov (!%p88_p2), 104   ;;  %s760_s19 = smov (!%p88_p2), 72  }
   0xa   : > { %s761_s20 = smov (!%p88_p2), 56   ;;  %s762_s21 = smov (!%p88_p2), 40  }
   0xb   : > { %s863_s7 = smov (!%p107_p3, %s600_s7), 1  ;;  %vm129_vm0 = vcmask 64512   ;;  %vm163_vm1 = vcmask 130048   ;;  %s763_s22 = smov 48   ;;  %vm537_vm2 = vcmask 195584   ;;  %vm542_vm3 = vcmask 257024  }
   0xc   : > { %s635_s8 = sshll.u32 %s863_s7, 3  ;;  %s764_s23 = smov 8  }
   0xd   : > { %s111_s11 = scalar_lea.vmem %s860_s0, %s635_s8  ;;  %s765_s24 = smov 24  }
   0xe   : > { %v638_v0 = vld [vmem:[%s111_s11] sm:$0xff]   ;;  %s766_s25 = smov 16   ;;  %s116_s28 = scalar_lea.vmem %s861_s1, %s635_s8 }
   0xf   : > { %v640_v1 = vunpack.c.h.bf16 %v638_v0  ;;  %v639_v2 = vunpack.c.l.bf16 %v638_v0 }
  0x11   : > { %127 = vrot.lane.b32.xlu0 %v640_v1, %s753_s12  ;;  %v121_v3 = vmul.f32 0.35355338, %v639_v2  ;;  %v793_v4 = vpack.i.bf16 %v639_v2, %v640_v1  ;;  %v122_v7 = vmul.f32 0.35355338, %v640_v1 }
  0x13   : > { %664 = vrot.lane.b32.xlu2 %v793_v4, %s755_s14 }
  0x19   : > { %125 = vrot.lane.b32.xlu0 %v639_v2, %s753_s12 }
  0x21   : > { %221 = vrot.lane.b32.xlu0 %v121_v3, %s754_s13 }
  0x6d   : > { %v665_v12 = vpop.permute.xlu2 %664 }
  0x6e   : > { %v666_v13 = vunpack.i.l.bf16 %v665_v12  ;;  %v667_v14 = vunpack.i.h.bf16 %v665_v12 }
  0x70   : > { %615 = vmatpush.xpose.msk.msra.mxu2 %vm129_vm0, %v666_v13 }
  0x74   : > { %616 = vmatpush.xpose.msk.msra.mxu2 %vm129_vm0, %v667_v14 }
  0x83   : > { %v128_v5 = vpop.permute.xlu0 %127 }
  0x84   : > { %609 = vmatpush.xpose.msk.msra.mxu0 %vm129_vm0, %v128_v5 }
  0x8b   : > { %v126_v6 = vpop.permute.xlu0 %125 }
  0x8c   : > { %610 = vmatpush.xpose.msk.msra.mxu0 %vm129_vm0, %v126_v6 }
  0x8f   : > { %611 = vmatmul.msk.f32.vlgmr.msra.gmra.mxu0 %vm129_vm0, %v121_v3 }
  0x93   : > { %v222_v15 = vpop.permute.xlu0 %221 }
  0x94   : > { %617 = vmatmul.msk.f32.vlgmr.msra.gmra.mxu2 %vm129_vm0, %v222_v15 }
  0x97   : > { %612 = vmatmul.msk.f32.gmra.mxu0 %vm129_vm0, %v122_v7 }
 0x10c   : > { %v157_v8 = vpop.f32.mrf.mxu0 }
 0x10d   : > { %v164_v9 = vsel %vm163_vm1, %v157_v8, -inf }
 0x10e   : > { %165 = vmax.xlane.f32.xlu1 %v164_v9 }
 0x114   : > { %v160_v10 = vpop.f32.mrf.mxu0 }
 0x115   : > { %v167_v11 = vsel %vm163_vm1, %v160_v10, -inf }
 0x116   : > { %168 = vmax.xlane.f32.xlu1 %v167_v11 }
 0x117   : > { %v254_v28 = vpop.f32.mrf.mxu2 }
 0x118   : > { %v260_v29 = vsel %vm163_vm1, %v254_v28, -inf }
 0x12f   : > { %669 = vrot.lane.b32.xlu1 %v793_v4, %s756_s15 }
 0x137   : > { %223 = vrot.lane.b32.xlu1 %v122_v7, %s754_s13 }
 0x13f   : > { %674 = vrot.lane.b32.xlu1 %v793_v4, %s757_s16 }
 0x147   : > { %317 = vrot.lane.b32.xlu1 %v121_v3, %s758_s17 }
 0x14f   : > { %413 = vrot.lane.b32.xlu1 %v121_v3, %s759_s18 }
 0x157   : > { %415 = vrot.lane.b32.xlu1 %v122_v7, %s759_s18 }
 0x181   : > { %v166_v16 = vpop.xlane.xlu1 %165 }
 0x182   : > { %v170_v17 = vsub.f32 %v157_v8, %v166_v16 }
 0x184   : > { %v172_v18 = vmul.f32 1.442695, %v170_v17 }
 0x186   : > { %713 = vpow2.f32 %v172_v18 }
 0x189   : > { %v169_v19 = vpop.xlane.xlu1 %168 }
 0x18a   : > { %v171_v20 = vsub.f32 %v160_v10, %v169_v19 }
 0x18c   : > { %v714_v21 = vpop.eup %713  ;;  %v174_v22 = vmul.f32 1.442695, %v171_v20 }
 0x18d   : > { %v176_v23 = vsel %vm163_vm1, %v714_v21, 0.0 }
 0x18e   : > { %715 = vpow2.f32 %v174_v22  ;;  %177 = vadd.xlane.f32.xlu2 %v176_v23 }
 0x194   : > { %v716_v24 = vpop.eup %715 }
 0x195   : > { %v179_v25 = vsel %vm163_vm1, %v716_v24, 0.0 }
 0x196   : > { %180 = vadd.xlane.f32.xlu0 %v179_v25 }
 0x1a1   : > { %v670_v26 = vpop.permute.xlu1 %669 }
 0x1a2   : > { %v671_v30 = vunpack.i.l.bf16 %v670_v26  ;;  %v672_v32 = vunpack.i.h.bf16 %v670_v26 }
 0x1a4   : > { %212 = vmatpush.msra.mxu1 %v671_v30 }
 0x1a6   : > { %679 = vrot.lane.b32.xlu2 %v793_v4, %s760_s19  ;;  %213 = vmatpush.msra.mxu1 %v672_v32 }
 0x1a9   : > { %v224_v27 = vpop.permute.xlu1 %223 }
 0x1aa   : > { %618 = vmatmul.msk.f32.gmra.mxu2 %vm129_vm0, %v224_v27  ;;  %319 = vrot.lane.b32.xlu0 %v122_v7, %s758_s17 }
 0x1b1   : > { %v675_v31 = vpop.permute.xlu1 %674 }
 0x1b2   : > { %v676_v33 = vunpack.i.l.bf16 %v675_v31  ;;  %v677_v34 = vunpack.i.h.bf16 %v675_v31 }
 0x1b4   : > { %621 = vmatpush.xpose.msk.msrb.mxu1 %vm129_vm0, %v676_v33 }
 0x1b8   : > { %622 = vmatpush.xpose.msk.msrb.mxu1 %vm129_vm0, %v677_v34 }
 0x1b9   : > { %v318_v36 = vpop.permute.xlu1 %317 }
 0x1c1   : > { %v414_v43 = vpop.permute.xlu1 %413 }
 0x1c9   : > { %v416_v46 = vpop.permute.xlu1 %415 }
 0x1cf   : > { %261 = vmax.xlane.f32.xlu2 %v260_v29 }
 0x201   : > { %v178_v35 = vpop.xlane.xlu2 %177 }
 0x202   : > { %717 = vrcp.f32 %v178_v35 }
 0x208   : > { %v718_v37 = vpop.eup %717 }
 0x209   : > { %v680_v38 = vpop.permute.xlu2 %679  ;;  %v181_v39 = vpop.xlane.xlu0 %180  ;;  %v184_v40 = vmul.f32 %v718_v37, %v714_v21 }
 0x20a   : > { %v681_v41 = vunpack.i.l.bf16 %v680_v38  ;;  %719 = vrcp.f32 %v181_v39  ;;  %v682_v42 = vunpack.i.h.bf16 %v680_v38 }
 0x20b   : > { %613 = vmatmul.msk.f32.vlgmr.msra.gmra.mxu1 %vm163_vm1, %v184_v40 }
 0x20c   : > { %627 = vmatpush.xpose.msk.msrb.mxu0 %vm129_vm0, %v681_v41 }
 0x210   : > { %v720_v44 = vpop.eup %719  ;;  %628 = vmatpush.xpose.msk.msrb.mxu0 %vm129_vm0, %v682_v42 }
 0x211   : > { %v185_v45 = vmul.f32 %v720_v44, %v716_v24 }
 0x213   : > { %614 = vmatmul.msk.f32.gmra.mxu1 %vm163_vm1, %v185_v45  ;;  %629 = vmatmul.msk.f32.vlgmr.msrb.gmra.mxu0 %vm129_vm0, %v414_v43 }
 0x21b   : > { %623 = vmatmul.msk.f32.vlgmr.msrb.gmra.mxu1 %vm129_vm0, %v318_v36  ;;  %630 = vmatmul.msk.f32.gmra.mxu0 %vm129_vm0, %v416_v46 }
 0x21c   : > { %v320_v47 = vpop.permute.xlu0 %319 }
 0x223   : > { %624 = vmatmul.msk.f32.gmra.mxu1 %vm129_vm0, %v320_v47 }
 0x22d   : > { %v257_v48 = vpop.f32.mrf.mxu2 }
 0x22e   : > { %v263_v49 = vsel %vm163_vm1, %v257_v48, -inf }
 0x22f   : > { %264 = vmax.xlane.f32.xlu1 %v263_v49 }
 0x242   : > { %v262_v51 = vpop.xlane.xlu2 %261 }
 0x243   : > { %v266_v52 = vsub.f32 %v254_v28, %v262_v51 }
 0x245   : > { %v268_v56 = vmul.f32 1.442695, %v266_v52 }
 0x247   : > { %721 = vpow2.f32 %v268_v56 }
 0x24d   : > { %v722_v61 = vpop.eup %721 }
 0x24e   : > { %v272_v63 = vsel %vm163_vm1, %v722_v61, 0.0 }
 0x288   : > { %v823_v50 = vpop.f32.mrf.mxu1 }
 0x290   : > { %v825_v53 = vpop.f32.mrf.mxu1  ;;  %v446_v54 = vpop.f32.mrf.mxu0 }
 0x291   : > { %v452_v55 = vsel %vm163_vm1, %v446_v54, -inf }
 0x292   : > { %453 = vmax.xlane.f32.xlu2 %v452_v55 }
 0x298   : > { %v350_v57 = vpop.f32.mrf.mxu1  ;;  %v449_v58 = vpop.f32.mrf.mxu0 }
 0x299   : > { %v455_v59 = vsel %vm163_vm1, %v449_v58, -inf  ;;  %v356_v60 = vsel %vm163_vm1, %v350_v57, -inf }
 0x29a   : > { %456 = vmax.xlane.f32.xlu1 %v455_v59  ;;  %357 = vmax.xlane.f32.xlu0 %v356_v60 }
 0x2a0   : > { %v353_v62 = vpop.f32.mrf.mxu1 }
 0x2a1   : > { %v359_v0 = vsel %vm163_vm1, %v353_v62, -inf }
 0x2a2   : > { %v265_v1 = vpop.xlane.xlu1 %264  ;;  %273 = vadd.xlane.f32.xlu0 %v272_v63  ;;  %360 = vmax.xlane.f32.xlu2 %v359_v0 }
 0x2a3   : > { %v267_v2 = vsub.f32 %v257_v48, %v265_v1 }
 0x2a5   : > { %v270_v3 = vmul.f32 1.442695, %v267_v2 }
 0x2a7   : > { %723 = vpow2.f32 %v270_v3 }
 0x2ad   : > { %v724_v5 = vpop.eup %723 }
 0x2ae   : > { %v275_v6 = vsel %vm163_vm1, %v724_v5, 0.0 }
 0x2af   : > { %276 = vadd.xlane.f32.xlu1 %v275_v6 }
 0x2ba   : > { %684 = vrot.lane.b32.xlu2 %v793_v4, %s761_s20 }
 0x2c2   : > { %694 = vrot.lane.b32.xlu2 %v793_v4, %s762_s21 }
 0x305   : > { %v454_v7 = vpop.xlane.xlu2 %453 }
 0x306   : > { %v458_v8 = vsub.f32 %v446_v54, %v454_v7 }
 0x308   : > { %v460_v9 = vmul.f32 1.442695, %v458_v8 }
 0x30a   : > { %725 = vpow2.f32 %v460_v9 }
 0x30d   : > { %v358_v10 = vpop.xlane.xlu0 %357  ;;  %v457_v15 = vpop.xlane.xlu1 %456 }
 0x30e   : > { %v362_v11 = vsub.f32 %v350_v57, %v358_v10  ;;  %v459_v19 = vsub.f32 %v449_v58, %v457_v15 }
 0x310   : > { %v726_v12 = vpop.eup %725  ;;  %v364_v13 = vmul.f32 1.442695, %v362_v11  ;;  %v462_v23 = vmul.f32 1.442695, %v459_v19 }
 0x311   : > { %v464_v14 = vsel %vm163_vm1, %v726_v12, 0.0 }
 0x312   : > { %465 = vadd.xlane.f32.xlu1 %v464_v14  ;;  %727 = vpow2.f32 %v364_v13 }
 0x315   : > { %v274_v16 = vpop.xlane.xlu0 %273  ;;  %v361_v17 = vpop.xlane.xlu2 %360 }
 0x316   : > { %v363_v18 = vsub.f32 %v353_v62, %v361_v17  ;;  %729 = vrcp.f32 %v274_v16 }
 0x318   : > { %v366_v20 = vmul.f32 1.442695, %v363_v18  ;;  %v728_v21 = vpop.eup %727 }
 0x319   : > { %v368_v22 = vsel %vm163_vm1, %v728_v21, 0.0 }
 0x31a   : > { %731 = vpow2.f32 %v366_v20  ;;  %369 = vadd.xlane.f32.xlu0 %v368_v22 }
 0x31b   : > { %733 = vpow2.f32 %v462_v23 }
 0x31c   : > { %v730_v25 = vpop.eup %729 }
 0x31d   : > { %v685_v24 = vpop.permute.xlu2 %684  ;;  %v280_v30 = vmul.f32 %v730_v25, %v722_v61 }
 0x31e   : > { %v686_v26 = vunpack.i.l.bf16 %v685_v24  ;;  %v687_v27 = vunpack.i.h.bf16 %v685_v24 }
 0x320   : > { %v732_v28 = vpop.eup %731  ;;  %308 = vmatpush.msra.mxu3 %v686_v26 }
 0x321   : > { %v371_v29 = vsel %vm163_vm1, %v732_v28, 0.0  ;;  %v734_v32 = vpop.eup %733 }
 0x322   : > { %v277_v31 = vpop.xlane.xlu1 %276  ;;  %372 = vadd.xlane.f32.xlu1 %v371_v29  ;;  %309 = vmatpush.msra.mxu3 %v687_v27  ;;  %v467_v34 = vsel %vm163_vm1, %v734_v32, 0.0 }
 0x323   : > { %735 = vrcp.f32 %v277_v31  ;;  %619 = vmatmul.msk.f32.vlgmr.msra.gmra.mxu3 %vm163_vm1, %v280_v30 }
 0x325   : > { %v695_v36 = vpop.permute.xlu2 %694 }
 0x326   : > { %v696_v37 = vunpack.i.l.bf16 %v695_v36  ;;  %v697_v38 = vunpack.i.h.bf16 %v695_v36 }
 0x328   : > { %500 = vmatpush.msrb.mxu2 %v696_v37 }
 0x329   : > { %v736_v33 = vpop.eup %735 }
 0x32a   : > { %468 = vadd.xlane.f32.xlu1 %v467_v34  ;;  %v281_v35 = vmul.f32 %v736_v33, %v724_v5  ;;  %501 = vmatpush.msrb.mxu2 %v697_v38 }
 0x32c   : > { %620 = vmatmul.msk.f32.gmra.mxu3 %vm163_vm1, %v281_v35 }
 0x32e   : > { %689 = vrot.lane.b32.xlu0 %v793_v4, %s763_s22 }
 0x385   : > { %v466_v39 = vpop.xlane.xlu1 %465 }
 0x386   : > { %737 = vrcp.f32 %v466_v39 }
 0x38c   : > { %v738_v40 = vpop.eup %737 }
 0x38d   : > { %v472_v41 = vmul.f32 %v738_v40, %v726_v12  ;;  %v370_v43 = vpop.xlane.xlu0 %369 }
 0x38e   : > { %739 = vrcp.f32 %v370_v43 }
 0x38f   : > { %631 = vmatmul.msk.f32.vlgmr.msrb.gmra.mxu2 %vm163_vm1, %v472_v41 }
 0x394   : > { %v740_v46 = vpop.eup %739 }
 0x395   : > { %v373_v42 = vpop.xlane.xlu1 %372  ;;  %v376_v49 = vmul.f32 %v740_v46, %v728_v21 }
 0x39d   : > { %v469_v44 = vpop.xlane.xlu1 %468 }
 0x39e   : > { %741 = vrcp.f32 %v469_v44 }
 0x39f   : > { %743 = vrcp.f32 %v373_v42 }
 0x3a0   : > { %v690_v45 = vpop.permute.xlu0 %689 }
 0x3a1   : > { %v691_v47 = vunpack.i.l.bf16 %v690_v45  ;;  %v692_v48 = vunpack.i.h.bf16 %v690_v45 }
 0x3a3   : > { %404 = vmatpush.msrb.mxu3 %v691_v47 }
 0x3a4   : > { %v742_v4 = vpop.eup %741 }
 0x3a5   : > { %v473_v51 = vmul.f32 %v742_v4, %v734_v32  ;;  %405 = vmatpush.msrb.mxu3 %v692_v48  ;;  %v744_v54 = vpop.eup %743 }
 0x3a6   : > { %v311_v52 = vpop.f32.mrf.mxu3  ;;  %625 = vmatmul.msk.f32.vlgmr.msrb.gmra.mxu3 %vm163_vm1, %v376_v49  ;;  %v377_v55 = vmul.f32 %v744_v54, %v732_v28 }
 0x3a7   : > { %632 = vmatmul.msk.f32.gmra.mxu2 %vm163_vm1, %v473_v51 }
 0x3ae   : > { %626 = vmatmul.msk.f32.gmra.mxu3 %vm163_vm1, %v377_v55 }
 0x3af   : > { %v314_v56 = vpop.f32.mrf.mxu3 }
 0x3b0   : > { %v698_v57 = vpack.i.bf16 %v314_v56, %v311_v52 }
 0x3b2   : > { %699 = vrot.lane.b32.xlu2 %v698_v57, %s764_s23 }
 0x40c   : > { %v700_v0 = vpop.permute.xlu2 %699 }
 0x40d   : > { %v702_v1 = vunpack.i.h.bf16 %v700_v0  ;;  %v701_v2 = vunpack.i.l.bf16 %v700_v0 }
 0x40f   : > { %v534_v8 = vsel %vm129_vm0, %v825_v53, %v702_v1  ;;  %v533_v9 = vsel %vm129_vm0, %v823_v50, %v701_v2 }
 0x412   : > { %v503_v58 = vpop.f32.mrf.mxu2 }
 0x429   : > { %v407_v59 = vpop.f32.mrf.mxu3 }
 0x42a   : > { %v506_v60 = vpop.f32.mrf.mxu2 }
 0x42b   : > { %v708_v61 = vpack.i.bf16 %v506_v60, %v503_v58 }
 0x42d   : > { %709 = vrot.lane.b32.xlu0 %v708_v61, %s765_s24 }
 0x431   : > { %v410_v62 = vpop.f32.mrf.mxu3 }
 0x432   : > { %v703_v63 = vpack.i.bf16 %v410_v62, %v407_v59 }
 0x434   : > { %704 = vrot.lane.b32.xlu1 %v703_v63, %s766_s25 }
 0x49f   : > { %v710_v3 = vpop.permute.xlu0 %709 }
 0x4a0   : > { %v712_v10 = vunpack.i.h.bf16 %v710_v3  ;;  %v711_v11 = vunpack.i.l.bf16 %v710_v3 }
 0x4a6   : > { %v705_v5 = vpop.permute.xlu1 %704 }
 0x4a7   : > { %v707_v6 = vunpack.i.h.bf16 %v705_v5  ;;  %v706_v7 = vunpack.i.l.bf16 %v705_v5 }
 0x4a9   : > { %v536_v12 = vsel %vm163_vm1, %v534_v8, %v707_v6  ;;  %v535_v13 = vsel %vm163_vm1, %v533_v9, %v706_v7 }
 0x4aa   : > { %v539_v14 = vsel %vm537_vm2, %v536_v12, %v712_v10  ;;  %v538_v15 = vsel %vm537_vm2, %v535_v13, %v711_v11 }
 0x4ab   : > { %v541_v16 = vpack.c.bf16 %v539_v14, %v539_v14  ;;  %v540_v17 = vpack.c.bf16 %v538_v15, %v538_v15 }
 0x4ad   : > { %544 = vst.msk [vmem:[%s116_s28 + $0x4] sm:$0xf] %vm542_vm3, %v541_v16 }
 0x4ae   : > { %543 = vst.msk [vmem:[%s116_s28] sm:$0xf] %vm542_vm3, %v540_v17 }
 0x4af PF: > { %s11_s6 = sadd.s32 1, %s751_s6  }
 0x4b0   : > { %p8_p4 = scmp.ge.s32.totalorder %s11_s6, 4  }
 0x4b2   :  { %10 = sbr.rel (!%p8_p4) target bundleno = 1 (0x1), region = 54 }

// kernel: transformer2d_forward.34
= control target key start
LH: loop header
LB: loop body
LE: loop exit
PB: predicated region body
PF: predicated region fallthrough
CT: control target
= control target key end

     0   :  { %vm19_vm0 = vcmask 523264   ;;  %v151_v1 = vmov 0.0   ;;  %vm58_vm1 = vcmask 261120   ;;  %vm116_vm2 = vcmask 519168   ;;  %s207_s1 = inlined_call_operand.vmem [shape: bf16[32,64], index: 1, kind: input, shape index: {}]   ;;  %s208_s2 = inlined_call_operand.vmem [shape: f32[1,64], index: 2, kind: input, shape index: {}]   ;;  %s209_s0 = inlined_call_operand.vmem [shape: bf16[32,32], index: 0, kind: input, shape index: {}]   ;;  %s210_s3 = inlined_call_operand.vmem [shape: bf16[32,64], index: 3, kind: output, shape index: {}]  }
   0x1   :  { %v146_v0 = vld [vmem:[%s207_s1 + $0x8] sm:$0xff]  ;;  %20 = vst.msk [vmem:[#allocation2] sm:$0xff] %vm19_vm0, %v151_v1  ;;  %v145_v2 = vld [vmem:[%s207_s1] sm:$0xff] }
   0x2   :  { %21 = vst.msk [vmem:[#allocation2 + $0x8] sm:$0xff] %vm19_vm0, %v151_v1  ;;  %71 = vmatpush.bf16.msra.mxu0 %v146_v0  ;;  %147 = vmatpush.bf16.msra.mxu1 %v146_v0  ;;  %v143_v3 = vld [vmem:[%s209_s0] sm:$0xff]  ;;  %v144_v4 = vld [vmem:[%s209_s0 + $0x8] sm:$0xff] }
   0x3   :  { %22 = vst.msk [vmem:[#allocation2 + $0x10] sm:$0xff] %vm19_vm0, %v151_v1  ;;  %v150_v13 = vld [vmem:[%s208_s2] ss:$0 sm:$0xff] }
   0x4   :  { %23 = vst.msk [vmem:[#allocation2 + $0x18] sm:$0xff] %vm19_vm0, %v151_v1 }
   0x6   :  { %72 = vmatpush.bf16.msra.mxu0 %v145_v2  ;;  %148 = vmatpush.bf16.msra.mxu1 %v145_v2 }
   0x8   :  { %v24_v5 = vld [vmem:[#allocation2] sm:$0xff] }
   0x9   :  { %141 = vmatmul.msk.bf16.vlgmr.msra.gmra.mxu0 %vm58_vm1, %v143_v3  ;;  %142 = vmatmul.msk.bf16.vlgmr.msra.gmra.mxu1 %vm58_vm1, %v144_v4  ;;  %v25_v11 = vld [vmem:[#allocation2 + $0x8] sm:$0xff] }
   0xa   :  { %v26_v6 = vld [vmem:[#allocation2 + $0x10] sm:$0xff] }
   0xb   :  { %v27_v12 = vld [vmem:[#allocation2 + $0x18] sm:$0xff] }
  0x86   :  { %v74_v7 = vpop.f32.mrf.mxu0  ;;  %v79_v8 = vpop.f32.mrf.mxu1 }
  0x87   :  { %v84_v9 = vadd.f32 %v74_v7, %v24_v5  ;;  %v86_v10 = vadd.f32 %v79_v8, %v26_v6 }
  0x89   :  { %89 = vst.msk [vmem:[#allocation2] sm:$0xff] %vm19_vm0, %v84_v9 }
  0x8a   :  { %91 = vst.msk [vmem:[#allocation2 + $0x10] sm:$0xff] %vm19_vm0, %v86_v10 }
  0x8e   :  { %v76_v14 = vpop.f32.mrf.mxu0  ;;  %v81_v15 = vpop.f32.mrf.mxu1 }
  0x8f   :  { %v85_v16 = vadd.f32 %v76_v14, %v25_v11  ;;  %v87_v17 = vadd.f32 %v81_v15, %v27_v12 }
  0x90   :  { %v96_v18 = vld [vmem:[#allocation2] sm:$0xff] }
  0x91   :  { %v104_v19 = vadd.f32 %v150_v13, %v96_v18  ;;  %v98_v20 = vld [vmem:[#allocation2 + $0x10] sm:$0xff]  ;;  %90 = vst.msk [vmem:[#allocation2 + $0x8] sm:$0xff] %vm19_vm0, %v85_v16 }
  0x92   :  { %v106_v21 = vadd.f32 %v150_v13, %v98_v20  ;;  %92 = vst.msk [vmem:[#allocation2 + $0x18] sm:$0xff] %vm19_vm0, %v87_v17 }
  0x93   :  { %v108_v22 = vmax.f32 %v104_v19, 0.0 }
  0x94   :  { %v110_v23 = vmax.f32 %v106_v21, 0.0 }
  0x95   :  { %v112_v24 = vpack.c.bf16 %v108_v22, %v108_v22 }
  0x96   :  { %v114_v25 = vpack.c.bf16 %v110_v23, %v110_v23 }
  0x97   :  { %117 = vst.msk [vmem:[%s210_s3] sm:$0xf] %vm116_vm2, %v112_v24 }
  0x98   :  { %119 = vst.msk [vmem:[%s210_s3 + $0x8] sm:$0xf] %vm116_vm2, %v114_v25  ;;  %v97_v26 = vld [vmem:[#allocation2 + $0x8] sm:$0xff] }
  0x99   :  { %v105_v27 = vadd.f32 %v150_v13, %v97_v26  ;;  %v99_v28 = vld [vmem:[#allocation2 + $0x18] sm:$0xff] }
  0x9a   :  { %v107_v29 = vadd.f32 %v150_v13, %v99_v28 }
  0x9b   :  { %v109_v30 = vmax.f32 %v105_v27, 0.0 }
  0x9c   :  { %v111_v31 = vmax.f32 %v107_v29, 0.0 }
  0x9d   :  { %v113_v32 = vpack.c.bf16 %v109_v30, %v109_v30 }
  0x9e   :  { %v115_v33 = vpack.c.bf16 %v111_v31, %v111_v31 }
  0x9f   :  { %118 = vst.msk [vmem:[%s210_s3 + $0x4] sm:$0xf] %vm116_vm2, %v113_v32 }
  0xa0   :  { %120 = vst.msk [vmem:[%s210_s3 + $0xc] sm:$0xf] %vm116_vm2, %v115_v33 }

// kernel: transformer2d_forward.35
= control target key start
LH: loop header
LB: loop body
LE: loop exit
PB: predicated region body
PF: predicated region fallthrough
CT: control target
= control target key end

     0   :  { %vm28_vm0 = vcmask 261120   ;;  %v329_v1 = vmov 0.0   ;;  %vm83_vm1 = vcmask 523264   ;;  %v330_v42 = vmov 32.0   ;;  %s446_s1 = inlined_call_operand.vmem [shape: bf16[64,32], index: 1, kind: input, shape index: {}]   ;;  %s447_s0 = inlined_call_operand.vmem [shape: bf16[32,64], index: 0, kind: input, shape index: {}]   ;;  %s448_s2 = inlined_call_operand.vmem [shape: f32[1,32], index: 2, kind: input, shape index: {}]   ;;  %s449_s3 = inlined_call_operand.vmem [shape: bf16[32,32], index: 3, kind: input, shape index: {}]   ;;  %s450_s4 = inlined_call_operand.vmem [shape: f32[1,32], index: 4, kind: input, shape index: {}]   ;;  %s451_s5 = inlined_call_operand.vmem [shape: f32[1,32], index: 5, kind: input, shape index: {}]   ;;  %s452_s6 = inlined_call_operand.vmem [shape: bf16[32,32], index: 6, kind: output, shape index: {}]  }
   0x1   :  { %v300_v0 = vld [vmem:[%s446_s1 + $0x18] sm:$0xff]  ;;  %29 = vst.msk [vmem:[#allocation2] sm:$0xff] %vm28_vm0, %v329_v1  ;;  %v299_v2 = vld [vmem:[%s446_s1 + $0x10] sm:$0xff]  ;;  %v298_v3 = vld [vmem:[%s446_s1 + $0x8] sm:$0xff]  ;;  %319 = vrcp.f32 %v330_v42  ;;  %vm260_vm11 = vcmask 257024  }
   0x2   :  { %30 = vst.msk [vmem:[#allocation2 + $0x8] sm:$0xff] %vm28_vm0, %v329_v1  ;;  %94 = vmatpush.bf16.msra.mxu0 %v300_v0  ;;  %310 = vmatpush.bf16.msra.mxu1 %v300_v0  ;;  %v297_v4 = vld [vmem:[%s446_s1] sm:$0xff]  ;;  %v296_v6 = vld [vmem:[%s447_s0 + $0x8] sm:$0xff] }
   0x3   :  { %31 = vst.msk [vmem:[#allocation2 + $0x10] sm:$0xff] %vm28_vm0, %v329_v1  ;;  %v295_v5 = vld [vmem:[%s447_s0] sm:$0xff]  ;;  %v309_v17 = vld [vmem:[%s449_s3 + $0x8] sm:$0xff]  }
   0x4   :  { %32 = vst.msk [vmem:[#allocation2 + $0x18] sm:$0xff] %vm28_vm0, %v329_v1  ;;  %v302_v15 = vld [vmem:[%s449_s3] sm:$0xff]   ;;  %v307_v23 = vunpack.c.l.bf16 %v309_v17  ;;  %v308_v33 = vunpack.c.h.bf16 %v309_v17 }
   0x5   :  { %v316_v16 = vld [vmem:[%s448_s2] ss:$0 sm:$0xff]  ;;  %v303_v22 = vunpack.c.l.bf16 %v302_v15  ;;  %v304_v32 = vunpack.c.h.bf16 %v302_v15 }
   0x6   :  { %95 = vmatpush.bf16.msra.mxu0 %v299_v2  ;;  %311 = vmatpush.bf16.msra.mxu1 %v299_v2 }
   0x7   :  { %v320_v43 = vpop.eup %319 }
   0x8   :  { %v33_v7 = vld [vmem:[#allocation2] sm:$0xff]  ;;  %v158_v44 = vmul.f32 32.0, %v320_v43  ;;  %vm162_vm2 = vweird.f32 %v320_v43 }
   0x9   :  { %v34_v13 = vld [vmem:[#allocation2 + $0x8] sm:$0xff] }
   0xa   :  { %96 = vmatpush.bf16.msra.mxu0 %v298_v3  ;;  %312 = vmatpush.bf16.msra.mxu1 %v298_v3  ;;  %v35_v8 = vld [vmem:[#allocation2 + $0x10] sm:$0xff]  ;;  %v159_v45 = vsub.f32 1.0, %v158_v44 }
   0xb   :  { %v36_v14 = vld [vmem:[#allocation2 + $0x18] sm:$0xff] }
   0xc   :  { %v160_v46 = vmul.f32 %v320_v43, %v159_v45 }
   0xe   :  { %97 = vmatpush.bf16.msra.mxu0 %v297_v4  ;;  %313 = vmatpush.bf16.msra.mxu1 %v297_v4  ;;  %v161_v47 = vadd.f32 %v320_v43, %v160_v46 }
  0x10   :  { %v163_v48 = vsel %vm162_vm2, %v320_v43, %v161_v47 }
  0x11   :  { %293 = vmatmul.msk.bf16.vlgmr.msra.gmra.mxu0 %vm83_vm1, %v295_v5  ;;  %294 = vmatmul.msk.bf16.vlgmr.msra.gmra.mxu1 %vm83_vm1, %v296_v6 }
  0x8e   :  { %v99_v9 = vpop.f32.mrf.mxu0  ;;  %v104_v10 = vpop.f32.mrf.mxu1 }
  0x8f   :  { %v109_v11 = vadd.f32 %v99_v9, %v33_v7  ;;  %v111_v12 = vadd.f32 %v104_v10, %v35_v8 }
  0x91   :  { %114 = vst.msk [vmem:[#allocation2] sm:$0xff] %vm28_vm0, %v109_v11 }
  0x92   :  { %116 = vst.msk [vmem:[#allocation2 + $0x10] sm:$0xff] %vm28_vm0, %v111_v12 }
  0x96   :  { %v101_v18 = vpop.f32.mrf.mxu0  ;;  %v106_v19 = vpop.f32.mrf.mxu1 }
  0x97   :  { %v110_v20 = vadd.f32 %v101_v18, %v34_v13  ;;  %v112_v21 = vadd.f32 %v106_v19, %v36_v14 }
  0x98   :  { %v121_v24 = vld [vmem:[#allocation2] sm:$0xff] }
  0x99   :  { %115 = vst.msk [vmem:[#allocation2 + $0x8] sm:$0xff] %vm28_vm0, %v110_v20  ;;  %v123_v25 = vld [vmem:[#allocation2 + $0x10] sm:$0xff]  ;;  %v129_v26 = vadd.f32 %v316_v16, %v121_v24 }
  0x9a   :  { %117 = vst.msk [vmem:[#allocation2 + $0x18] sm:$0xff] %vm28_vm0, %v112_v21  ;;  %v131_v27 = vadd.f32 %v316_v16, %v123_v25 }
  0x9b   :  { %v141_v28 = vadd.f32 %v303_v22, %v129_v26 }
  0x9c   :  { %v143_v29 = vadd.f32 %v307_v23, %v131_v27 }
  0x9d   :  { %v145_v30 = vsel %vm28_vm0, %v141_v28, 0.0 }
  0x9e   :  { %v151_v31 = vsel %vm28_vm0, %v143_v29, 0.0  ;;  %146 = vadd.xlane.f32.xlu0 %v145_v30 }
  0x9f   :  { %152 = vadd.xlane.f32.xlu1 %v151_v31  ;;  %v317_v31 = vld [vmem:[%s450_s4] ss:$0 sm:$0xff] }
  0xa0   :  { %v122_v34 = vld [vmem:[#allocation2 + $0x8] sm:$0xff] }
  0xa1   :  { %v124_v35 = vld [vmem:[#allocation2 + $0x18] sm:$0xff]  ;;  %v130_v36 = vadd.f32 %v316_v16, %v122_v34 }
  0xa2   :  { %v132_v37 = vadd.f32 %v316_v16, %v124_v35 }
  0xa3   :  { %v142_v38 = vadd.f32 %v304_v32, %v130_v36  ;;  %v318_v36 = vld [vmem:[%s451_s5] ss:$0 sm:$0xff] }
  0xa4   :  { %v144_v39 = vadd.f32 %v308_v33, %v132_v37 }
  0xa5   :  { %v148_v40 = vsel %vm28_vm0, %v142_v38, 0.0 }
  0xa6   :  { %v154_v41 = vsel %vm28_vm0, %v144_v39, 0.0  ;;  %149 = vadd.xlane.f32.xlu0 %v148_v40 }
  0xa7   :  { %155 = vadd.xlane.f32.xlu1 %v154_v41 }
 0x111   :  { %v147_v49 = vpop.xlane.xlu0 %146 }
 0x112   :  { %v153_v50 = vpop.xlane.xlu1 %152  ;;  %v164_v51 = vmul.f32 %v163_v48, %v147_v49 }
 0x113   :  { %v166_v52 = vmul.f32 %v163_v48, %v153_v50 }
 0x114   :  { %v168_v53 = vsub.f32 %v141_v28, %v164_v51 }
 0x115   :  { %v405_v54 = vsub.f32 %v143_v29, %v166_v52 }
 0x116   :  { %v172_v55 = vmul.f32 %v168_v53, %v168_v53 }
 0x117   :  { %v174_v56 = vmul.f32 %v405_v54, %v405_v54 }
 0x118   :  { %v176_v57 = vsel %vm28_vm0, %v172_v55, 0.0 }
 0x119   :  { %177 = vadd.xlane.f32.xlu2 %v176_v57  ;;  %v182_v58 = vsel %vm28_vm0, %v174_v56, 0.0  ;;  %v150_v59 = vpop.xlane.xlu0 %149 }
 0x11a   :  { %v156_v60 = vpop.xlane.xlu1 %155  ;;  %183 = vadd.xlane.f32.xlu0 %v182_v58  ;;  %v165_v61 = vmul.f32 %v163_v48, %v150_v59 }
 0x11b   :  { %v167_v62 = vmul.f32 %v163_v48, %v156_v60 }
 0x11c   :  { %v411_v63 = vsub.f32 %v142_v38, %v165_v61 }
 0x11d   :  { %v413_v0 = vsub.f32 %v144_v39, %v167_v62 }
 0x11e   :  { %v173_v1 = vmul.f32 %v411_v63, %v411_v63 }
 0x11f   :  { %v175_v2 = vmul.f32 %v413_v0, %v413_v0 }
 0x120   :  { %v179_v3 = vsel %vm28_vm0, %v173_v1, 0.0 }
 0x121   :  { %v185_v4 = vsel %vm28_vm0, %v175_v2, 0.0  ;;  %180 = vadd.xlane.f32.xlu2 %v179_v3 }
 0x122   :  { %186 = vadd.xlane.f32.xlu1 %v185_v4 }
 0x18c   :  { %v178_v5 = vpop.xlane.xlu2 %177 }
 0x18d   :  { %v188_v6 = vmul.f32 %v178_v5, %v163_v48  ;;  %v184_v7 = vpop.xlane.xlu0 %183 }
 0x18e   :  { %v190_v8 = vmul.f32 %v184_v7, %v163_v48 }
 0x18f   :  { %v192_v9 = vadd.f32 1e-05, %v188_v6 }
 0x190   :  { %v194_v10 = vadd.f32 1e-05, %v190_v8 }
 0x191   :  { %321 = vrsqrt.f32 %v192_v9  ;;  %vm202_vm5 = vweird.f32 %v192_v9 }
 0x192   :  { %323 = vrsqrt.f32 %v194_v10  ;;  %vm222_vm7 = vweird.f32 %v194_v10 }
 0x194   :  { %v181_v11 = vpop.xlane.xlu2 %180 }
 0x195   :  { %v187_v12 = vpop.xlane.xlu1 %186  ;;  %v189_v13 = vmul.f32 %v181_v11, %v163_v48 }
 0x196   :  { %v191_v14 = vmul.f32 %v187_v12, %v163_v48 }
 0x197   :  { %v322_v15 = vpop.eup %321  ;;  %v193_v16 = vadd.f32 1e-05, %v189_v13 }
 0x198   :  { %v324_v17 = vpop.eup %323  ;;  %v197_v18 = vmul.f32 %v322_v15, %v192_v9  ;;  %v195_v19 = vadd.f32 1e-05, %v191_v14  ;;  %vm203_vm3 = vweird.f32 %v322_v15 }
 0x199   :  { %v217_v20 = vmul.f32 %v324_v17, %v194_v10  ;;  %325 = vrsqrt.f32 %v193_v16  ;;  %vm223_vm4 = vweird.f32 %v324_v17  ;;  %vm204_vm6 = vmor %vm202_vm5, %vm203_vm3  ;;  %vm212_vm12 = vweird.f32 %v193_v16 }
 0x19a   :  { %v198_v21 = vmul.f32 %v322_v15, %v197_v18  ;;  %327 = vrsqrt.f32 %v195_v19  ;;  %vm224_vm8 = vmor %vm222_vm7, %vm223_vm4  ;;  %vm232_vm13 = vweird.f32 %v195_v19 }
 0x19b   :  { %v218_v22 = vmul.f32 %v324_v17, %v217_v20 }
 0x19c   :  { %v199_v23 = vmul.f32 0.5, %v198_v21 }
 0x19d   :  { %v219_v24 = vmul.f32 0.5, %v218_v22 }
 0x19e   :  { %v200_v25 = vsub.f32 1.5, %v199_v23 }
 0x19f   :  { %v326_v26 = vpop.eup %325  ;;  %v220_v27 = vsub.f32 1.5, %v219_v24 }
 0x1a0   :  { %v328_v28 = vpop.eup %327  ;;  %v201_v29 = vmul.f32 %v322_v15, %v200_v25  ;;  %v207_v30 = vmul.f32 %v326_v26, %v193_v16  ;;  %vm213_vm9 = vweird.f32 %v326_v26 }
 0x1a1   :  { %v221_v32 = vmul.f32 %v324_v17, %v220_v27  ;;  %v227_v33 = vmul.f32 %v328_v28, %v195_v19  ;;  %vm233_vm10 = vweird.f32 %v328_v28  ;;  %vm214_vm14 = vmor %vm212_vm12, %vm213_vm9 }
 0x1a2   :  { %v205_v34 = vsel %vm204_vm6, %v322_v15, %v201_v29  ;;  %v208_v35 = vmul.f32 %v326_v26, %v207_v30  ;;  %vm234_vm15 = vmor %vm232_vm13, %vm233_vm10 }
 0x1a3   :  { %v236_v37 = vmul.f32 %v205_v34, %v168_v53  ;;  %v225_v38 = vsel %vm224_vm8, %v324_v17, %v221_v32  ;;  %v228_v39 = vmul.f32 %v328_v28, %v227_v33 }
 0x1a4   :  { %v238_v40 = vmul.f32 %v225_v38, %v405_v54  ;;  %v209_v41 = vmul.f32 0.5, %v208_v35 }
 0x1a5   :  { %v244_v42 = vmul.f32 %v317_v31, %v236_v37  ;;  %v229_v43 = vmul.f32 0.5, %v228_v39 }
 0x1a6   :  { %v246_v44 = vmul.f32 %v317_v31, %v238_v40  ;;  %v210_v45 = vsub.f32 1.5, %v209_v41 }
 0x1a7   :  { %v252_v46 = vadd.f32 %v318_v36, %v244_v42  ;;  %v230_v47 = vsub.f32 1.5, %v229_v43 }
 0x1a8   :  { %v254_v48 = vadd.f32 %v318_v36, %v246_v44  ;;  %v211_v49 = vmul.f32 %v326_v26, %v210_v45 }
 0x1a9   :  { %v256_v50 = vpack.c.bf16 %v252_v46, %v252_v46  ;;  %v231_v51 = vmul.f32 %v328_v28, %v230_v47 }
 0x1aa   :  { %v258_v52 = vpack.c.bf16 %v254_v48, %v254_v48  ;;  %v215_v53 = vsel %vm214_vm14, %v326_v26, %v211_v49 }
 0x1ab   :  { %261 = vst.msk [vmem:[%s452_s6] sm:$0xf] %vm260_vm11, %v256_v50  ;;  %v235_v54 = vsel %vm234_vm15, %v328_v28, %v231_v51  ;;  %v237_v55 = vmul.f32 %v215_v53, %v411_v63 }
 0x1ac   :  { %263 = vst.msk [vmem:[%s452_s6 + $0x8] sm:$0xf] %vm260_vm11, %v258_v52  ;;  %v239_v56 = vmul.f32 %v235_v54, %v413_v0 }
 0x1ad   :  { %v245_v57 = vmul.f32 %v317_v31, %v237_v55 }
 0x1ae   :  { %v247_v58 = vmul.f32 %v317_v31, %v239_v56 }
 0x1af   :  { %v253_v59 = vadd.f32 %v318_v36, %v245_v57 }
 0x1b0   :  { %v255_v60 = vadd.f32 %v318_v36, %v247_v58 }
 0x1b1   :  { %v257_v61 = vpack.c.bf16 %v253_v59, %v253_v59 }
 0x1b2   :  { %v259_v62 = vpack.c.bf16 %v255_v60, %v255_v60 }
 0x1b3   :  { %262 = vst.msk [vmem:[%s452_s6 + $0x4] sm:$0xf] %vm260_vm11, %v257_v61 }
 0x1b4   :  { %264 = vst.msk [vmem:[%s452_s6 + $0xc] sm:$0xf] %vm260_vm11, %v259_v62 }

// kernel: transformer2d_forward.45
= control target key start
LH: loop header
LB: loop body
LE: loop exit
PB: predicated region body
PF: predicated region fallthrough
CT: control target
= control target key end

     0   :  { %vm19_vm0 = vcmask 523264   ;;  %v147_v1 = vmov 0.0   ;;  %vm58_vm1 = vcmask 261120   ;;  %vm112_vm2 = vcmask 519168   ;;  %s203_s1 = inlined_call_operand.vmem [shape: bf16[32,64], index: 1, kind: input, shape index: {}]   ;;  %s204_s2 = inlined_call_operand.vmem [shape: f32[1,64], index: 2, kind: input, shape index: {}]   ;;  %s205_s0 = inlined_call_operand.vmem [shape: bf16[32,32], index: 0, kind: input, shape index: {}]   ;;  %s206_s3 = inlined_call_operand.vmem [shape: bf16[32,64], index: 3, kind: output, shape index: {}]  }
   0x1   :  { %v142_v0 = vld [vmem:[%s203_s1 + $0x8] sm:$0xff]  ;;  %20 = vst.msk [vmem:[#allocation2] sm:$0xff] %vm19_vm0, %v147_v1  ;;  %v141_v2 = vld [vmem:[%s203_s1] sm:$0xff] }
   0x2   :  { %21 = vst.msk [vmem:[#allocation2 + $0x8] sm:$0xff] %vm19_vm0, %v147_v1  ;;  %71 = vmatpush.bf16.msra.mxu0 %v142_v0  ;;  %143 = vmatpush.bf16.msra.mxu1 %v142_v0  ;;  %v139_v3 = vld [vmem:[%s205_s0] sm:$0xff]  ;;  %v140_v4 = vld [vmem:[%s205_s0 + $0x8] sm:$0xff] }
   0x3   :  { %22 = vst.msk [vmem:[#allocation2 + $0x10] sm:$0xff] %vm19_vm0, %v147_v1  ;;  %v146_v13 = vld [vmem:[%s204_s2] ss:$0 sm:$0xff] }
   0x4   :  { %23 = vst.msk [vmem:[#allocation2 + $0x18] sm:$0xff] %vm19_vm0, %v147_v1 }
   0x6   :  { %72 = vmatpush.bf16.msra.mxu0 %v141_v2  ;;  %144 = vmatpush.bf16.msra.mxu1 %v141_v2 }
   0x8   :  { %v24_v5 = vld [vmem:[#allocation2] sm:$0xff] }
   0x9   :  { %137 = vmatmul.msk.bf16.vlgmr.msra.gmra.mxu0 %vm58_vm1, %v139_v3  ;;  %138 = vmatmul.msk.bf16.vlgmr.msra.gmra.mxu1 %vm58_vm1, %v140_v4  ;;  %v25_v11 = vld [vmem:[#allocation2 + $0x8] sm:$0xff] }
   0xa   :  { %v26_v6 = vld [vmem:[#allocation2 + $0x10] sm:$0xff] }
   0xb   :  { %v27_v12 = vld [vmem:[#allocation2 + $0x18] sm:$0xff] }
  0x86   :  { %v74_v7 = vpop.f32.mrf.mxu0  ;;  %v79_v8 = vpop.f32.mrf.mxu1 }
  0x87   :  { %v84_v9 = vadd.f32 %v74_v7, %v24_v5  ;;  %v86_v10 = vadd.f32 %v79_v8, %v26_v6 }
  0x89   :  { %89 = vst.msk [vmem:[#allocation2] sm:$0xff] %vm19_vm0, %v84_v9 }
  0x8a   :  { %91 = vst.msk [vmem:[#allocation2 + $0x10] sm:$0xff] %vm19_vm0, %v86_v10 }
  0x8e   :  { %v76_v14 = vpop.f32.mrf.mxu0  ;;  %v81_v15 = vpop.f32.mrf.mxu1 }
  0x8f   :  { %v85_v16 = vadd.f32 %v76_v14, %v25_v11  ;;  %v87_v17 = vadd.f32 %v81_v15, %v27_v12 }
  0x90   :  { %v96_v18 = vld [vmem:[#allocation2] sm:$0xff] }
  0x91   :  { %v104_v19 = vadd.f32 %v146_v13, %v96_v18  ;;  %v98_v20 = vld [vmem:[#allocation2 + $0x10] sm:$0xff]  ;;  %90 = vst.msk [vmem:[#allocation2 + $0x8] sm:$0xff] %vm19_vm0, %v85_v16 }
  0x92   :  { %v106_v21 = vadd.f32 %v146_v13, %v98_v20  ;;  %92 = vst.msk [vmem:[#allocation2 + $0x18] sm:$0xff] %vm19_vm0, %v87_v17 }
  0x93   :  { %v108_v22 = vpack.c.bf16 %v104_v19, %v104_v19 }
  0x94   :  { %v110_v23 = vpack.c.bf16 %v106_v21, %v106_v21 }
  0x95   :  { %113 = vst.msk [vmem:[%s206_s3] sm:$0xf] %vm112_vm2, %v108_v22 }
  0x96   :  { %115 = vst.msk [vmem:[%s206_s3 + $0x8] sm:$0xf] %vm112_vm2, %v110_v23 }
  0x98   :  { %v97_v24 = vld [vmem:[#allocation2 + $0x8] sm:$0xff] }
  0x99   :  { %v105_v25 = vadd.f32 %v146_v13, %v97_v24  ;;  %v99_v26 = vld [vmem:[#allocation2 + $0x18] sm:$0xff] }
  0x9a   :  { %v107_v27 = vadd.f32 %v146_v13, %v99_v26 }
  0x9b   :  { %v109_v28 = vpack.c.bf16 %v105_v25, %v105_v25 }
  0x9c   :  { %v111_v29 = vpack.c.bf16 %v107_v27, %v107_v27 }
  0x9d   :  { %114 = vst.msk [vmem:[%s206_s3 + $0x4] sm:$0xf] %vm112_vm2, %v109_v28 }
  0x9e   :  { %116 = vst.msk [vmem:[%s206_s3 + $0xc] sm:$0xf] %vm112_vm2, %v111_v29 }

// kernel: transformer2d_forward.43
= control target key start
LH: loop header
LB: loop body
LE: loop exit
PB: predicated region body
PF: predicated region fallthrough
CT: control target
= control target key end

     0   :  { %vm28_vm0 = vcmask 261120   ;;  %v198_v1 = vmov 0.0   ;;  %v199_v22 = vmov 32.0   ;;  %vm160_vm6 = vcmask 257024   ;;  %s271_s1 = inlined_call_operand.vmem [shape: bf16[32,32], index: 1, kind: input, shape index: {}]   ;;  %s272_s0 = inlined_call_operand.vmem [shape: bf16[16,32], index: 0, kind: input, shape index: {}]   ;;  %s273_s2 = inlined_call_operand.vmem [shape: f32[1,32], index: 2, kind: input, shape index: {}]   ;;  %s274_s3 = inlined_call_operand.vmem [shape: bf16[16,32], index: 3, kind: input, shape index: {}]   ;;  %s275_s4 = inlined_call_operand.vmem [shape: f32[1,32], index: 4, kind: input, shape index: {}]   ;;  %s276_s5 = inlined_call_operand.vmem [shape: f32[1,32], index: 5, kind: input, shape index: {}]   ;;  %s277_s6 = inlined_call_operand.vmem [shape: bf16[16,32], index: 6, kind: output, shape index: {}]  }
   0x1   :  { %v182_v0 = vld [vmem:[%s271_s1 + $0x8] sm:$0xff]  ;;  %29 = vst.msk [vmem:[#allocation2] sm:$0xff] %vm28_vm0, %v198_v1  ;;  %v181_v2 = vld [vmem:[%s271_s1] sm:$0xff]  ;;  %192 = vrcp.f32 %v199_v22 }
   0x2   :  { %30 = vst.msk [vmem:[#allocation2 + $0x8] sm:$0xff] %vm28_vm0, %v198_v1  ;;  %66 = vmatpush.bf16.msra.mxu0 %v182_v0  ;;  %v180_v3 = vld [vmem:[%s272_s0] sm:$0xff] }
   0x3   :  { %v184_v8 = vld [vmem:[%s274_s3] sm:$0xff]  }
   0x4   :  { %v189_v9 = vld [vmem:[%s273_s2] ss:$0 sm:$0xff]  ;;  %v185_v12 = vunpack.c.l.bf16 %v184_v8  ;;  %v186_v17 = vunpack.c.h.bf16 %v184_v8 }
   0x5   :  { %v190_v53 = vld [vmem:[%s275_s4] ss:$0 sm:$0xff] }
   0x6   :  { %67 = vmatpush.bf16.msra.mxu0 %v181_v2  ;;  %v191_v56 = vld [vmem:[%s276_s5] ss:$0 sm:$0xff] }
   0x7   :  { %v193_v23 = vpop.eup %192 }
   0x8   :  { %v31_v4 = vld [vmem:[#allocation2] sm:$0xff]  ;;  %v102_v24 = vmul.f32 32.0, %v193_v23  ;;  %vm106_vm1 = vweird.f32 %v193_v23 }
   0x9   :  { %179 = vmatmul.msk.bf16.vlgmr.msra.gmra.mxu0 %vm28_vm0, %v180_v3  ;;  %v32_v7 = vld [vmem:[#allocation2 + $0x8] sm:$0xff] }
   0xa   :  { %v103_v25 = vsub.f32 1.0, %v102_v24 }
   0xc   :  { %v104_v26 = vmul.f32 %v193_v23, %v103_v25 }
   0xe   :  { %v105_v27 = vadd.f32 %v193_v23, %v104_v26 }
  0x10   :  { %v107_v28 = vsel %vm106_vm1, %v193_v23, %v105_v27 }
  0x86   :  { %v69_v5 = vpop.f32.mrf.mxu0 }
  0x87   :  { %v74_v6 = vadd.f32 %v69_v5, %v31_v4 }
  0x89   :  { %76 = vst.msk [vmem:[#allocation2] sm:$0xff] %vm28_vm0, %v74_v6 }
  0x8e   :  { %v71_v10 = vpop.f32.mrf.mxu0 }
  0x8f   :  { %v75_v11 = vadd.f32 %v71_v10, %v32_v7 }
  0x90   :  { %v81_v13 = vld [vmem:[#allocation2] sm:$0xff] }
  0x91   :  { %77 = vst.msk [vmem:[#allocation2 + $0x8] sm:$0xff] %vm28_vm0, %v75_v11  ;;  %v87_v14 = vadd.f32 %v189_v9, %v81_v13 }
  0x93   :  { %v93_v15 = vadd.f32 %v185_v12, %v87_v14 }
  0x95   :  { %v95_v16 = vsel %vm28_vm0, %v93_v15, 0.0 }
  0x96   :  { %96 = vadd.xlane.f32.xlu0 %v95_v16 }
  0x98   :  { %v82_v18 = vld [vmem:[#allocation2 + $0x8] sm:$0xff] }
  0x99   :  { %v88_v19 = vadd.f32 %v189_v9, %v82_v18 }
  0x9b   :  { %v94_v20 = vadd.f32 %v186_v17, %v88_v19 }
  0x9d   :  { %v98_v21 = vsel %vm28_vm0, %v94_v20, 0.0 }
  0x9e   :  { %99 = vadd.xlane.f32.xlu0 %v98_v21 }
 0x109   :  { %v97_v29 = vpop.xlane.xlu0 %96 }
 0x10a   :  { %v108_v30 = vmul.f32 %v107_v28, %v97_v29 }
 0x10c   :  { %v110_v31 = vsub.f32 %v93_v15, %v108_v30 }
 0x10e   :  { %v112_v32 = vmul.f32 %v110_v31, %v110_v31 }
 0x110   :  { %v114_v33 = vsel %vm28_vm0, %v112_v32, 0.0 }
 0x111   :  { %115 = vadd.xlane.f32.xlu1 %v114_v33  ;;  %v100_v34 = vpop.xlane.xlu0 %99 }
 0x112   :  { %v109_v35 = vmul.f32 %v107_v28, %v100_v34 }
 0x114   :  { %v111_v36 = vsub.f32 %v94_v20, %v109_v35 }
 0x116   :  { %v113_v37 = vmul.f32 %v111_v36, %v111_v36 }
 0x118   :  { %v117_v38 = vsel %vm28_vm0, %v113_v37, 0.0 }
 0x119   :  { %118 = vadd.xlane.f32.xlu1 %v117_v38 }
 0x184   :  { %v116_v39 = vpop.xlane.xlu1 %115 }
 0x185   :  { %v120_v40 = vmul.f32 %v116_v39, %v107_v28 }
 0x187   :  { %v122_v41 = vadd.f32 1e-05, %v120_v40 }
 0x189   :  { %194 = vrsqrt.f32 %v122_v41  ;;  %vm130_vm3 = vweird.f32 %v122_v41 }
 0x18c   :  { %v119_v42 = vpop.xlane.xlu1 %118 }
 0x18d   :  { %v121_v43 = vmul.f32 %v119_v42, %v107_v28 }
 0x18f   :  { %v195_v44 = vpop.eup %194  ;;  %v123_v45 = vadd.f32 1e-05, %v121_v43 }
 0x190   :  { %v125_v46 = vmul.f32 %v195_v44, %v122_v41  ;;  %vm131_vm2 = vweird.f32 %v195_v44 }
 0x191   :  { %196 = vrsqrt.f32 %v123_v45  ;;  %vm132_vm4 = vmor %vm130_vm3, %vm131_vm2  ;;  %vm140_vm7 = vweird.f32 %v123_v45 }
 0x192   :  { %v126_v47 = vmul.f32 %v195_v44, %v125_v46 }
 0x194   :  { %v127_v48 = vmul.f32 0.5, %v126_v47 }
 0x196   :  { %v128_v49 = vsub.f32 1.5, %v127_v48 }
 0x197   :  { %v197_v50 = vpop.eup %196 }
 0x198   :  { %v129_v51 = vmul.f32 %v195_v44, %v128_v49  ;;  %v135_v52 = vmul.f32 %v197_v50, %v123_v45  ;;  %vm141_vm5 = vweird.f32 %v197_v50 }
 0x199   :  { %vm142_vm8 = vmor %vm140_vm7, %vm141_vm5 }
 0x19a   :  { %v133_v54 = vsel %vm132_vm4, %v195_v44, %v129_v51  ;;  %v136_v55 = vmul.f32 %v197_v50, %v135_v52 }
 0x19b   :  { %v144_v57 = vmul.f32 %v133_v54, %v110_v31 }
 0x19c   :  { %v137_v58 = vmul.f32 0.5, %v136_v55 }
 0x19d   :  { %v150_v59 = vmul.f32 %v190_v53, %v144_v57 }
 0x19e   :  { %v138_v60 = vsub.f32 1.5, %v137_v58 }
 0x19f   :  { %v156_v61 = vadd.f32 %v191_v56, %v150_v59 }
 0x1a0   :  { %v139_v62 = vmul.f32 %v197_v50, %v138_v60 }
 0x1a1   :  { %v158_v63 = vpack.c.bf16 %v156_v61, %v156_v61 }
 0x1a2   :  { %v143_v0 = vsel %vm142_vm8, %v197_v50, %v139_v62 }
 0x1a3   :  { %161 = vst.msk [vmem:[%s277_s6] sm:$0xf] %vm160_vm6, %v158_v63  ;;  %v145_v1 = vmul.f32 %v143_v0, %v111_v36 }
 0x1a5   :  { %v151_v2 = vmul.f32 %v190_v53, %v145_v1 }
 0x1a7   :  { %v157_v3 = vadd.f32 %v191_v56, %v151_v2 }
 0x1a9   :  { %v159_v4 = vpack.c.bf16 %v157_v3, %v157_v3 }
 0x1ab   :  { %162 = vst.msk [vmem:[%s277_s6 + $0x4] sm:$0xf] %vm160_vm6, %v159_v4 }

// kernel: transformer2d_forward.44
= control target key start
LH: loop header
LB: loop body
LE: loop exit
PB: predicated region body
PF: predicated region fallthrough
CT: control target
= control target key end

     0   :  { %vm19_vm0 = vcmask 261120   ;;  %v107_v1 = vmov 0.0   ;;  %vm82_vm1 = vcmask 257024   ;;  %s151_s1 = inlined_call_operand.vmem [shape: bf16[32,32], index: 1, kind: input, shape index: {}]   ;;  %s152_s2 = inlined_call_operand.vmem [shape: f32[1,32], index: 2, kind: input, shape index: {}]   ;;  %s153_s0 = inlined_call_operand.vmem [shape: bf16[16,32], index: 0, kind: input, shape index: {}]   ;;  %s154_s3 = inlined_call_operand.vmem [shape: bf16[16,32], index: 3, kind: output, shape index: {}]  }
   0x1   :  { %v104_v0 = vld [vmem:[%s151_s1 + $0x8] sm:$0xff]  ;;  %20 = vst.msk [vmem:[#allocation2] sm:$0xff] %vm19_vm0, %v107_v1  ;;  %v103_v2 = vld [vmem:[%s151_s1] sm:$0xff] }
   0x2   :  { %21 = vst.msk [vmem:[#allocation2 + $0x8] sm:$0xff] %vm19_vm0, %v107_v1  ;;  %57 = vmatpush.bf16.msra.mxu0 %v104_v0  ;;  %v102_v3 = vld [vmem:[%s153_s0] sm:$0xff] }
   0x3   :  { %v106_v8 = vld [vmem:[%s152_s2] ss:$0 sm:$0xff] }
   0x6   :  { %58 = vmatpush.bf16.msra.mxu0 %v103_v2 }
   0x8   :  { %v22_v4 = vld [vmem:[#allocation2] sm:$0xff] }
   0x9   :  { %101 = vmatmul.msk.bf16.vlgmr.msra.gmra.mxu0 %vm19_vm0, %v102_v3  ;;  %v23_v7 = vld [vmem:[#allocation2 + $0x8] sm:$0xff] }
  0x86   :  { %v60_v5 = vpop.f32.mrf.mxu0 }
  0x87   :  { %v65_v6 = vadd.f32 %v60_v5, %v22_v4 }
  0x89   :  { %67 = vst.msk [vmem:[#allocation2] sm:$0xff] %vm19_vm0, %v65_v6 }
  0x8e   :  { %v62_v9 = vpop.f32.mrf.mxu0 }
  0x8f   :  { %v66_v10 = vadd.f32 %v62_v9, %v23_v7 }
  0x90   :  { %v72_v11 = vld [vmem:[#allocation2] sm:$0xff] }
  0x91   :  { %v78_v12 = vadd.f32 %v106_v8, %v72_v11  ;;  %68 = vst.msk [vmem:[#allocation2 + $0x8] sm:$0xff] %vm19_vm0, %v66_v10 }
  0x93   :  { %v80_v13 = vpack.c.bf16 %v78_v12, %v78_v12 }
  0x95   :  { %83 = vst.msk [vmem:[%s154_s3] sm:$0xf] %vm82_vm1, %v80_v13 }
  0x98   :  { %v73_v14 = vld [vmem:[#allocation2 + $0x8] sm:$0xff] }
  0x99   :  { %v79_v15 = vadd.f32 %v106_v8, %v73_v14 }
  0x9b   :  { %v81_v16 = vpack.c.bf16 %v79_v15, %v79_v15 }
  0x9d   :  { %84 = vst.msk [vmem:[%s154_s3 + $0x4] sm:$0xf] %vm82_vm1, %v81_v16 }

// kernel: transformer2d_forward.42
= control target key start
LH: loop header
LB: loop body
LE: loop exit
PB: predicated region body
PF: predicated region fallthrough
CT: control target
= control target key end

     0   :  { %s612_s9 = smov 0   ;;  %s687_s0 = inlined_call_operand.vmem [shape: f32[2,1,8], index: 0, kind: input, shape index: {}]   ;;  %s688_s1 = inlined_call_operand.vmem [shape: bf16[2,8,96], index: 1, kind: input, shape index: {}]   ;;  %s689_s2 = inlined_call_operand.vmem [shape: bf16[2,8,32], index: 2, kind: output, shape index: {}]  }
   0x1 LB: > { %s514_s10 = sadd.s32 4294967295, %s580_s9   ;;  %p518_p0 = scmp.ge.s32.totalorder %s580_s9, 1  ;;  %s580_s9 = sphi %s612_s9, %s12_s9  }
   0x2   : > { %p119_p1 = scmp.lt.s32.totalorder %s580_s9, 3 }
   0x4   : > { %p120_p2 = pnand %p518_p0, %p119_p1 }
   0x5   : > { %p142_p3 = scmp.lt.s32.totalorder (!%p120_p2), %s514_s10, 1  ;;  %s582_s15 = smov (!%p120_p2), 96  }
   0x6   : > { %123 = sbr.rel (%p120_p2) target bundleno = 1176 (0x498), region = 28  ;;  %s583_s16 = smov (!%p120_p2), 88  }
   0x7   : > { %s584_s17 = smov (!%p120_p2), 120   ;;  %s586_s21 = smov (!%p120_p2), 64  }
   0x8   : > { %s587_s22 = smov (!%p120_p2), 80   ;;  %s588_s23 = smov (!%p120_p2), 72  }
   0x9   : > { %s589_s24 = smov (!%p120_p2), 112   ;;  %s590_s25 = smov (!%p120_p2), 104  }
   0xa   : > { %s591_s26 = smov (!%p120_p2), 48   ;;  %s592_s27 = smov (!%p120_p2), 56  }
   0xb   : > { %s693_s10 = smov (!%p142_p3, %s514_s10), 1  ;;  %vm170_vm0 = vcmask 64512   ;;  %v155_v7 = vlaneseq  ;;  %v585_v8 = vmov 0   ;;  %s593_s28 = smov 40   ;;  %vm445_vm5 = vcmask 130048  }
   0xc   : > { %s519_s11 = sshll.u32 %s693_s10, 2  ;;  %s144_s20 = scalar_lea.vmem %s687_s0, %s693_s10  ;;  %vm447_vm6 = vcmask 195584   ;;  %vm450_vm7 = vcmask 257024  }
   0xd   : > { %s148_s14 = scalar_lea.vmem %s688_s1, %s519_s11  ;;  %v160_v6 = vld [vmem:[%s144_s20] sm:$0x1]  ;;  %v156_v10 = vshrl.u32 %v155_v7, 7  ;;  %v158_v11 = vand.u32 127, %v155_v7  ;;  %s594_s29 = smov 24  }
   0xe   : > { %v153_v0 = vld [vmem:[%s148_s14] sm:$0xf]  ;;  %vm161_vm1 = vcmp.gt.f32.partialorder %v160_v6, 0.5  ;;  %s595_s30 = smov 8   ;;  %s596_s3 = smov 16  }
   0xf   : > { %v628_v1 = vunpack.c.l.bf16 %v153_v0  ;;  %v162_v9 = vsel %vm161_vm1, 1, %v585_v8  ;;  %vm159_vm2 = vcmp.gt.s32.totalorder %v158_v11, %v156_v10  ;;  %s152_s6 = scalar_lea.vmem %s689_s2, %s519_s11 }
  0x10   : > { %v163_v12 = vperm.slane %v162_v9, 0 }
  0x11   : > { %168 = vrot.lane.b32.xlu0 %v628_v1, %s582_s15  ;;  %236 = vrot.lane.b32.xlu1 %v628_v1, %s583_s16  ;;  %v166_v3 = vmul.f32 0.35355338, %v628_v1 }
  0x12   : > { %vm164_vm3 = vcmp.eq.s32.totalorder %v163_v12, 1 }
  0x13   : > { %234 = vrot.lane.b32.xlu2 %v166_v3, %s584_s17  ;;  %vm641_vm4 = vmor %vm159_vm2, %vm164_vm3 }
  0x1b   : > { %208 = vrot.lane.b32.xlu2 %v628_v1, %s586_s21 }
  0x23   : > { %302 = vrot.lane.b32.xlu2 %v628_v1, %s587_s22 }
  0x2b   : > { %368 = vrot.lane.b32.xlu2 %v628_v1, %s588_s23 }
  0x33   : > { %300 = vrot.lane.b32.xlu2 %v166_v3, %s589_s24 }
  0x6d   : > { %v235_v5 = vpop.permute.xlu2 %234 }
  0x75   : > { %v209_v20 = vpop.permute.xlu2 %208 }
  0x76   : > { %229 = vmatpush.msra.mxu1 %v209_v20 }
  0x7d   : > { %v303_v25 = vpop.permute.xlu2 %302 }
  0x7e   : > { %527 = vmatpush.xpose.msk.msrb.mxu1 %vm170_vm0, %v303_v25 }
  0x83   : > { %v169_v2 = vpop.permute.xlu0 %168  ;;  %v237_v4 = vpop.permute.xlu1 %236 }
  0x84   : > { %521 = vmatpush.xpose.msk.msra.mxu0 %vm170_vm0, %v169_v2  ;;  %524 = vmatpush.xpose.msk.msra.mxu2 %vm170_vm0, %v237_v4 }
  0x85   : > { %v369_v27 = vpop.permute.xlu2 %368 }
  0x87   : > { %522 = vmatmul.msk.f32.vlgmr.msra.gmra.mxu0 %vm170_vm0, %v166_v3  ;;  %525 = vmatmul.msk.f32.vlgmr.msra.gmra.mxu2 %vm170_vm0, %v235_v5 }
  0x88   : > { %530 = vmatpush.xpose.msk.msrb.mxu0 %vm170_vm0, %v369_v27 }
  0x8d   : > { %v301_v31 = vpop.permute.xlu2 %300 }
 0x104   : > { %v193_v14 = vpop.f32.mrf.mxu0 }
 0x105   : > { %v196_v15 = vsel %vm641_vm4, -1e+30, %v193_v14 }
 0x106   : > { %v197_v16 = vsel %vm170_vm0, %v196_v15, -inf }
 0x107   : > { %198 = vmax.xlane.f32.xlu0 %v197_v16 }
 0x10a   : > { %v259_v23 = vpop.f32.mrf.mxu2 }
 0x10b   : > { %v262_v24 = vsel %vm641_vm4, -1e+30, %v259_v23 }
 0x10c   : > { %v263_v26 = vsel %vm170_vm0, %v262_v24, -inf }
 0x10d   : > { %264 = vmax.xlane.f32.xlu2 %v263_v26 }
 0x17a   : > { %v199_v17 = vpop.xlane.xlu0 %198 }
 0x17b   : > { %v200_v18 = vsub.f32 %v196_v15, %v199_v17 }
 0x17d   : > { %v201_v19 = vmul.f32 1.442695, %v200_v18 }
 0x17f   : > { %558 = vpow2.f32 %v201_v19 }
 0x180   : > { %v265_v34 = vpop.xlane.xlu2 %264 }
 0x181   : > { %v266_v35 = vsub.f32 %v262_v24, %v265_v34 }
 0x183   : > { %v267_v39 = vmul.f32 1.442695, %v266_v35 }
 0x185   : > { %v559_v21 = vpop.eup %558 }
 0x186   : > { %v203_v22 = vsel %vm170_vm0, %v559_v21, 0.0 }
 0x187   : > { %204 = vadd.xlane.f32.xlu1 %v203_v22 }
 0x1a0   : > { %366 = vrot.lane.b32.xlu1 %v166_v3, %s590_s25 }
 0x1fa   : > { %v205_v28 = vpop.xlane.xlu1 %204 }
 0x1fb   : > { %560 = vrcp.f32 %v205_v28 }
 0x1fc   : > { %562 = vpow2.f32 %v267_v39 }
 0x201   : > { %v561_v29 = vpop.eup %560 }
 0x202   : > { %v207_v30 = vmul.f32 %v561_v29, %v559_v21  ;;  %v563_v43 = vpop.eup %562 }
 0x203   : > { %v269_v44 = vsel %vm170_vm0, %v563_v43, 0.0 }
 0x204   : > { %523 = vmatmul.msk.f32.vlgmr.msra.gmra.mxu1 %vm170_vm0, %v207_v30 }
 0x20c   : > { %528 = vmatmul.msk.f32.vlgmr.msrb.gmra.mxu1 %vm170_vm0, %v301_v31 }
 0x212   : > { %v367_v32 = vpop.permute.xlu1 %366 }
 0x213   : > { %531 = vmatmul.msk.f32.vlgmr.msrb.gmra.mxu0 %vm170_vm0, %v367_v32 }
 0x281   : > { %v660_v33 = vpop.f32.mrf.mxu1 }
 0x289   : > { %v325_v36 = vpop.f32.mrf.mxu1 }
 0x28a   : > { %v328_v37 = vsel %vm641_vm4, -1e+30, %v325_v36 }
 0x28b   : > { %v329_v38 = vsel %vm170_vm0, %v328_v37, -inf }
 0x28c   : > { %330 = vmax.xlane.f32.xlu1 %v329_v38 }
 0x290   : > { %v391_v40 = vpop.f32.mrf.mxu0 }
 0x291   : > { %v394_v41 = vsel %vm641_vm4, -1e+30, %v391_v40 }
 0x292   : > { %v395_v42 = vsel %vm170_vm0, %v394_v41, -inf }
 0x293   : > { %396 = vmax.xlane.f32.xlu0 %v395_v42 }
 0x29b   : > { %270 = vadd.xlane.f32.xlu0 %v269_v44 }
 0x2a5   : > { %340 = vrot.lane.b32.xlu1 %v628_v1, %s591_s26 }
 0x2ff   : > { %v331_v45 = vpop.xlane.xlu1 %330 }
 0x300   : > { %v332_v46 = vsub.f32 %v328_v37, %v331_v45 }
 0x302   : > { %v333_v47 = vmul.f32 1.442695, %v332_v46 }
 0x304   : > { %564 = vpow2.f32 %v333_v47 }
 0x306   : > { %v397_v48 = vpop.xlane.xlu0 %396 }
 0x307   : > { %v398_v49 = vsub.f32 %v394_v41, %v397_v48 }
 0x309   : > { %v399_v50 = vmul.f32 1.442695, %v398_v49 }
 0x30a   : > { %v565_v51 = vpop.eup %564 }
 0x30b   : > { %566 = vpow2.f32 %v399_v50  ;;  %v335_v52 = vsel %vm170_vm0, %v565_v51, 0.0 }
 0x30c   : > { %336 = vadd.xlane.f32.xlu0 %v335_v52 }
 0x30e   : > { %v271_v55 = vpop.xlane.xlu0 %270 }
 0x311   : > { %v567_v53 = vpop.eup %566 }
 0x312   : > { %v401_v54 = vsel %vm170_vm0, %v567_v53, 0.0 }
 0x313   : > { %402 = vadd.xlane.f32.xlu2 %v401_v54 }
 0x317   : > { %v341_v63 = vpop.permute.xlu1 %340 }
 0x320   : > { %274 = vrot.lane.b32.xlu0 %v628_v1, %s592_s27 }
 0x32b   : > { %406 = vrot.lane.b32.xlu2 %v628_v1, %s593_s28 }
 0x37f   : > { %v337_v57 = vpop.xlane.xlu0 %336 }
 0x386   : > { %v403_v56 = vpop.xlane.xlu2 %402 }
 0x387   : > { %568 = vrcp.f32 %v403_v56 }
 0x388   : > { %570 = vrcp.f32 %v271_v55 }
 0x389   : > { %572 = vrcp.f32 %v337_v57 }
 0x38d   : > { %v569_v58 = vpop.eup %568 }
 0x38e   : > { %v407_v59 = vpop.permute.xlu2 %406  ;;  %v405_v60 = vmul.f32 %v569_v58, %v567_v53  ;;  %v571_v61 = vpop.eup %570 }
 0x38f   : > { %427 = vmatpush.msrb.mxu2 %v407_v59  ;;  %v273_v0 = vmul.f32 %v571_v61, %v563_v43  ;;  %v573_v1 = vpop.eup %572 }
 0x390   : > { %532 = vmatmul.msk.f32.vlgmr.msrb.gmra.mxu2 %vm170_vm0, %v405_v60  ;;  %v339_v2 = vmul.f32 %v573_v1, %v565_v51 }
 0x392   : > { %v275_v62 = vpop.permute.xlu0 %274 }
 0x393   : > { %295 = vmatpush.msra.mxu3 %v275_v62 }
 0x394   : > { %526 = vmatmul.msk.f32.vlgmr.msra.gmra.mxu3 %vm170_vm0, %v273_v0 }
 0x395   : > { %361 = vmatpush.msrb.mxu3 %v341_v63 }
 0x39c   : > { %529 = vmatmul.msk.f32.vlgmr.msrb.gmra.mxu3 %vm170_vm0, %v339_v2 }
 0x413   : > { %v429_v3 = vpop.f32.mrf.mxu2 }
 0x414   : > { %441 = vrot.lane.b32.xlu1 %v429_v3, %s594_s29 }
 0x417   : > { %v297_v4 = vpop.f32.mrf.mxu3 }
 0x418   : > { %433 = vrot.lane.b32.xlu0 %v297_v4, %s595_s30 }
 0x41f   : > { %v363_v5 = vpop.f32.mrf.mxu3 }
 0x420   : > { %437 = vrot.lane.b32.xlu0 %v363_v5, %s596_s3 }
 0x486   : > { %v442_v9 = vpop.permute.xlu1 %441 }
 0x48a   : > { %v434_v6 = vpop.permute.xlu0 %433 }
 0x48b   : > { %v444_v7 = vsel %vm170_vm0, %v660_v33, %v434_v6 }
 0x492   : > { %v438_v8 = vpop.permute.xlu0 %437 }
 0x493   : > { %v446_v10 = vsel %vm445_vm5, %v444_v7, %v438_v8 }
 0x494   : > { %v448_v11 = vsel %vm447_vm6, %v446_v10, %v442_v9 }
 0x495   : > { %v449_v12 = vpack.c.bf16 %v448_v11, %v448_v11 }
 0x497   : > { %451 = vst.msk [vmem:[%s152_s6] sm:$0xf] %vm450_vm7, %v449_v12 }
 0x498 PF: > { %s12_s9 = sadd.s32 1, %s580_s9  }
 0x499   : > { %p9_p4 = scmp.ge.s32.totalorder %s12_s9, 4  }
 0x49b   :  { %11 = sbr.rel (!%p9_p4) target bundleno = 1 (0x1), region = 61 }

// kernel: transformer2d_forward.41
= control target key start
LH: loop header
LB: loop body
LE: loop exit
PB: predicated region body
PF: predicated region fallthrough
CT: control target
= control target key end

     0   :  { %vm19_vm0 = vcmask 785408   ;;  %v108_v1 = vmov 0.0   ;;  %vm47_vm1 = vcmask 261120   ;;  %vm83_vm2 = vcmask 781312   ;;  %s151_s1 = inlined_call_operand.vmem [shape: bf16[32,96], index: 1, kind: input, shape index: {}]   ;;  %s152_s2 = inlined_call_operand.vmem [shape: f32[1,96], index: 2, kind: input, shape index: {}]   ;;  %s153_s0 = inlined_call_operand.vmem [shape: bf16[16,32], index: 0, kind: input, shape index: {}]   ;;  %s154_s3 = inlined_call_operand.vmem [shape: bf16[16,96], index: 3, kind: output, shape index: {}]  }
   0x1   :  { %v105_v0 = vld [vmem:[%s151_s1 + $0x8] sm:$0xff]  ;;  %20 = vst.msk [vmem:[#allocation2] sm:$0xff] %vm19_vm0, %v108_v1  ;;  %v104_v2 = vld [vmem:[%s151_s1] sm:$0xff] }
   0x2   :  { %21 = vst.msk [vmem:[#allocation2 + $0x8] sm:$0xff] %vm19_vm0, %v108_v1  ;;  %57 = vmatpush.bf16.msra.mxu0 %v105_v0  ;;  %v103_v3 = vld [vmem:[%s153_s0] sm:$0xff] }
   0x3   :  { %v107_v8 = vld [vmem:[%s152_s2] ss:$0 sm:$0xff] }
   0x6   :  { %58 = vmatpush.bf16.msra.mxu0 %v104_v2 }
   0x8   :  { %v22_v4 = vld [vmem:[#allocation2] sm:$0xff] }
   0x9   :  { %102 = vmatmul.msk.bf16.vlgmr.msra.gmra.mxu0 %vm47_vm1, %v103_v3  ;;  %v23_v7 = vld [vmem:[#allocation2 + $0x8] sm:$0xff] }
  0x86   :  { %v60_v5 = vpop.f32.mrf.mxu0 }
  0x87   :  { %v65_v6 = vadd.f32 %v60_v5, %v22_v4 }
  0x89   :  { %68 = vst.msk [vmem:[#allocation2] sm:$0xff] %vm19_vm0, %v65_v6 }
  0x8e   :  { %v62_v9 = vpop.f32.mrf.mxu0 }
  0x8f   :  { %v66_v10 = vadd.f32 %v62_v9, %v23_v7 }
  0x90   :  { %v73_v11 = vld [vmem:[#allocation2] sm:$0xff] }
  0x91   :  { %v79_v12 = vadd.f32 %v107_v8, %v73_v11  ;;  %69 = vst.msk [vmem:[#allocation2 + $0x8] sm:$0xff] %vm19_vm0, %v66_v10 }
  0x93   :  { %v81_v13 = vpack.c.bf16 %v79_v12, %v79_v12 }
  0x95   :  { %84 = vst.msk [vmem:[%s154_s3] sm:$0xf] %vm83_vm2, %v81_v13 }
  0x98   :  { %v74_v14 = vld [vmem:[#allocation2 + $0x8] sm:$0xff] }
  0x99   :  { %v80_v15 = vadd.f32 %v107_v8, %v74_v14 }
  0x9b   :  { %v82_v16 = vpack.c.bf16 %v80_v15, %v80_v15 }
  0x9d   :  { %85 = vst.msk [vmem:[%s154_s3 + $0x4] sm:$0xf] %vm83_vm2, %v82_v16 }

// kernel: transformer2d_forward.48
= control target key start
LH: loop header
LB: loop body
LE: loop exit
PB: predicated region body
PF: predicated region fallthrough
CT: control target
= control target key end

     0   :  { %vm19_vm0 = vcmask 523264   ;;  %v110_v1 = vmov 0.0   ;;  %vm47_vm1 = vcmask 261120   ;;  %vm85_vm2 = vcmask 519168   ;;  %s153_s1 = inlined_call_operand.vmem [shape: bf16[32,64], index: 1, kind: input, shape index: {}]   ;;  %s154_s2 = inlined_call_operand.vmem [shape: f32[1,64], index: 2, kind: input, shape index: {}]   ;;  %s155_s0 = inlined_call_operand.vmem [shape: bf16[16,32], index: 0, kind: input, shape index: {}]   ;;  %s156_s3 = inlined_call_operand.vmem [shape: bf16[16,64], index: 3, kind: output, shape index: {}]  }
   0x1   :  { %v107_v0 = vld [vmem:[%s153_s1 + $0x8] sm:$0xff]  ;;  %20 = vst.msk [vmem:[#allocation2] sm:$0xff] %vm19_vm0, %v110_v1  ;;  %v106_v2 = vld [vmem:[%s153_s1] sm:$0xff] }
   0x2   :  { %21 = vst.msk [vmem:[#allocation2 + $0x8] sm:$0xff] %vm19_vm0, %v110_v1  ;;  %57 = vmatpush.bf16.msra.mxu0 %v107_v0  ;;  %v105_v3 = vld [vmem:[%s155_s0] sm:$0xff] }
   0x3   :  { %v109_v8 = vld [vmem:[%s154_s2] ss:$0 sm:$0xff] }
   0x6   :  { %58 = vmatpush.bf16.msra.mxu0 %v106_v2 }
   0x8   :  { %v22_v4 = vld [vmem:[#allocation2] sm:$0xff] }
   0x9   :  { %104 = vmatmul.msk.bf16.vlgmr.msra.gmra.mxu0 %vm47_vm1, %v105_v3  ;;  %v23_v7 = vld [vmem:[#allocation2 + $0x8] sm:$0xff] }
  0x86   :  { %v60_v5 = vpop.f32.mrf.mxu0 }
  0x87   :  { %v65_v6 = vadd.f32 %v60_v5, %v22_v4 }
  0x89   :  { %68 = vst.msk [vmem:[#allocation2] sm:$0xff] %vm19_vm0, %v65_v6 }
  0x8e   :  { %v62_v9 = vpop.f32.mrf.mxu0 }
  0x8f   :  { %v66_v10 = vadd.f32 %v62_v9, %v23_v7 }
  0x90   :  { %v73_v11 = vld [vmem:[#allocation2] sm:$0xff] }
  0x91   :  { %v79_v12 = vadd.f32 %v109_v8, %v73_v11  ;;  %69 = vst.msk [vmem:[#allocation2 + $0x8] sm:$0xff] %vm19_vm0, %v66_v10 }
  0x93   :  { %v81_v13 = vmax.f32 %v79_v12, 0.0 }
  0x95   :  { %v83_v14 = vpack.c.bf16 %v81_v13, %v81_v13 }
  0x97   :  { %86 = vst.msk [vmem:[%s156_s3] sm:$0xf] %vm85_vm2, %v83_v14 }
  0x98   :  { %v74_v15 = vld [vmem:[#allocation2 + $0x8] sm:$0xff] }
  0x99   :  { %v80_v16 = vadd.f32 %v109_v8, %v74_v15 }
  0x9b   :  { %v82_v17 = vmax.f32 %v80_v16, 0.0 }
  0x9d   :  { %v84_v18 = vpack.c.bf16 %v82_v17, %v82_v17 }
  0x9f   :  { %87 = vst.msk [vmem:[%s156_s3 + $0x4] sm:$0xf] %vm85_vm2, %v84_v18 }

// kernel: transformer2d_forward.59
= control target key start
LH: loop header
LB: loop body
LE: loop exit
PB: predicated region body
PF: predicated region fallthrough
CT: control target
= control target key end

     0   :  { %vm46_vm0 = vcmask 261120   ;;  %s140_s1 = inlined_call_operand.vmem [shape: bf16[32,128], index: 1, kind: input, shape index: {}]   ;;  %s141_s2 = inlined_call_operand.vmem [shape: f32[1,128], index: 2, kind: input, shape index: {}]   ;;  %s142_s0 = inlined_call_operand.vmem [shape: bf16[16,32], index: 0, kind: input, shape index: {}]   ;;  %s143_s3 = inlined_call_operand.vmem [shape: f32[16,128], index: 3, kind: output, shape index: {}]  }
   0x1   :  { %v100_v0 = vld [vmem:[%s140_s1 + $0x8] sm:$0xff]  ;;  %v99_v1 = vld [vmem:[%s140_s1] sm:$0xff] }
   0x2   :  { %56 = vmatpush.bf16.msra.mxu0 %v100_v0  ;;  %v98_v2 = vld [vmem:[%s142_s0] sm:$0xff] }
   0x3   :  { %v101_v3 = vld [vmem:[%s141_s2] ss:$0 sm:$0xff] }
   0x6   :  { %57 = vmatpush.bf16.msra.mxu0 %v99_v1 }
   0x9   :  { %97 = vmatmul.msk.bf16.vlgmr.msra.gmra.mxu0 %vm46_vm0, %v98_v2 }
  0x86   :  { %v59_v4 = vpop.f32.mrf.mxu0 }
  0x87   :  { %v77_v5 = vadd.f32 %v101_v3, %v59_v4 }
  0x89   :  { %79 = vst [vmem:[%s143_s3] sm:$0xff] %v77_v5 }
  0x8e   :  { %v61_v6 = vpop.f32.mrf.mxu0 }
  0x8f   :  { %v78_v7 = vadd.f32 %v101_v3, %v61_v6 }
  0x91   :  { %80 = vst [vmem:[%s143_s3 + $0x8] sm:$0xff] %v78_v7 }

// kernel: transformer2d_forward.49
= control target key start
LH: loop header
LB: loop body
LE: loop exit
PB: predicated region body
PF: predicated region fallthrough
CT: control target
= control target key end

     0   :  { %vm28_vm0 = vcmask 261120   ;;  %v225_v1 = vmov 0.0   ;;  %vm72_vm1 = vcmask 523264   ;;  %v226_v24 = vmov 32.0   ;;  %s303_s1 = inlined_call_operand.vmem [shape: bf16[64,32], index: 1, kind: input, shape index: {}]   ;;  %s304_s0 = inlined_call_operand.vmem [shape: bf16[16,64], index: 0, kind: input, shape index: {}]   ;;  %s305_s2 = inlined_call_operand.vmem [shape: f32[1,32], index: 2, kind: input, shape index: {}]   ;;  %s306_s3 = inlined_call_operand.vmem [shape: bf16[16,32], index: 3, kind: input, shape index: {}]   ;;  %s307_s4 = inlined_call_operand.vmem [shape: f32[1,32], index: 4, kind: input, shape index: {}]   ;;  %s308_s5 = inlined_call_operand.vmem [shape: f32[1,32], index: 5, kind: input, shape index: {}]   ;;  %s309_s6 = inlined_call_operand.vmem [shape: bf16[16,32], index: 6, kind: output, shape index: {}]  }
   0x1   :  { %v209_v0 = vld [vmem:[%s303_s1 + $0x18] sm:$0xff]  ;;  %29 = vst.msk [vmem:[#allocation2] sm:$0xff] %vm28_vm0, %v225_v1  ;;  %v208_v2 = vld [vmem:[%s303_s1 + $0x10] sm:$0xff]  ;;  %v207_v3 = vld [vmem:[%s303_s1 + $0x8] sm:$0xff]  ;;  %219 = vrcp.f32 %v226_v24  ;;  %vm177_vm7 = vcmask 257024  }
   0x2   :  { %30 = vst.msk [vmem:[#allocation2 + $0x8] sm:$0xff] %vm28_vm0, %v225_v1  ;;  %80 = vmatpush.bf16.msra.mxu0 %v209_v0  ;;  %v206_v4 = vld [vmem:[%s303_s1] sm:$0xff] }
   0x3   :  { %v205_v5 = vld [vmem:[%s304_s0] sm:$0xff] }
   0x4   :  { %v211_v10 = vld [vmem:[%s306_s3] sm:$0xff]  }
   0x5   :  { %v216_v11 = vld [vmem:[%s305_s2] ss:$0 sm:$0xff]  ;;  %v212_v14 = vunpack.c.l.bf16 %v211_v10  ;;  %v213_v19 = vunpack.c.h.bf16 %v211_v10 }
   0x6   :  { %81 = vmatpush.bf16.msra.mxu0 %v208_v2  ;;  %v217_v55 = vld [vmem:[%s307_s4] ss:$0 sm:$0xff] }
   0x7   :  { %v220_v25 = vpop.eup %219  ;;  %v218_v58 = vld [vmem:[%s308_s5] ss:$0 sm:$0xff] }
   0x8   :  { %v31_v6 = vld [vmem:[#allocation2] sm:$0xff]  ;;  %v119_v26 = vmul.f32 32.0, %v220_v25  ;;  %vm123_vm2 = vweird.f32 %v220_v25 }
   0x9   :  { %v32_v9 = vld [vmem:[#allocation2 + $0x8] sm:$0xff] }
   0xa   :  { %82 = vmatpush.bf16.msra.mxu0 %v207_v3  ;;  %v120_v27 = vsub.f32 1.0, %v119_v26 }
   0xc   :  { %v121_v28 = vmul.f32 %v220_v25, %v120_v27 }
   0xe   :  { %83 = vmatpush.bf16.msra.mxu0 %v206_v4  ;;  %v122_v29 = vadd.f32 %v220_v25, %v121_v28 }
  0x10   :  { %v124_v30 = vsel %vm123_vm2, %v220_v25, %v122_v29 }
  0x11   :  { %204 = vmatmul.msk.bf16.vlgmr.msra.gmra.mxu0 %vm72_vm1, %v205_v5 }
  0x8e   :  { %v85_v7 = vpop.f32.mrf.mxu0 }
  0x8f   :  { %v90_v8 = vadd.f32 %v85_v7, %v31_v6 }
  0x91   :  { %93 = vst.msk [vmem:[#allocation2] sm:$0xff] %vm28_vm0, %v90_v8 }
  0x96   :  { %v87_v12 = vpop.f32.mrf.mxu0 }
  0x97   :  { %v91_v13 = vadd.f32 %v87_v12, %v32_v9 }
  0x98   :  { %v98_v15 = vld [vmem:[#allocation2] sm:$0xff] }
  0x99   :  { %94 = vst.msk [vmem:[#allocation2 + $0x8] sm:$0xff] %vm28_vm0, %v91_v13  ;;  %v104_v16 = vadd.f32 %v216_v11, %v98_v15 }
  0x9b   :  { %v110_v17 = vadd.f32 %v212_v14, %v104_v16 }
  0x9d   :  { %v112_v18 = vsel %vm28_vm0, %v110_v17, 0.0 }
  0x9e   :  { %113 = vadd.xlane.f32.xlu0 %v112_v18 }
  0xa0   :  { %v99_v20 = vld [vmem:[#allocation2 + $0x8] sm:$0xff] }
  0xa1   :  { %v105_v21 = vadd.f32 %v216_v11, %v99_v20 }
  0xa3   :  { %v111_v22 = vadd.f32 %v213_v19, %v105_v21 }
  0xa5   :  { %v115_v23 = vsel %vm28_vm0, %v111_v22, 0.0 }
  0xa6   :  { %116 = vadd.xlane.f32.xlu0 %v115_v23 }
 0x111   :  { %v114_v31 = vpop.xlane.xlu0 %113 }
 0x112   :  { %v125_v32 = vmul.f32 %v124_v30, %v114_v31 }
 0x114   :  { %v127_v33 = vsub.f32 %v110_v17, %v125_v32 }
 0x116   :  { %v129_v34 = vmul.f32 %v127_v33, %v127_v33 }
 0x118   :  { %v131_v35 = vsel %vm28_vm0, %v129_v34, 0.0 }
 0x119   :  { %132 = vadd.xlane.f32.xlu1 %v131_v35  ;;  %v117_v36 = vpop.xlane.xlu0 %116 }
 0x11a   :  { %v126_v37 = vmul.f32 %v124_v30, %v117_v36 }
 0x11c   :  { %v128_v38 = vsub.f32 %v111_v22, %v126_v37 }
 0x11e   :  { %v130_v39 = vmul.f32 %v128_v38, %v128_v38 }
 0x120   :  { %v134_v40 = vsel %vm28_vm0, %v130_v39, 0.0 }
 0x121   :  { %135 = vadd.xlane.f32.xlu1 %v134_v40 }
 0x18c   :  { %v133_v41 = vpop.xlane.xlu1 %132 }
 0x18d   :  { %v137_v42 = vmul.f32 %v133_v41, %v124_v30 }
 0x18f   :  { %v139_v43 = vadd.f32 1e-05, %v137_v42 }
 0x191   :  { %221 = vrsqrt.f32 %v139_v43  ;;  %vm147_vm4 = vweird.f32 %v139_v43 }
 0x194   :  { %v136_v44 = vpop.xlane.xlu1 %135 }
 0x195   :  { %v138_v45 = vmul.f32 %v136_v44, %v124_v30 }
 0x197   :  { %v222_v46 = vpop.eup %221  ;;  %v140_v47 = vadd.f32 1e-05, %v138_v45 }
 0x198   :  { %v142_v48 = vmul.f32 %v222_v46, %v139_v43  ;;  %vm148_vm3 = vweird.f32 %v222_v46 }
 0x199   :  { %223 = vrsqrt.f32 %v140_v47  ;;  %vm149_vm5 = vmor %vm147_vm4, %vm148_vm3  ;;  %vm157_vm8 = vweird.f32 %v140_v47 }
 0x19a   :  { %v143_v49 = vmul.f32 %v222_v46, %v142_v48 }
 0x19c   :  { %v144_v50 = vmul.f32 0.5, %v143_v49 }
 0x19e   :  { %v145_v51 = vsub.f32 1.5, %v144_v50 }
 0x19f   :  { %v224_v52 = vpop.eup %223 }
 0x1a0   :  { %v146_v53 = vmul.f32 %v222_v46, %v145_v51  ;;  %v152_v54 = vmul.f32 %v224_v52, %v140_v47  ;;  %vm158_vm6 = vweird.f32 %v224_v52 }
 0x1a1   :  { %vm159_vm9 = vmor %vm157_vm8, %vm158_vm6 }
 0x1a2   :  { %v150_v56 = vsel %vm149_vm5, %v222_v46, %v146_v53  ;;  %v153_v57 = vmul.f32 %v224_v52, %v152_v54 }
 0x1a3   :  { %v161_v59 = vmul.f32 %v150_v56, %v127_v33 }
 0x1a4   :  { %v154_v60 = vmul.f32 0.5, %v153_v57 }
 0x1a5   :  { %v167_v61 = vmul.f32 %v217_v55, %v161_v59 }
 0x1a6   :  { %v155_v62 = vsub.f32 1.5, %v154_v60 }
 0x1a7   :  { %v173_v63 = vadd.f32 %v218_v58, %v167_v61 }
 0x1a8   :  { %v156_v0 = vmul.f32 %v224_v52, %v155_v62 }
 0x1a9   :  { %v175_v1 = vpack.c.bf16 %v173_v63, %v173_v63 }
 0x1aa   :  { %v160_v2 = vsel %vm159_vm9, %v224_v52, %v156_v0 }
 0x1ab   :  { %178 = vst.msk [vmem:[%s309_s6] sm:$0xf] %vm177_vm7, %v175_v1  ;;  %v162_v3 = vmul.f32 %v160_v2, %v128_v38 }
 0x1ad   :  { %v168_v4 = vmul.f32 %v217_v55, %v162_v3 }
 0x1af   :  { %v174_v5 = vadd.f32 %v218_v58, %v168_v4 }
 0x1b1   :  { %v176_v6 = vpack.c.bf16 %v174_v5, %v174_v5 }
 0x1b3   :  { %179 = vst.msk [vmem:[%s309_s6 + $0x4] sm:$0xf] %vm177_vm7, %v176_v6 }

// kernel: transformer2d_forward.46
= control target key start
LH: loop header
LB: loop body
LE: loop exit
PB: predicated region body
PF: predicated region fallthrough
CT: control target
= control target key end

     0   :  { %s671_s9 = smov 0   ;;  %s737_s0 = inlined_call_operand.vmem [shape: bf16[2,8,32], index: 0, kind: input, shape index: {}]   ;;  %s738_s1 = inlined_call_operand.vmem [shape: bf16[2,16,64], index: 1, kind: input, shape index: {}]   ;;  %s739_s2 = inlined_call_operand.vmem [shape: bf16[2,8,32], index: 2, kind: output, shape index: {}]  }
   0x1 LB: > { %s537_s10 = sadd.s32 4294967295, %s644_s9   ;;  %p541_p0 = scmp.ge.s32.totalorder %s644_s9, 1  ;;  %s644_s9 = sphi %s671_s9, %s12_s9  }
   0x2   : > { %p121_p1 = scmp.lt.s32.totalorder %s644_s9, 3 }
   0x4   : > { %p122_p2 = pnand %p541_p0, %p121_p1 }
   0x5   : > { %p146_p3 = scmp.lt.s32.totalorder (!%p122_p2), %s537_s10, 1  ;;  %s646_s19 = smov (!%p122_p2), 96  }
   0x6   : > { %125 = sbr.rel (%p122_p2) target bundleno = 1068 (0x42c), region = 28  ;;  %s647_s20 = smov (!%p122_p2), 112  }
   0x7   : > { %s648_s21 = smov (!%p122_p2), 104   ;;  %s649_s22 = smov (!%p122_p2), 120  }
   0x8   : > { %s650_s23 = smov (!%p122_p2), 88   ;;  %s651_s24 = smov (!%p122_p2), 80  }
   0x9   : > { %s652_s25 = smov (!%p122_p2), 72   ;;  %s653_s26 = smov (!%p122_p2), 8  }
   0xa   : > { %s654_s27 = smov (!%p122_p2), 16   ;;  %s655_s28 = smov (!%p122_p2), 24  }
   0xb   : > { %s741_s10 = smov (!%p146_p3, %s537_s10), 1  ;;  %vm166_vm0 = vcmask 64512   ;;  %vm196_vm1 = vcmask 130048   ;;  %vm467_vm2 = vcmask 195584   ;;  %vm470_vm3 = vcmask 257024  }
   0xc   : > { %s564_s11 = sshll.u32 %s741_s10, 3  ;;  %s542_s12 = sshll.u32 %s741_s10, 2 }
   0xd   : > { %s154_s15 = scalar_lea.vmem %s738_s1, %s564_s11  ;;  %s149_s18 = scalar_lea.vmem %s737_s0, %s542_s12 }
   0xe   : > { %v566_v0 = vld [vmem:[%s154_s15] sm:$0xff]   ;;  %s158_s3 = scalar_lea.vmem %s739_s2, %s542_s12 }
   0xf   : > { %v159_v1 = vld [vmem:[%s149_s18] sm:$0xf]  ;;  %v568_v2 = vunpack.c.h.bf16 %v566_v0  ;;  %v567_v4 = vunpack.c.l.bf16 %v566_v0 }
  0x10   : > { %v160_v3 = vunpack.c.l.bf16 %v159_v1 }
  0x11   : > { %546 = vmatpush.xpose.msk.msra.mxu0 %vm166_vm0, %v568_v2  ;;  %v694_v6 = vpack.i.bf16 %v567_v4, %v568_v2 }
  0x12   : > { %v165_v5 = vmul.f32 0.35355338, %v160_v3 }
  0x13   : > { %593 = vrot.lane.b32.xlu2 %v694_v6, %s646_s19 }
  0x15   : > { %547 = vmatpush.xpose.msk.msra.mxu0 %vm166_vm0, %v567_v4 }
  0x18   : > { %548 = vmatmul.msk.f32.vlgmr.msra.gmra.mxu0 %vm166_vm0, %v165_v5 }
  0x1b   : > { %598 = vrot.lane.b32.xlu2 %v694_v6, %s647_s20 }
  0x23   : > { %603 = vrot.lane.b32.xlu2 %v694_v6, %s648_s21 }
  0x2b   : > { %309 = vrot.lane.b32.xlu2 %v165_v5, %s647_s20 }
  0x6d   : > { %v594_v9 = vpop.permute.xlu2 %593 }
  0x6e   : > { %v595_v21 = vunpack.i.l.bf16 %v594_v9  ;;  %v596_v22 = vunpack.i.h.bf16 %v594_v9 }
  0x70   : > { %231 = vmatpush.msra.mxu1 %v595_v21 }
  0x72   : > { %232 = vmatpush.msra.mxu1 %v596_v22 }
  0x75   : > { %v599_v10 = vpop.permute.xlu2 %598 }
  0x76   : > { %v600_v23 = vunpack.i.l.bf16 %v599_v10  ;;  %v601_v24 = vunpack.i.h.bf16 %v599_v10 }
  0x78   : > { %554 = vmatpush.xpose.msk.msrb.mxu1 %vm166_vm0, %v600_v23 }
  0x7c   : > { %555 = vmatpush.xpose.msk.msrb.mxu1 %vm166_vm0, %v601_v24 }
  0x7d   : > { %v604_v14 = vpop.permute.xlu2 %603 }
  0x7e   : > { %v605_v15 = vunpack.i.l.bf16 %v604_v14  ;;  %v606_v16 = vunpack.i.h.bf16 %v604_v14 }
  0x80   : > { %558 = vmatpush.xpose.msk.msrb.mxu0 %vm166_vm0, %v605_v15 }
  0x84   : > { %559 = vmatpush.xpose.msk.msrb.mxu0 %vm166_vm0, %v606_v16 }
  0x85   : > { %v310_v30 = vpop.permute.xlu2 %309 }
  0x95   : > { %v193_v7 = vpop.f32.mrf.mxu0 }
  0x96   : > { %v197_v8 = vsel %vm196_vm1, %v193_v7, -inf }
  0x97   : > { %198 = vmax.xlane.f32.xlu0 %v197_v8 }
  0xab   : > { %588 = vrot.lane.b32.xlu0 %v694_v6, %s649_s22 }
  0xb3   : > { %381 = vrot.lane.b32.xlu0 %v165_v5, %s648_s21 }
 0x10a   : > { %v199_v11 = vpop.xlane.xlu0 %198 }
 0x10b   : > { %v200_v12 = vsub.f32 %v193_v7, %v199_v11 }
 0x10d   : > { %v201_v13 = vmul.f32 1.442695, %v200_v12 }
 0x10f   : > { %622 = vpow2.f32 %v201_v13 }
 0x115   : > { %v623_v17 = vpop.eup %622 }
 0x116   : > { %v203_v18 = vsel %vm196_vm1, %v623_v17, 0.0 }
 0x117   : > { %204 = vadd.xlane.f32.xlu1 %v203_v18 }
 0x11d   : > { %v589_v19 = vpop.permute.xlu0 %588 }
 0x11e   : > { %v590_v25 = vunpack.i.l.bf16 %v589_v19  ;;  %v591_v26 = vunpack.i.h.bf16 %v589_v19 }
 0x120   : > { %550 = vmatpush.xpose.msk.msra.mxu2 %vm166_vm0, %v590_v25 }
 0x124   : > { %551 = vmatpush.xpose.msk.msra.mxu2 %vm166_vm0, %v591_v26 }
 0x125   : > { %v382_v20 = vpop.permute.xlu0 %381 }
 0x126   : > { %560 = vmatmul.msk.f32.vlgmr.msrb.gmra.mxu0 %vm166_vm0, %v382_v20 }
 0x130   : > { %237 = vrot.lane.b32.xlu1 %v165_v5, %s649_s22 }
 0x18a   : > { %v205_v27 = vpop.xlane.xlu1 %204 }
 0x18b   : > { %624 = vrcp.f32 %v205_v27 }
 0x191   : > { %v625_v28 = vpop.eup %624 }
 0x192   : > { %v207_v29 = vmul.f32 %v625_v28, %v623_v17 }
 0x194   : > { %549 = vmatmul.msk.f32.vlgmr.msra.gmra.mxu1 %vm196_vm1, %v207_v29 }
 0x19c   : > { %556 = vmatmul.msk.f32.vlgmr.msrb.gmra.mxu1 %vm166_vm0, %v310_v30 }
 0x1a2   : > { %v238_v31 = vpop.permute.xlu1 %237 }
 0x1a3   : > { %552 = vmatmul.msk.f32.vlgmr.msra.gmra.mxu2 %vm166_vm0, %v238_v31  ;;  %v410_v32 = vpop.f32.mrf.mxu0 }
 0x1a4   : > { %v413_v33 = vsel %vm196_vm1, %v410_v32, -inf }
 0x1a5   : > { %414 = vmax.xlane.f32.xlu0 %v413_v33 }
 0x211   : > { %v713_v34 = vpop.f32.mrf.mxu1 }
 0x218   : > { %v415_v44 = vpop.xlane.xlu0 %414 }
 0x219   : > { %v338_v35 = vpop.f32.mrf.mxu1  ;;  %v416_v47 = vsub.f32 %v410_v32, %v415_v44 }
 0x21a   : > { %v341_v36 = vsel %vm196_vm1, %v338_v35, -inf }
 0x21b   : > { %342 = vmax.xlane.f32.xlu1 %v341_v36  ;;  %v417_v49 = vmul.f32 1.442695, %v416_v47 }
 0x226   : > { %v266_v37 = vpop.f32.mrf.mxu2 }
 0x227   : > { %v269_v38 = vsel %vm196_vm1, %v266_v37, -inf }
 0x228   : > { %270 = vmax.xlane.f32.xlu2 %v269_v38 }
 0x234   : > { %608 = vrot.lane.b32.xlu1 %v694_v6, %s650_s23 }
 0x28e   : > { %v343_v39 = vpop.xlane.xlu1 %342 }
 0x28f   : > { %v344_v40 = vsub.f32 %v338_v35, %v343_v39 }
 0x291   : > { %v345_v41 = vmul.f32 1.442695, %v344_v40 }
 0x293   : > { %626 = vpow2.f32 %v345_v41 }
 0x299   : > { %v627_v42 = vpop.eup %626 }
 0x29a   : > { %v347_v43 = vsel %vm196_vm1, %v627_v42, 0.0 }
 0x29b   : > { %348 = vadd.xlane.f32.xlu0 %v347_v43  ;;  %v271_v45 = vpop.xlane.xlu2 %270 }
 0x29c   : > { %v272_v46 = vsub.f32 %v266_v37, %v271_v45 }
 0x29e   : > { %v273_v48 = vmul.f32 1.442695, %v272_v46 }
 0x2a0   : > { %628 = vpow2.f32 %v273_v48 }
 0x2a1   : > { %630 = vpow2.f32 %v417_v49 }
 0x2a6   : > { %v629_v50 = vpop.eup %628  ;;  %v609_v54 = vpop.permute.xlu1 %608 }
 0x2a7   : > { %v275_v51 = vsel %vm196_vm1, %v629_v50, 0.0  ;;  %v631_v52 = vpop.eup %630  ;;  %v610_v55 = vunpack.i.l.bf16 %v609_v54  ;;  %v611_v56 = vunpack.i.h.bf16 %v609_v54 }
 0x2a8   : > { %276 = vadd.xlane.f32.xlu2 %v275_v51  ;;  %v419_v53 = vsel %vm196_vm1, %v631_v52, 0.0 }
 0x2a9   : > { %303 = vmatpush.msra.mxu3 %v610_v55 }
 0x2ab   : > { %304 = vmatpush.msra.mxu3 %v611_v56 }
 0x2af   : > { %613 = vrot.lane.b32.xlu0 %v694_v6, %s651_s24 }
 0x2b0   : > { %420 = vadd.xlane.f32.xlu2 %v419_v53 }
 0x2c8   : > { %618 = vrot.lane.b32.xlu2 %v694_v6, %s652_s25 }
 0x30e   : > { %v349_v57 = vpop.xlane.xlu0 %348 }
 0x31b   : > { %v277_v58 = vpop.xlane.xlu2 %276 }
 0x31c   : > { %632 = vrcp.f32 %v277_v58 }
 0x31d   : > { %634 = vrcp.f32 %v349_v57 }
 0x321   : > { %v614_v59 = vpop.permute.xlu0 %613 }
 0x322   : > { %v633_v60 = vpop.eup %632  ;;  %v615_v61 = vunpack.i.l.bf16 %v614_v59  ;;  %v616_v62 = vunpack.i.h.bf16 %v614_v59 }
 0x323   : > { %v421_v63 = vpop.xlane.xlu2 %420  ;;  %v279_v0 = vmul.f32 %v633_v60, %v629_v50  ;;  %v635_v1 = vpop.eup %634 }
 0x324   : > { %375 = vmatpush.msrb.mxu3 %v615_v61  ;;  %636 = vrcp.f32 %v421_v63  ;;  %v351_v3 = vmul.f32 %v635_v1, %v627_v42 }
 0x325   : > { %553 = vmatmul.msk.f32.vlgmr.msra.gmra.mxu3 %vm196_vm1, %v279_v0 }
 0x326   : > { %376 = vmatpush.msrb.mxu3 %v616_v62 }
 0x32a   : > { %v637_v4 = vpop.eup %636 }
 0x32b   : > { %v619_v2 = vpop.permute.xlu2 %618  ;;  %v423_v7 = vmul.f32 %v637_v4, %v631_v52 }
 0x32c   : > { %v620_v5 = vunpack.i.l.bf16 %v619_v2  ;;  %v621_v6 = vunpack.i.h.bf16 %v619_v2 }
 0x32d   : > { %557 = vmatmul.msk.f32.vlgmr.msrb.gmra.mxu3 %vm196_vm1, %v351_v3 }
 0x32e   : > { %447 = vmatpush.msrb.mxu2 %v620_v5 }
 0x330   : > { %448 = vmatpush.msrb.mxu2 %v621_v6 }
 0x331   : > { %561 = vmatmul.msk.f32.vlgmr.msrb.gmra.mxu2 %vm196_vm1, %v423_v7 }
 0x3a8   : > { %v306_v8 = vpop.f32.mrf.mxu3 }
 0x3a9   : > { %454 = vrot.lane.b32.xlu1 %v306_v8, %s653_s26 }
 0x3b0   : > { %v378_v9 = vpop.f32.mrf.mxu3 }
 0x3b1   : > { %458 = vrot.lane.b32.xlu0 %v378_v9, %s654_s27 }
 0x3b4   : > { %v450_v10 = vpop.f32.mrf.mxu2 }
 0x3b5   : > { %462 = vrot.lane.b32.xlu1 %v450_v10, %s655_s28 }
 0x41b   : > { %v455_v11 = vpop.permute.xlu1 %454 }
 0x41c   : > { %v465_v13 = vsel %vm166_vm0, %v713_v34, %v455_v11 }
 0x423   : > { %v459_v12 = vpop.permute.xlu0 %458 }
 0x424   : > { %v466_v14 = vsel %vm196_vm1, %v465_v13, %v459_v12 }
 0x427   : > { %v463_v15 = vpop.permute.xlu1 %462 }
 0x428   : > { %v468_v16 = vsel %vm467_vm2, %v466_v14, %v463_v15 }
 0x429   : > { %v469_v17 = vpack.c.bf16 %v468_v16, %v468_v16 }
 0x42b   : > { %471 = vst.msk [vmem:[%s158_s3] sm:$0xf] %vm470_vm3, %v469_v17 }
 0x42c PF: > { %s12_s9 = sadd.s32 1, %s644_s9  }
 0x42d   : > { %p9_p4 = scmp.ge.s32.totalorder %s12_s9, 4  }
 0x42f   :  { %11 = sbr.rel (!%p9_p4) target bundleno = 1 (0x1), region = 61 }

</bundles_post_ra>
